<compile_context>
chip_gen: v5e
topology: v5e:2x2
jax: 0.10.0
libtpu: 0.0.40
codegen_flags: <defaults>
</compile_context>

<pallas_src>
import functools

import jax
import jax.numpy as jnp
from jax.experimental import pallas as pl
from jax.experimental.pallas import tpu as pltpu

DEFAULT_WEIGHTS_FMLOSS = {
    "data_constraint": 10000.0,
    "identity_constraint": 1000.0,
    "inv_constraint": 10000.0,
    "TPS_constraint": 1000.0,
}

HIDDEN = 32      # hidden width of the warp MLP
IN_DIM = 3       # (x, y, t)
OUT_DIM = 2      # warped (x, y)
IN_ROWS = 4      # fused kernel input rows: x, y, t1, t2
OUT_ROWS = 4     # fused kernel output rows: y1x, y1y, y2x, y2y
MAX_TILE_B = 1024
OMEGA0 = 1.0     # SIREN frequency


def _round_up(x, m):
    return ((x + m - 1) // m) * m


def _choose_tile(n):
    """Lane-tile width: multiple of 128; >= 2 grid steps when the batch allows
    (so v7x megacore can shard the 'parallel' axis); capped at 1024 lanes so the
    [HIDDEN, tile] intermediates of the double MLP eval keep vreg/VMEM pressure low."""
    n128 = _round_up(max(int(n), 1), 128)
    if n128 <= 128:
        return 128
    half = (n128 // 2) // 128 * 128
    return int(min(MAX_TILE_B, max(128, half)))


# ----------------------------- Pallas kernel ------------------------------ #
def _warp_mlp2_kernel(x_ref, w1t_ref, b1_ref, w2t_ref, b2_ref, w3t_ref, b3_ref, o_ref):
    """Two chained SIREN warp-MLP evaluations on one [4, TILE_B] feature-major tile.

    Input rows:  (x, y, t1, t2)  with the batch on the 128-lane axis.
    Output rows: (y1_x, y1_y, y2_x, y2_y) where
        y1 = MLP([x, y, t1])   and   y2 = MLP([y1_x, y1_y, t2]).
    """
    x = x_ref[...]                      # [4, TILE_B]
    w1t = w1t_ref[...]                  # [HIDDEN, 4]; column 3 is exactly zero
    b1 = b1_ref[...]                    # [HIDDEN, 1]
    w2t = w2t_ref[...]                  # [HIDDEN, HIDDEN]
    b2 = b2_ref[...]                    # [HIDDEN, 1]
    w3t = w3t_ref[...]                  # [OUT_DIM, HIDDEN]
    b3 = b3_ref[...]                    # [OUT_DIM, 1]

    def hidden_to_out(h1):
        z2 = jnp.dot(w2t, h1, preferred_element_type=jnp.float32) + b2
        h2 = jnp.sin(OMEGA0 * z2)
        return jnp.dot(w3t, h2, preferred_element_type=jnp.float32) + b3   # [2, TILE_B]

    # ---- stage 1: y1 = MLP([x, y, t1]) ----
    # Layer 1 on the MXU: w1t's zero 4th column makes the contraction over the
    # full (x, y, t1, t2) tile ignore the t2 row.
    z1 = jnp.dot(w1t, x, preferred_element_type=jnp.float32) + b1          # [H, TILE_B]
    y1 = hidden_to_out(jnp.sin(OMEGA0 * z1))                               # [2, TILE_B]

    # ---- stage 2: y2 = MLP([y1_x, y1_y, t2]) ----
    # Three broadcast FMAs (contraction dim is only 3) avoid an in-kernel
    # sublane concat of (y1, t2); the heavy layers below still use the MXU.
    z1b = (w1t[:, 0:1] * y1[0:1, :]
           + w1t[:, 1:2] * y1[1:2, :]
           + w1t[:, 2:3] * x[3:4, :]
           + b1)                                                           # [H, TILE_B]
    y2 = hidden_to_out(jnp.sin(OMEGA0 * z1b))                              # [2, TILE_B]

    o_ref[0:2, :] = y1
    o_ref[2:4, :] = y2


def warp_mlp2_pallas(x4, padded_params):
    """Fused double evaluation of the warp MLP.

    x4: [4, n] feature-major (rows x, y, t1, t2).
    Returns [4, n]: rows 0-1 = MLP([x, y, t1]), rows 2-3 = MLP([y1_x, y1_y, t2]).
    """
    w1t, b1, w2t, b2, w3t, b3 = padded_params
    n = x4.shape[1]
    tile = _choose_tile(n)
    n_pad = _round_up(n, tile)
    x4 = x4.astype(jnp.float32)
    if n_pad != n:
        x4 = jnp.pad(x4, ((0, 0), (0, n_pad - n)))

    out = pl.pallas_call(
        _warp_mlp2_kernel,
        out_shape=jax.ShapeDtypeStruct((OUT_ROWS, n_pad), jnp.float32),
        grid=(n_pad // tile,),
        in_specs=[
            pl.BlockSpec((IN_ROWS, tile), lambda i: (0, i)),
            # Weights/biases: constant index map -> stay resident in VMEM.
            pl.BlockSpec((HIDDEN, IN_ROWS), lambda i: (0, 0)),
            pl.BlockSpec((HIDDEN, 1), lambda i: (0, 0)),
            pl.BlockSpec((HIDDEN, HIDDEN), lambda i: (0, 0)),
            pl.BlockSpec((HIDDEN, 1), lambda i: (0, 0)),
            pl.BlockSpec((OUT_DIM, HIDDEN), lambda i: (0, 0)),
            pl.BlockSpec((OUT_DIM, 1), lambda i: (0, 0)),
        ],
        out_specs=pl.BlockSpec((OUT_ROWS, tile), lambda i: (0, i)),
        compiler_params=pltpu.CompilerParams(dimension_semantics=("parallel",)),
    )(x4, w1t, b1, w2t, b2, w3t, b3)
    return out[:, :n]


# --------------------------- parameters / refs ----------------------------- #
def make_params(key):
    k1, k2, k3 = jax.random.split(key, 3)
    w1 = jax.random.uniform(k1, (IN_DIM, HIDDEN), jnp.float32, -1.0, 1.0) / IN_DIM
    b1 = jnp.zeros((HIDDEN,), jnp.float32)
    c = jnp.sqrt(6.0 / HIDDEN) / OMEGA0
    w2 = jax.random.uniform(k2, (HIDDEN, HIDDEN), jnp.float32, -c, c)
    b2 = jnp.zeros((HIDDEN,), jnp.float32)
    w3 = jax.random.uniform(k3, (HIDDEN, OUT_DIM), jnp.float32, -c, c)
    b3 = jnp.zeros((OUT_DIM,), jnp.float32)
    return (w1, b1, w2, b2, w3, b3)


def pad_params(params):
    """Weights stored transposed (feature-major).  w1t gets a zero 4th column so
    the stage-1 MXU dot over the (x, y, t1, t2) tile ignores the t2 row."""
    w1, b1, w2, b2, w3, b3 = params
    w1t = jnp.zeros((HIDDEN, IN_ROWS), jnp.float32).at[:, :IN_DIM].set(w1.T)
    b1c = b1.reshape(HIDDEN, 1)
    w2t = w2.T
    b2c = b2.reshape(HIDDEN, 1)
    w3t = w3.T                               # [OUT_DIM, HIDDEN]
    b3c = b3.reshape(OUT_DIM, 1)
    return (w1t, b1c, w2t, b2c, w3t, b3c)


def mlp_ref_single(p, params):
    """Pure-JAX single-point reference (used only for the hessian sanity check)."""
    w1, b1, w2, b2, w3, b3 = params
    h = jnp.sin(OMEGA0 * (p @ w1 + b1))
    h = jnp.sin(OMEGA0 * (h @ w2 + b2))
    return h @ w3 + b3


def mlp_ref_batched(pts, params):
    w1, b1, w2, b2, w3, b3 = params
    h = jnp.sin(OMEGA0 * (pts @ w1 + b1))
    h = jnp.sin(OMEGA0 * (h @ w2 + b2))
    return h @ w3 + b3


def fused_ref(x4, params):
    """Pure-JAX reference of the fused two-stage evaluation (sanity check only)."""
    y1 = mlp_ref_batched(x4[:3].T, params)                        # [n, 2]
    y2 = mlp_ref_batched(jnp.concatenate([y1, x4[3:4].T], axis=1), params)
    return jnp.concatenate([y1.T, y2.T], axis=0)                  # [4, n]


def siren_hessian_batched(coords, params):
    """Closed-form per-sample hessian of the 2-hidden-layer SIREN warp.

    Returns H[s, k, i, j] = d^2 y_k / d p_i d p_j, shape [N, 2, 3, 3].
    Mathematically identical to jax.vmap(jax.hessian(mlp_ref_single)) but is a
    handful of small batched einsums instead of per-point fwd-over-rev AD.
    """
    w1, b1, w2, b2, w3, _ = params
    a = OMEGA0
    z1 = a * (coords @ w1 + b1)            # [N, H]
    h1 = jnp.sin(z1)
    z2 = a * (h1 @ w2 + b2)                # [N, H]
    s1, c1 = jnp.sin(z1), jnp.cos(z1)
    s2, c2 = jnp.sin(z2), jnp.cos(z2)
    G = (a * a) * jnp.einsum("sn,nm,in->smi", c1, w2, w1)          # dz2/dp
    Q = jnp.einsum("in,jn->nij", w1, w1)
    D2 = -(a ** 3) * jnp.einsum("sn,nm,nij->smij", s1, w2, Q)      # d2z2/dp2
    d2h2 = (-s2[:, :, None, None]) * G[:, :, :, None] * G[:, :, None, :] \
        + c2[:, :, None, None] * D2
    return jnp.einsum("mk,smij->skij", w3, d2h2)                   # [N, 2, 3, 3]


# ------------------------------- the loss ---------------------------------- #
def feature_matching_warping_loss(
    coords,
    src,
    tgt,
    params,
    padded_params,
    intermediate_times=(0.25, 0.5, 0.75),
    constraint_weights=DEFAULT_WEIGHTS_FMLOSS,
):
    times = tuple(intermediate_times)
    N = coords.shape[0]
    Nf = src.shape[0]

    # Feature-major slabs built once, up front (no big fused-batch transpose).
    coordsT = coords.astype(jnp.float32).T         # [3, N]
    xyT = coordsT[:2]                               # [2, N]
    tT = coordsT[2:3]                               # [1, N]
    srcT = src.astype(jnp.float32).T                # [2, Nf]
    tgtT = tgt.astype(jnp.float32).T                # [2, Nf]
    ones_N = jnp.ones((1, N), jnp.float32)
    zeros_N = jnp.zeros((1, N), jnp.float32)
    ones_f = jnp.ones((1, Nf), jnp.float32)
    zeros_f = jnp.zeros((1, Nf), jnp.float32)

    # One fused slab, one pallas_call.  Each column carries (x, y, t1, t2):
    # y1 = model([x, y, t1]) and y2 = model([y1, t2]) come back in one pass.
    segs = [
        jnp.concatenate([xyT, tT, -tT], axis=0),            # y1 = Y,     y2 = Xs
        jnp.concatenate([xyT, tT, 1.0 - tT], axis=0),        # y1 = Y dup, y2 = Xt
        jnp.concatenate([xyT, ones_N, zeros_N], axis=0),      # y1 = X1
        jnp.concatenate([srcT, ones_f, zeros_f], axis=0),     # y1 = y_src
        jnp.concatenate([tgtT, -ones_f, zeros_f], axis=0),    # y1 = y_tgt
    ]
    for t in times:
        segs.append(jnp.concatenate(
            [tgtT, (t - 1.0) * ones_f, (1.0 - t) * ones_f], axis=0))  # y_tgt_0 / y_tgt_t
        segs.append(jnp.concatenate(
            [srcT, t * ones_f, -t * ones_f], axis=0))                 # y_src_0 / y_src_t
    x4 = jnp.concatenate(segs, axis=1)                 # [4, 3N + (2+2T)Nf]

    out = warp_mlp2_pallas(x4, padded_params)          # [4, total]

    off = 0
    YT = out[0:2, off:off + N]
    XsT = out[2:4, off:off + N]; off += N
    XtT = out[2:4, off:off + N]; off += N
    X1T = out[0:2, off:off + N]; off += N
    y_srcT = out[0:2, off:off + Nf]; off += Nf
    y_tgtT = out[0:2, off:off + Nf]; off += Nf

    # ---- loss terms (exact PyTorch semantics, computed feature-major) ----
    data_constraint = ((tgtT - y_srcT) ** 2 + (srcT - y_tgtT) ** 2) * 100.0
    for _ in times:
        y_tgt_0T = out[0:2, off:off + Nf]
        y_tgt_tT = out[2:4, off:off + Nf]; off += Nf
        y_src_0T = out[0:2, off:off + Nf]
        y_src_tT = out[2:4, off:off + Nf]; off += Nf
        data_constraint = data_constraint + (y_src_0T - y_tgt_0T) ** 2 * 50.0
        data_constraint = data_constraint + (y_src_tT - srcT) ** 2 * 20.0
        data_constraint = data_constraint + (y_tgt_tT - tgtT) ** 2 * 20.0

    diff_constraint = (YT - xyT) ** 2
    # NOTE: like the PyTorch reference, this gates on exact float equality t == 0.
    identity_constraint = jnp.where(
        tT == 0.0, diff_constraint, jnp.zeros_like(diff_constraint))

    inv_constraint = (XsT - xyT) ** 2 + (XtT - X1T) ** 2
    inv_constraint = jnp.where(
        tT == 0.0, jnp.zeros_like(inv_constraint), inv_constraint)

    # TPS constraint: batched analytic second derivative of the warp network.
    TPS_constraint = siren_hessian_batched(coords.astype(jnp.float32), params) ** 2

    w = constraint_weights
    return {
        "data_constraint": data_constraint.mean() * w["data_constraint"],
        "identity_constraint": identity_constraint.mean() * w["identity_constraint"],
        "inv_constraint": inv_constraint.mean() * w["inv_constraint"],
        "TPS_constraint": TPS_constraint.mean() * w["TPS_constraint"],
    }


# --------------------------------- main ------------------------------------ #
if __name__ == "__main__":
    key = jax.random.PRNGKey(0)
    k_params, k_coords, k_time, k_src, k_tgt = jax.random.split(key, 5)

    params = make_params(k_params)
    padded_params = pad_params(params)

    # coords: [N, 3] with spatial coords in [-1, 1]; half the samples at t=0 so
    # both branches of the identity / inverse masks are exercised.
    N = 64
    xy = jax.random.uniform(k_coords, (N, 2), jnp.float32, -1.0, 1.0)
    t_rand = jax.random.uniform(k_time, (N, 1), jnp.float32, 0.0, 1.0)
    t_col = jnp.where(jnp.arange(N)[:, None] < N // 2, jnp.zeros_like(t_rand), t_rand)
    coords = jnp.concatenate([xy, t_col], axis=1)

    # feature matches: [Nf, 2] points in [-1, 1]
    Nf = 8
    warp_src_pts = jax.random.uniform(k_src, (Nf, 2), jnp.float32, -1.0, 1.0)
    warp_tgt_pts = jax.random.uniform(k_tgt, (Nf, 2), jnp.float32, -1.0, 1.0)

    # Sanity: fused Pallas (two chained MLP evals per column) matches pure JAX.
    x4_check = jnp.concatenate([coords, -coords[:, 2:3]], axis=1).T      # [4, N]
    y_pallas = jax.block_until_ready(warp_mlp2_pallas(x4_check, padded_params))
    y_ref = fused_ref(x4_check, params)
    assert float(jnp.max(jnp.abs(y_pallas - y_ref))) < 1e-3, "pallas forward mismatch"

    # Sanity: analytic hessian matches jax.hessian on a few points.
    h_ad = jax.vmap(jax.hessian(lambda p: mlp_ref_single(p, params)))(coords[:4])
    h_an = siren_hessian_batched(coords[:4], params)
    assert float(jnp.max(jnp.abs(h_ad - h_an))) < 1e-3, "analytic hessian mismatch"

    loss_fn = jax.jit(
        functools.partial(
            feature_matching_warping_loss,
            intermediate_times=(0.25, 0.5, 0.75),
            constraint_weights=DEFAULT_WEIGHTS_FMLOSS,
        )
    )
    out = loss_fn(coords, warp_src_pts, warp_tgt_pts, params, padded_params)
    out = jax.block_until_ready(out)

    for k in ("data_constraint", "identity_constraint", "inv_constraint",
              "TPS_constraint"):
        assert jnp.isfinite(out[k]), k

    print("KERNEL_OK")
</pallas_src>

<mosaic_0001>
module attributes {stable_mosaic.version = 11 : i64} {
  func.func @_warp_mlp2_kernel(%arg0: i32, %arg1: memref<4x128xf32, #tpu.memory_space<vmem>>, %arg2: memref<32x4xf32, #tpu.memory_space<vmem>>, %arg3: memref<32x1xf32, #tpu.memory_space<vmem>>, %arg4: memref<32x32xf32, #tpu.memory_space<vmem>>, %arg5: memref<32x1xf32, #tpu.memory_space<vmem>>, %arg6: memref<2x32xf32, #tpu.memory_space<vmem>>, %arg7: memref<2x1xf32, #tpu.memory_space<vmem>>, %arg8: memref<4x128xf32, #tpu.memory_space<vmem>>) attributes {dimension_semantics = [#tpu.dimension_semantics<parallel>], iteration_bounds = array<i64: 1>, scalar_prefetch = 0 : i64, scratch_operands = 0 : i64, tpu.core_type = #tpu.core_type<tc>, window_params = [{transform_indices = @transform_0, window_bounds = array<i64: 4, 128>}, {pipeline_mode = #tpu.pipeline_mode<synchronous>, transform_indices = @transform_1, window_bounds = array<i64: 32, 4>}, {pipeline_mode = #tpu.pipeline_mode<synchronous>, transform_indices = @transform_2, window_bounds = array<i64: 32, 1>}, {pipeline_mode = #tpu.pipeline_mode<synchronous>, transform_indices = @transform_3, window_bounds = array<i64: 32, 32>}, {pipeline_mode = #tpu.pipeline_mode<synchronous>, transform_indices = @transform_4, window_bounds = array<i64: 32, 1>}, {pipeline_mode = #tpu.pipeline_mode<synchronous>, transform_indices = @transform_5, window_bounds = array<i64: 2, 32>}, {pipeline_mode = #tpu.pipeline_mode<synchronous>, transform_indices = @transform_6, window_bounds = array<i64: 2, 1>}, {transform_indices = @transform_7, window_bounds = array<i64: 4, 128>}]} {
    %c0 = arith.constant 0 : index
    %c0_0 = arith.constant 0 : index
    %0 = vector.load %arg1[%c0, %c0_0] : memref<4x128xf32, #tpu.memory_space<vmem>>, vector<4x128xf32>
    %c0_1 = arith.constant 0 : index
    %c0_2 = arith.constant 0 : index
    %1 = vector.load %arg2[%c0_1, %c0_2] : memref<32x4xf32, #tpu.memory_space<vmem>>, vector<32x4xf32>
    %c0_3 = arith.constant 0 : index
    %c0_4 = arith.constant 0 : index
    %2 = vector.load %arg3[%c0_3, %c0_4] : memref<32x1xf32, #tpu.memory_space<vmem>>, vector<32x1xf32>
    %c0_5 = arith.constant 0 : index
    %c0_6 = arith.constant 0 : index
    %3 = vector.load %arg4[%c0_5, %c0_6] : memref<32x32xf32, #tpu.memory_space<vmem>>, vector<32x32xf32>
    %c0_7 = arith.constant 0 : index
    %c0_8 = arith.constant 0 : index
    %4 = vector.load %arg5[%c0_7, %c0_8] : memref<32x1xf32, #tpu.memory_space<vmem>>, vector<32x1xf32>
    %c0_9 = arith.constant 0 : index
    %c0_10 = arith.constant 0 : index
    %5 = vector.load %arg6[%c0_9, %c0_10] : memref<2x32xf32, #tpu.memory_space<vmem>>, vector<2x32xf32>
    %c0_11 = arith.constant 0 : index
    %c0_12 = arith.constant 0 : index
    %6 = vector.load %arg7[%c0_11, %c0_12] : memref<2x1xf32, #tpu.memory_space<vmem>>, vector<2x1xf32>
    %cst = arith.constant dense<0.000000e+00> : vector<32x128xf32>
    %7 = tpu.matmul %1, %0, %cst {dimension_numbers = #tpu.dot_dimension_numbers<[1], [0], [0], [1], [0, 0, 1, 1], [], []>} : vector<32x4xf32>, vector<4x128xf32>, vector<32x128xf32> -> vector<32x128xf32>
    %8 = vector.broadcast %2 : vector<32x1xf32> to vector<32x128xf32>
    %9 = arith.addf %7, %8 : vector<32x128xf32>
    %cst_13 = arith.constant 1.000000e+00 : f32
    %10 = vector.broadcast %cst_13 : f32 to vector<32x128xf32>
    %11 = arith.mulf %10, %9 : vector<32x128xf32>
    %12 = math.sin %11 : vector<32x128xf32>
    %cst_14 = arith.constant dense<0.000000e+00> : vector<32x128xf32>
    %13 = tpu.matmul %3, %12, %cst_14 {dimension_numbers = #tpu.dot_dimension_numbers<[1], [0], [0], [1], [0, 0, 1, 1], [], []>} : vector<32x32xf32>, vector<32x128xf32>, vector<32x128xf32> -> vector<32x128xf32>
    %14 = vector.broadcast %4 : vector<32x1xf32> to vector<32x128xf32>
    %15 = arith.addf %13, %14 : vector<32x128xf32>
    %cst_15 = arith.constant 1.000000e+00 : f32
    %16 = vector.broadcast %cst_15 : f32 to vector<32x128xf32>
    %17 = arith.mulf %16, %15 : vector<32x128xf32>
    %18 = math.sin %17 : vector<32x128xf32>
    %cst_16 = arith.constant dense<0.000000e+00> : vector<2x128xf32>
    %19 = tpu.matmul %5, %18, %cst_16 {dimension_numbers = #tpu.dot_dimension_numbers<[1], [0], [0], [1], [0, 0, 1, 1], [], []>} : vector<2x32xf32>, vector<32x128xf32>, vector<2x128xf32> -> vector<2x128xf32>
    %20 = vector.broadcast %6 : vector<2x1xf32> to vector<2x128xf32>
    %21 = arith.addf %19, %20 : vector<2x128xf32>
    %22 = vector.extract_strided_slice %1 {offsets = [0, 0], sizes = [32, 1], strides = [1, 1]} : vector<32x4xf32> to vector<32x1xf32>
    %23 = vector.extract_strided_slice %21 {offsets = [0, 0], sizes = [1, 128], strides = [1, 1]} : vector<2x128xf32> to vector<1x128xf32>
    %24 = vector.broadcast %22 : vector<32x1xf32> to vector<32x128xf32>
    %25 = vector.broadcast %23 : vector<1x128xf32> to vector<32x128xf32>
    %26 = arith.mulf %24, %25 : vector<32x128xf32>
    %27 = vector.extract_strided_slice %1 {offsets = [0, 1], sizes = [32, 1], strides = [1, 1]} : vector<32x4xf32> to vector<32x1xf32>
    %28 = vector.extract_strided_slice %21 {offsets = [1, 0], sizes = [1, 128], strides = [1, 1]} : vector<2x128xf32> to vector<1x128xf32>
    %29 = vector.broadcast %27 : vector<32x1xf32> to vector<32x128xf32>
    %30 = vector.broadcast %28 : vector<1x128xf32> to vector<32x128xf32>
    %31 = arith.mulf %29, %30 : vector<32x128xf32>
    %32 = arith.addf %26, %31 : vector<32x128xf32>
    %33 = vector.extract_strided_slice %1 {offsets = [0, 2], sizes = [32, 1], strides = [1, 1]} : vector<32x4xf32> to vector<32x1xf32>
    %34 = vector.extract_strided_slice %0 {offsets = [3, 0], sizes = [1, 128], strides = [1, 1]} : vector<4x128xf32> to vector<1x128xf32>
    %35 = vector.broadcast %33 : vector<32x1xf32> to vector<32x128xf32>
    %36 = vector.broadcast %34 : vector<1x128xf32> to vector<32x128xf32>
    %37 = arith.mulf %35, %36 : vector<32x128xf32>
    %38 = arith.addf %32, %37 : vector<32x128xf32>
    %39 = vector.broadcast %2 : vector<32x1xf32> to vector<32x128xf32>
    %40 = arith.addf %38, %39 : vector<32x128xf32>
    %cst_17 = arith.constant 1.000000e+00 : f32
    %41 = vector.broadcast %cst_17 : f32 to vector<32x128xf32>
    %42 = arith.mulf %41, %40 : vector<32x128xf32>
    %43 = math.sin %42 : vector<32x128xf32>
    %cst_18 = arith.constant dense<0.000000e+00> : vector<32x128xf32>
    %44 = tpu.matmul %3, %43, %cst_18 {dimension_numbers = #tpu.dot_dimension_numbers<[1], [0], [0], [1], [0, 0, 1, 1], [], []>} : vector<32x32xf32>, vector<32x128xf32>, vector<32x128xf32> -> vector<32x128xf32>
    %45 = vector.broadcast %4 : vector<32x1xf32> to vector<32x128xf32>
    %46 = arith.addf %44, %45 : vector<32x128xf32>
    %cst_19 = arith.constant 1.000000e+00 : f32
    %47 = vector.broadcast %cst_19 : f32 to vector<32x128xf32>
    %48 = arith.mulf %47, %46 : vector<32x128xf32>
    %49 = math.sin %48 : vector<32x128xf32>
    %cst_20 = arith.constant dense<0.000000e+00> : vector<2x128xf32>
    %50 = tpu.matmul %5, %49, %cst_20 {dimension_numbers = #tpu.dot_dimension_numbers<[1], [0], [0], [1], [0, 0, 1, 1], [], []>} : vector<2x32xf32>, vector<32x128xf32>, vector<2x128xf32> -> vector<2x128xf32>
    %51 = vector.broadcast %6 : vector<2x1xf32> to vector<2x128xf32>
    %52 = arith.addf %50, %51 : vector<2x128xf32>
    %c0_21 = arith.constant 0 : index
    %c0_22 = arith.constant 0 : index
    %53 = vector.load %arg8[%c0_21, %c0_22] : memref<4x128xf32, #tpu.memory_space<vmem>>, vector<2x128xf32>
    tpu.vector_store %arg8[%c0_21, %c0_22], %21 {strides = array<i32>} : memref<4x128xf32, #tpu.memory_space<vmem>>, vector<2x128xf32>,
    %c2 = arith.constant 2 : index
    %c0_23 = arith.constant 0 : index
    %54 = vector.load %arg8[%c2, %c0_23] : memref<4x128xf32, #tpu.memory_space<vmem>>, vector<2x128xf32>
    tpu.vector_store %arg8[%c2, %c0_23], %52 {strides = array<i32>} : memref<4x128xf32, #tpu.memory_space<vmem>>, vector<2x128xf32>,
    return
  }
  func.func @transform_0(%arg0: i32) -> (i32, i32) {
    %c0_i32 = arith.constant 0 : i32
    %c0_i32_0 = arith.constant 0 : i32
    return %c0_i32, %arg0 : i32, i32
  }
  func.func @transform_1(%arg0: i32) -> (i32, i32) {
    %c0_i32 = arith.constant 0 : i32
    %c0_i32_0 = arith.constant 0 : i32
    %c0_i32_1 = arith.constant 0 : i32
    return %c0_i32, %c0_i32_0 : i32, i32
  }
  func.func @transform_2(%arg0: i32) -> (i32, i32) {
    %c0_i32 = arith.constant 0 : i32
    %c0_i32_0 = arith.constant 0 : i32
    %c0_i32_1 = arith.constant 0 : i32
    return %c0_i32, %c0_i32_0 : i32, i32
  }
  func.func @transform_3(%arg0: i32) -> (i32, i32) {
    %c0_i32 = arith.constant 0 : i32
    %c0_i32_0 = arith.constant 0 : i32
    %c0_i32_1 = arith.constant 0 : i32
    return %c0_i32, %c0_i32_0 : i32, i32
  }
  func.func @transform_4(%arg0: i32) -> (i32, i32) {
    %c0_i32 = arith.constant 0 : i32
    %c0_i32_0 = arith.constant 0 : i32
    %c0_i32_1 = arith.constant 0 : i32
    return %c0_i32, %c0_i32_0 : i32, i32
  }
  func.func @transform_5(%arg0: i32) -> (i32, i32) {
    %c0_i32 = arith.constant 0 : i32
    %c0_i32_0 = arith.constant 0 : i32
    %c0_i32_1 = arith.constant 0 : i32
    return %c0_i32, %c0_i32_0 : i32, i32
  }
  func.func @transform_6(%arg0: i32) -> (i32, i32) {
    %c0_i32 = arith.constant 0 : i32
    %c0_i32_0 = arith.constant 0 : i32
    %c0_i32_1 = arith.constant 0 : i32
    return %c0_i32, %c0_i32_0 : i32, i32
  }
  func.func @transform_7(%arg0: i32) -> (i32, i32) {
    %c0_i32 = arith.constant 0 : i32
    %c0_i32_0 = arith.constant 0 : i32
    return %c0_i32, %arg0 : i32, i32
  }
}

</mosaic_0001>

<bundles_post_ra>
// kernel: tpu_custom_call.1
= control target key start
LH: loop header
LB: loop body
LE: loop exit
PB: predicated region body
PF: predicated region fallthrough
CT: control target
= control target key end

     0   :  { %vm79_vm0 = vcmask 1043456   ;;  %vm66_vm1 = vcmask 31744   ;;  %v4989_v2 = vmov 0   ;;  %s4968_s0 = inlined_call_operand.vmem [shape: f32[4,128], index: 0, kind: input, shape index: {}]   ;;  %s4969_s1 = inlined_call_operand.vmem [shape: f32[32,4], index: 1, kind: input, shape index: {}]   ;;  %s4970_s2 = inlined_call_operand.vmem [shape: f32[32,1], index: 2, kind: input, shape index: {}]   ;;  %s4971_s3 = inlined_call_operand.vmem [shape: f32[32,32], index: 3, kind: input, shape index: {}]   ;;  %s4972_s4 = inlined_call_operand.vmem [shape: f32[32,1], index: 4, kind: input, shape index: {}]   ;;  %s4973_s5 = inlined_call_operand.vmem [shape: f32[2,32], index: 5, kind: input, shape index: {}]   ;;  %s4974_s6 = inlined_call_operand.vmem [shape: f32[2,1], index: 6, kind: input, shape index: {}]   ;;  %s4975_s7 = inlined_call_operand.hbm [shape: f32[4,128], index: 7, kind: output, shape index: {}]  }
   0x1   :  { %v27_v0 = vld [vmem:[%s4968_s0] sm:$0xf]  ;;  %2898 = vset.pattern.permute.xlu1 %v4989_v2  ;;  %v33_v3 = vld [vmem:[%s4970_s2 + $0x8] sm:$0xff]  ;;  %v35_v4 = vld [vmem:[%s4970_s2 + $0x18] sm:$0xff]  ;;  %2897 = vset.pattern.permute.xlu0 %v4989_v2 }
   0x2   :  { %v28_v1 = vld [vmem:[%s4969_s1] sm:$0xff]  ;;  %2824 = vmatpush.msk.msra.mxu0 %vm79_vm0, %v27_v0  ;;  %53 = vperm.xlu1 %2898, %v33_v3  }
   0x3   :  { %2825 = vmatmul.msk.f32.vlgmr.msra.gmra.mxu0 %vm66_vm1, %v28_v1  ;;  %2899 = vset.pattern.permute.xlu2 %v4989_v2 }
   0x4   :  { %63 = vperm.xlu0 %2897, %v35_v4  }
   0x5   :  { %12 = vsyncpa [#allocation3], 0  ;;  %v29_v5 = vld [vmem:[%s4969_s1 + $0x8] sm:$0xff]  ;;  %v32_v6 = vld [vmem:[%s4970_s2] sm:$0xff]  ;;  %v4985_v49 = vmov 2102212464  }
   0x6   :  { %v34_v7 = vld [vmem:[%s4970_s2 + $0x10] sm:$0xff]  ;;  %v40_v9 = vld [vmem:[%s4972_s4] sm:$0xff]  ;;  %v41_v10 = vld [vmem:[%s4972_s4 + $0x8] sm:$0xff]  ;;  %v4979_v53 = vmov 920167782   ;;  %s2953_s29 = smov [#allocation2]  }
   0x7   :  { %v30_v8 = vld [vmem:[%s4969_s1 + $0x10] sm:$0xff]  ;;  %v31_v11 = vld [vmem:[%s4969_s1 + $0x18] sm:$0xff]  ;;  %v4981_v63 = vmov 1326507024   ;;  %v4995_v3 = vmov 683565275  }
   0x8   :  { %s2815_s9 = sshll.u32 %s4975_s7, 4  ;;  %s2816_s9 = int_to_ptr.hbm [resolvable:$true] %s2815_s9 }
   0xa   :  { %48 = vperm.xlu1 %2898, %v32_v6  }
   0xb   :  { %2826 = vmatmul.msk.f32.gmra.mxu0 %vm66_vm1, %v29_v5 }
   0xc   :  { %58 = vperm.xlu0 %2897, %v34_v7  }
  0x12   :  { %734 = vperm.xlu1 %2898, %v40_v9  }
  0x13   :  { %2827 = vmatmul.msk.f32.gmra.mxu0 %vm66_vm1, %v30_v8  ;;  %v4983_v8 = vmov 2475754826  }
  0x14   :  { %739 = vperm.xlu0 %2897, %v41_v10  }
  0x1b   :  { %2828 = vmatmul.msk.f32.gmra.mxu0 %vm66_vm1, %v31_v11 }
  0x74   :  { %v3034_v12 = vpop.permute.xlu1 %53 }
  0x76   :  { %v3042_v18 = vpop.permute.xlu0 %63 }
  0x7c   :  { %v3036_v13 = vpop.permute.xlu1 %48 }
  0x7e   :  { %v3048_v26 = vpop.permute.xlu0 %58 }
  0x7f   :  { %5006 = vst [vmem:[#allocation5_spill] sm:$0xff] %v3048_v26 }
  0x80   :  { %v100_v14 = vpop.f32.mrf.mxu0 }
  0x81   :  { %v3039_v15 = vadd.f32 %v100_v14, %v3036_v13 }
  0x83   :  { %v115_v16 = vand.u32 2139095040, %v3039_v15 }
  0x85   :  { %v116_v17 = vshrl.u32 %v115_v16, 23 }
  0x87   :  { %v2829_v19 = vadd.s32 4294967169, %v116_v17 }
  0x88   :  { %v103_v20 = vpop.f32.mrf.mxu0 }
  0x89   :  { %v3045_v21 = vadd.f32 %v103_v20, %v3034_v12  ;;  %v122_v22 = vadd.s32 1, %v2829_v19 }
  0x8b   :  { %v270_v23 = vand.u32 2139095040, %v3045_v21  ;;  %vm123_vm2 = vcmp.gt.s32.totalorder %v122_v22, 0  ;;  %v4976_v32 = vand.u32 2147483647, %v3045_v21 }
  0x8c   :  { %v124_v29 = vsel %vm123_vm2, %v122_v22, 0  ;;  %v4991_v22 = vmov 2131351028  }
  0x8d   :  { %v271_v24 = vshrl.u32 %v270_v23, 23  ;;  %v3055_v33 = vand.u32 31, %v124_v29  ;;  %v3062_v40 = vand.u32 8388607, %v4976_v32  ;;  %v3079_v48 = vshrl.u32 %v124_v29, 5 }
  0x8f   :  { %v2832_v25 = vadd.s32 4294967169, %v271_v24  ;;  %v3065_v41 = vsub.s32 32, %v3055_v33  ;;  %v3083_v50 = vshll.u32 %v4985_v49, %v3055_v33 }
  0x90   :  { %v106_v27 = vpop.f32.mrf.mxu0 }
  0x91   :  { %v3051_v28 = vadd.f32 %v106_v27, %v3048_v26  ;;  %v277_v30 = vadd.s32 1, %v2832_v25  ;;  %v3088_v54 = vshrl.u32 %v4979_v53, %v3065_v41 }
  0x93   :  { %v425_v31 = vand.u32 2139095040, %v3051_v28  ;;  %vm278_vm3 = vcmp.gt.s32.totalorder %v277_v30, 0  ;;  %v4977_v36 = vand.u32 2147483647, %v3051_v28 }
  0x94   :  { %v279_v34 = vsel %vm278_vm3, %v277_v30, 0 }
  0x95   :  { %v426_v35 = vshrl.u32 %v425_v31, 23  ;;  %v3058_v37 = vand.u32 31, %v279_v34  ;;  %v3072_v44 = vand.u32 8388607, %v4977_v36  ;;  %v3090_v55 = vshrl.u32 %v279_v34, 5 }
  0x97   :  { %v2835_v38 = vadd.s32 4294967169, %v426_v35  ;;  %v3075_v45 = vsub.s32 32, %v3058_v37  ;;  %v293_v58 = vshll.u32 %v4985_v49, %v3058_v37  ;;  %v3096_v59 = vshll.u32 %v4979_v53, %v3058_v37 }
  0x98   :  { %v109_v39 = vpop.f32.mrf.mxu0  ;;  %v430_v61 = vor.u32 8388608, %v3072_v44  ;;  %v284_v4 = vshll.u32 %v4995_v3, %v3058_v37  ;;  %vm302_vm3 = vcmp.lt.s32.totalorder %v3090_v55, 4 }
  0x99   :  { %v432_v42 = vadd.s32 1, %v2835_v38  ;;  %v3068_v43 = vadd.f32 %v109_v39, %v3042_v18  ;;  %v294_v62 = vshrl.u32 %v4979_v53, %v3075_v45  ;;  %v3105_v0 = vshrl.u32 %v4981_v63, %v3075_v45 }
  0x9a   :  { %v285_v9 = vshrl.u32 %v4983_v8, %v3075_v45 }
  0x9b   :  { %vm433_vm4 = vcmp.gt.s32.totalorder %v432_v42, 0  ;;  %v580_v46 = vand.u32 2139095040, %v3068_v43  ;;  %v4978_v47 = vand.u32 2147483647, %v3068_v43  ;;  %v3125_v30 = vor.u32 %v294_v62, %v293_v58 }
  0x9c   :  { %v434_v51 = vsel %vm433_vm4, %v432_v42, 0  ;;  %v3134_v42 = vor.u32 %v285_v9, %v284_v4 }
  0x9d   :  { %v436_v56 = vand.u32 31, %v434_v51  ;;  %v581_v57 = vshrl.u32 %v580_v46, 23  ;;  %v584_v60 = vand.u32 8388607, %v4978_v47  ;;  %v3116_v17 = vshrl.u32 %v434_v51, 5 }
  0x9f   :  { %v437_v1 = vsub.s32 32, %v436_v56  ;;  %v448_v5 = vshll.u32 %v4985_v49, %v436_v56  ;;  %v2838_v6 = vadd.s32 4294967169, %v581_v57  ;;  %v585_v7 = vor.u32 8388608, %v584_v60 }
  0xa0   :  { %v451_v11 = vshll.u32 %v4979_v53, %v436_v56  ;;  %v439_v20 = vshll.u32 %v4995_v3, %v436_v56  ;;  %v442_v29 = vshll.u32 %v4983_v8, %v436_v56  ;;  %vm457_vm6 = vcmp.lt.s32.totalorder %v3116_v17, 4 }
  0xa1   :  { %v449_v10 = vshrl.u32 %v4979_v53, %v437_v1  ;;  %v452_v14 = vshrl.u32 %v4981_v63, %v437_v1  ;;  %v440_v16 = vshrl.u32 %v4983_v8, %v437_v1  ;;  %v587_v19 = vadd.s32 1, %v2838_v6 }
  0xa2   :  { %v443_v23 = vshrl.u32 %v4991_v22, %v437_v1  ;;  %v3122_v27 = vshll.u32 %v585_v7, 8  ;;  %v446_v34 = vshrl.u32 %v4985_v49, %v437_v1  ;;  %v3138_v51 = vshrl.u32 %v4995_v3, %v437_v1 }
  0xa3   :  { %v3120_v24 = vor.u32 %v449_v10, %v448_v5  ;;  %v453_v25 = vor.u32 %v452_v14, %v451_v11  ;;  %vm588_vm5 = vcmp.gt.s32.totalorder %v587_v19, 0  ;;  %v3130_v38 = vor.u32 %v440_v16, %v439_v20 }
  0xa4   :  { %v589_v35 = vsel %vm588_vm5, %v587_v19, 0  ;;  %v3132_v39 = vor.u32 %v443_v23, %v442_v29  ;;  %v445_v57 = vshll.u32 %v4991_v22, %v436_v56  ;;  %v626_v62 = vand.u32 65535, %v3122_v27 }
  0xa5   :  { %v591_v46 = vand.u32 31, %v589_v35  ;;  %v463_v58 = vsel %vm457_vm6, %v3120_v24, 920167782  ;;  %v467_v60 = vsel %vm457_vm6, %v453_v25, 1326507024  ;;  %v627_v4 = vshrl.u32 %v3122_v27, 16 }
  0xa6   :  { %v590_v5 = vshrl.u32 %v589_v35, 5  ;;  %v447_v7 = vor.u32 %v446_v34, %v445_v57  ;;  %vm454_vm7 = vcmp.lt.s32.totalorder %v3116_v17, 1  ;;  %vm456_vm8 = vcmp.lt.s32.totalorder %v3116_v17, 3 }
  0xa7   :  { %v592_v6 = vsub.s32 32, %v591_v46  ;;  %v603_v1 = vshll.u32 %v4985_v49, %v591_v46  ;;  %v606_v56 = vshll.u32 %v4979_v53, %v591_v46  ;;  %v462_v9 = vsel %vm454_vm7, %v3130_v38, %v3132_v39 }
  0xa8   :  { %v594_v14 = vshll.u32 %v4995_v3, %v591_v46  ;;  %v597_v19 = vshll.u32 %v4983_v8, %v591_v46  ;;  %v600_v23 = vshll.u32 %v4991_v22, %v591_v46  ;;  %vm612_vm9 = vcmp.lt.s32.totalorder %v590_v5, 4 }
  0xa9   :  { %v604_v10 = vshrl.u32 %v4979_v53, %v592_v6  ;;  %v607_v11 = vshrl.u32 %v4981_v63, %v592_v6  ;;  %v595_v16 = vshrl.u32 %v4983_v8, %v592_v6  ;;  %v598_v20 = vshrl.u32 %v4991_v22, %v592_v6 }
  0xaa   :  { %v601_v25 = vshrl.u32 %v4985_v49, %v592_v6  ;;  %v593_v57 = vshrl.u32 %v4995_v3, %v592_v6  ;;  %vm609_vm10 = vcmp.lt.s32.totalorder %v590_v5, 1  ;;  %vm610_vm11 = vcmp.lt.s32.totalorder %v590_v5, 2 }
  0xab   :  { %v605_v29 = vor.u32 %v604_v10, %v603_v1  ;;  %v608_v34 = vor.u32 %v607_v11, %v606_v56  ;;  %v596_v35 = vor.u32 %v595_v16, %v594_v14  ;;  %v599_v32 = vor.u32 %v598_v20, %v597_v19 }
  0xac   :  { %v602_v36 = vor.u32 %v601_v25, %v600_v23  ;;  %vm611_vm12 = vcmp.lt.s32.totalorder %v590_v5, 3  ;;  %v464_v56 = vsel %vm456_vm8, %v447_v7, %v463_v58  ;;  %vm455_vm13 = vcmp.lt.s32.totalorder %v3116_v17, 2 }
  0xad   :  { %v618_v47 = vsel %vm612_vm9, %v605_v29, 920167782  ;;  %v622_v53 = vsel %vm612_vm9, %v608_v34, 1326507024  ;;  %v617_v31 = vsel %vm609_vm10, %v596_v35, %v599_v32  ;;  %v613_v46 = vsel %vm609_vm10, %v593_v57, %v596_v35 }
  0xae   :  { %v614_v52 = vsel %vm612_vm9, %v602_v36, 2102212464  ;;  %v619_v63 = vsel %vm611_vm12, %v602_v36, %v618_v47  ;;  %v621_v8 = vsel %vm609_vm10, %v599_v32, %v602_v36  ;;  %v623_v1 = vsel %vm611_vm12, %v605_v29, %v622_v53 }
  0xaf   :  { %v620_v49 = vsel %vm610_vm11, %v617_v31, %v619_v63  ;;  %v615_v10 = vsel %vm611_vm12, %v599_v32, %v614_v52  ;;  %v624_v6 = vsel %vm610_vm11, %v621_v8, %v623_v1  ;;  %v3172_v47 = vsel %vm457_vm6, %v447_v7, 2102212464 }
  0xb0   :  { %v650_v11 = vand.u32 65535, %v620_v49  ;;  %v651_v14 = vshrl.u32 %v620_v49, 16  ;;  %v628_v16 = vand.u32 65535, %v624_v6  ;;  %v629_v19 = vshrl.u32 %v624_v6, 16 }
  0xb1   :  { %v3176_v53 = vsel %vm455_vm13, %v462_v9, %v464_v56  ;;  %v466_v32 = vsel %vm454_vm7, %v3132_v39, %v447_v7  ;;  %v3182_v49 = vsel %vm610_vm11, %v613_v46, %v615_v10  ;;  %v468_v8 = vsel %vm456_vm8, %v3120_v24, %v467_v60 }
  0xb2   :  { %v653_v36 = vmul.u32 %v651_v14, %v626_v62  ;;  %v654_v20 = vmul.u32 %v650_v11, %v627_v4  ;;  %v631_v52 = vmul.u32 %v629_v19, %v626_v62  ;;  %v632_v63 = vmul.u32 %v628_v16, %v627_v4 }
  0xb3   :  { %v630_v31 = vmul.u32 %v628_v16, %v626_v62  ;;  %v652_v58 = vmul.u32 %v650_v11, %v626_v62  ;;  %v655_v23 = vmul.u32 %v651_v14, %v627_v4  ;;  %v633_v29 = vmul.u32 %v629_v19, %v627_v4 }
  0xb4   :  { %v656_v25 = vshll.u32 %v653_v36, 16  ;;  %v634_v9 = vshll.u32 %v631_v52, 16  ;;  %v657_v34 = vshrl.u32 %v653_v36, 16  ;;  %v658_v35 = vshll.u32 %v654_v20, 16 }
  0xb5   :  { %v469_v5 = vsel %vm455_vm13, %v466_v32, %v468_v8  ;;  %v3191_v7 = vshll.u32 %v430_v61, 8  ;;  %v636_v46 = vshll.u32 %v632_v63, 16  ;;  %v635_v16 = vshrl.u32 %v631_v52, 16 }
  0xb6   :  { %vm660_vm14 = vc.u32 %v652_v58, %v656_v25  ;;  %v662_v57 = vadd.s32 %v656_v25, %v652_v58  ;;  %vm638_vm15 = vc.u32 %v630_v31, %v634_v9  ;;  %v640_v24 = vadd.s32 %v634_v9, %v630_v31 }
  0xb7   :  { %v661_v60 = vsel %vm660_vm14, 1, %v4989_v2  ;;  %v639_v62 = vsel %vm638_vm15, 1, %v4989_v2  ;;  %v473_v1 = vand.u32 65535, %v469_v5  ;;  %v471_v6 = vand.u32 65535, %v3191_v7 }
  0xb8   :  { %v663_v4 = vadd.s32 %v661_v60, %v655_v23  ;;  %vm664_vm0 = vc.u32 %v662_v57, %v658_v35  ;;  %v641_v56 = vadd.s32 %v639_v62, %v633_v29  ;;  %vm642_vm1 = vc.u32 %v640_v24, %v636_v46 }
  0xb9   :  { %v665_v10 = vsel %vm664_vm0, 1, %v4989_v2  ;;  %v643_v44 = vsel %vm642_vm1, 1, %v4989_v2  ;;  %v472_v11 = vshrl.u32 %v3191_v7, 16  ;;  %v474_v14 = vshrl.u32 %v469_v5, 16 }
  0xba   :  { %v667_v61 = vadd.s32 %v665_v10, %v663_v4  ;;  %v645_v19 = vadd.s32 %v643_v44, %v641_v56  ;;  %v495_v36 = vand.u32 65535, %v3176_v53  ;;  %v496_v32 = vshrl.u32 %v3176_v53, 16 }
  0xbb   :  { %v659_v8 = vshrl.u32 %v654_v20, 16  ;;  %v476_v58 = vmul.u32 %v474_v14, %v471_v6  ;;  %v477_v23 = vmul.u32 %v473_v1, %v472_v11  ;;  %v637_v25 = vshrl.u32 %v632_v63, 16 }
  0xbc   :  { %v668_v31 = vadd.s32 %v667_v61, %v657_v34  ;;  %v646_v29 = vadd.s32 %v645_v19, %v635_v16  ;;  %v670_v9 = vmul.u32 %v3122_v27, %v3182_v49  ;;  %v498_v46 = vmul.u32 %v496_v32, %v471_v6 }
  0xbd   :  { %v475_v60 = vmul.u32 %v473_v1, %v471_v6  ;;  %v479_v62 = vshll.u32 %v476_v58, 16  ;;  %v499_v5 = vmul.u32 %v495_v36, %v472_v11  ;;  %v3205_v4 = vadd.s32 %v662_v57, %v658_v35 }
  0xbe   :  { %v669_v24 = vadd.s32 %v668_v31, %v659_v8  ;;  %v3203_v52 = vadd.s32 %v646_v29, %v637_v25  ;;  %v478_v56 = vmul.u32 %v474_v14, %v472_v11  ;;  %v501_v53 = vshll.u32 %v498_v46, 16 }
  0xbf   :  { %v481_v34 = vshll.u32 %v477_v23, 16  ;;  %vm483_vm2 = vc.u32 %v475_v60, %v479_v62  ;;  %v485_v10 = vadd.s32 %v479_v62, %v475_v60  ;;  %v497_v49 = vmul.u32 %v495_v36, %v471_v6 }
  0xc0   :  { %v673_v20 = vadd.s32 1, %v669_v24  ;;  %vm672_vm4 = vc.u32 %v3203_v52, %v3205_v4  ;;  %v484_v27 = vsel %vm483_vm2, 1, %v4989_v2  ;;  %v500_v63 = vmul.u32 %v496_v32, %v472_v11 }
  0xc1   :  { %v486_v44 = vadd.s32 %v484_v27, %v478_v56  ;;  %vm487_vm5 = vc.u32 %v485_v10, %v481_v34  ;;  %v503_v35 = vshll.u32 %v499_v5, 16  ;;  %vm505_vm6 = vc.u32 %v497_v49, %v501_v53 }
  0xc2   :  { %v674_v1 = vsel %vm672_vm4, %v673_v20, %v669_v24  ;;  %v488_v61 = vsel %vm487_vm5, 1, %v4989_v2  ;;  %v507_v14 = vadd.s32 %v501_v53, %v497_v49  ;;  %v480_v16 = vshrl.u32 %v476_v58, 16 }
  0xc3   :  { %v675_v57 = vadd.s32 %v674_v1, %v670_v9  ;;  %v482_v19 = vshrl.u32 %v477_v23, 16  ;;  %v490_v8 = vadd.s32 %v488_v61, %v486_v44  ;;  %v506_v31 = vsel %vm505_vm6, 1, %v4989_v2 }
  0xc4   :  { %v502_v29 = vshrl.u32 %v498_v46, 16  ;;  %v508_v60 = vadd.s32 %v506_v31, %v500_v63  ;;  %vm509_vm9 = vc.u32 %v507_v14, %v503_v35  ;;  %v5007_v36 = vmov 2475754826  }
  0xc5   :  { %v676_v25 = vadd.s32 536870912, %v675_v57  ;;  %v491_v6 = vadd.s32 %v490_v8, %v480_v16  ;;  %v510_v11 = vsel %vm509_vm9, 1, %v4989_v2  ;;  %v287_v32 = vshll.u32 %v5007_v36, %v3058_v37 }
  0xc6   :  { %v288_v9 = vshrl.u32 %v4991_v22, %v3075_v45  ;;  %v512_v58 = vadd.s32 %v510_v11, %v508_v60  ;;  %v290_v23 = vshll.u32 %v4991_v22, %v3058_v37  ;;  %v5008_v62 = vmov 2102212464  }
  0xc7   :  { %v3218_v24 = vshrl.u32 %v676_v25, 30  ;;  %v291_v46 = vshrl.u32 %v5008_v62, %v3075_v45  ;;  %v458_v56 = vsel %vm454_vm7, %v3138_v51, %v3130_v38  ;;  %v460_v53 = vsel %vm456_vm8, %v3132_v39, %v3172_v47 }
  0xc8   :  { %v492_v20 = vadd.s32 %v491_v6, %v482_v19  ;;  %v3232_v34 = vor.u32 %v288_v9, %v287_v32  ;;  %v504_v27 = vshrl.u32 %v499_v5, 16  ;;  %v513_v37 = vadd.s32 %v512_v58, %v502_v29 }
  0xc9   :  { %v678_v10 = vshll.u32 %v3218_v24, 30  ;;  %v3235_v49 = vor.u32 %v291_v46, %v290_v23  ;;  %v5009_v63 = vmov 1326507024   ;;  %v308_v38 = vsel %vm302_vm3, %v3125_v30, 920167782 }
  0xca   :  { %v3239_v1 = vshrl.u32 %v5009_v63, %v3065_v41  ;;  %v5010_v39 = vor.u32 %v3105_v0, %v3096_v59  ;;  %v511_v47 = vadd.s32 %v507_v14, %v503_v35  ;;  %v461_v5 = vsel %vm455_vm13, %v458_v56, %v460_v53 }
  0xcb   :  { %v679_v44 = vsub.s32 %v675_v57, %v678_v10  ;;  %v514_v61 = vadd.s32 %v513_v37, %v504_v27  ;;  %vm299_vm7 = vcmp.lt.s32.totalorder %v3090_v55, 1  ;;  %vm301_vm10 = vcmp.lt.s32.totalorder %v3090_v55, 3 }
  0xcc   :  { %v312_v51 = vsel %vm302_vm3, %v5010_v39, 1326507024  ;;  %vm517_vm8 = vc.u32 %v492_v20, %v511_v47  ;;  %v307_v16 = vsel %vm299_vm7, %v3134_v42, %v3232_v34  ;;  %v311_v59 = vsel %vm299_vm7, %v3232_v34, %v3235_v49 }
  0xcd   :  { %vm680_vm11 = vcmp.lt.s32.totalorder %v679_v44, 0  ;;  %v681_v0 = vsub.s32 0, %v679_v44  ;;  %v518_v17 = vadd.s32 1, %v514_v61  ;;  %v309_v35 = vsel %vm301_vm10, %v3235_v49, %v308_v38 }
  0xce   :  { %v515_v57 = vmul.u32 %v3191_v7, %v461_v5  ;;  %vm300_vm12 = vcmp.lt.s32.totalorder %v3090_v55, 2  ;;  %v313_v14 = vsel %vm301_vm10, %v3125_v30, %v312_v51  ;;  %v5011_v19 = vor.u32 8388608, %v3062_v40 }
  0xcf   :  { %v5012_v31 = vmov 920167782   ;;  %v682_v29 = vsel %vm680_vm11, %v681_v0, %v679_v44  ;;  %v519_v60 = vsel %vm517_vm8, %v518_v17, %v514_v61  ;;  %v314_v6 = vsel %vm300_vm12, %v311_v59, %v313_v14 }
  0xd0   :  { %v3271_v8 = vshll.u32 %v5011_v19, 8  ;;  %v3275_v25 = vshll.u32 %v5012_v31, %v3055_v33  ;;  %v3281_v7 = vor.u32 %v3088_v54, %v3083_v50  ;;  %v683_v11 = vclz %v682_v29 }
  0xd1   :  { %v520_v32 = vadd.s32 %v519_v60, %v515_v57  ;;  %v3285_v40 = vsel %vm300_vm12, %v307_v16, %v309_v35  ;;  %vm579_vm13 = vcmp.lt.s32.totalorder %v3068_v43, 0  ;;  %v283_v9 = vshrl.u32 %v4995_v3, %v3075_v45 }
  0xd2   :  { %v143_v30 = vor.u32 %v3239_v1, %v3275_v25  ;;  %v318_v58 = vand.u32 65535, %v314_v6  ;;  %v2839_v23 = vadd.s32 4294967294, %v683_v11  ;;  %v316_v50 = vand.u32 65535, %v3271_v8 }
  0xd3   :  { %v521_v46 = vadd.s32 536870912, %v520_v32  ;;  %v319_v54 = vshrl.u32 %v314_v6, 16  ;;  %v5013_v56 = vand.u32 2147483647, %v3068_v43  ;;  %v701_v10 = vsub.s32 4, %v3218_v24 }
  0xd4   :  { %v317_v27 = vshrl.u32 %v3271_v8, 16  ;;  %v341_v37 = vshrl.u32 %v3285_v40, 16  ;;  %v671_v45 = vadd.s32 %v3205_v4, %v3203_v52  ;;  %vm2840_vm15 = vcmp.lt.s32.totalorder %v2839_v23, 0 }
  0xd5   :  { %vm3295_vm14 = vcmp.le.f32.partialorder %v5013_v56, 0.7853982  ;;  %v3304_v38 = vshrl.u32 %v521_v46, 30  ;;  %v321_v39 = vmul.u32 %v319_v54, %v316_v50  ;;  %v686_v51 = vsel %vm2840_vm15, 0, %v2839_v23 }
  0xd6   :  { %v3306_v5 = vadd.s32 %v511_v47, %v492_v20  ;;  %v3308_v61 = vmul.u32 %v318_v58, %v317_v27  ;;  %v340_v16 = vand.u32 65535, %v3285_v40  ;;  %v687_v59 = vsub.s32 32, %v686_v51 }
  0xd7   :  { %v691_v0 = vsub.s32 4294967266, %v686_v51  ;;  %v523_v17 = vshll.u32 %v3304_v38, 30  ;;  %v3315_v35 = vsel %vm299_vm7, %v283_v9, %v3134_v42  ;;  %v702_v52 = vsel %vm579_vm13, %v701_v10, %v3218_v24 }
  0xd8   :  { %v320_v4 = vmul.u32 %v318_v58, %v316_v50  ;;  %v324_v20 = vshll.u32 %v321_v39, 16  ;;  %v343_v47 = vmul.u32 %v341_v37, %v316_v50  ;;  %v688_v57 = vshll.u32 %v679_v44, %v686_v51 }
  0xd9   :  { %v689_v14 = vshrl.u32 %v671_v45, %v687_v59  ;;  %v692_v19 = vadd.s32 127, %v691_v0  ;;  %v524_v29 = vsub.s32 %v520_v32, %v523_v17  ;;  %v326_v60 = vshll.u32 %v3308_v61, 16 }
  0xda   :  { %vm328_vm0 = vc.u32 %v320_v4, %v324_v20  ;;  %v330_v6 = vadd.s32 %v324_v20, %v320_v4  ;;  %v344_v11 = vmul.u32 %v340_v16, %v317_v27  ;;  %v323_v9 = vmul.u32 %v319_v54, %v317_v27 }
  0xdb   :  { %v690_v40 = vor.u32 %v689_v14, %v688_v57  ;;  %v693_v23 = vshll.u32 %v692_v19, 23  ;;  %vm525_vm1 = vcmp.lt.s32.totalorder %v524_v29, 0  ;;  %v526_v42 = vsub.s32 0, %v524_v29 }
  0xdc   :  { %v329_v46 = vsel %vm328_vm0, 1, %v4989_v2  ;;  %vm332_vm2 = vc.u32 %v330_v6, %v326_v60  ;;  %v346_v24 = vshll.u32 %v343_v47, 16  ;;  %v704_v44 = vsel %vm3295_vm14, 0, %v702_v52 }
  0xdd   :  { %v694_v58 = vor.u32 4788187, %v693_v23  ;;  %v527_v56 = vsel %vm525_vm1, %v526_v42, %v524_v29  ;;  %v304_v32 = vsel %vm302_vm3, %v3235_v49, 2102212464  ;;  %v331_v45 = vadd.s32 %v329_v46, %v323_v9 }
  0xde   :  { %v528_v10 = vclz %v527_v56  ;;  %v333_v51 = vsel %vm332_vm2, 1, %v4989_v2  ;;  %v342_v59 = vmul.u32 %v340_v16, %v316_v50  ;;  %v697_v54 = vcvt.s32.f32 %v690_v40 }
  0xdf   :  { %v695_v0 = vand.u32 2147483647, %v694_v58  ;;  %v325_v17 = vshrl.u32 %v321_v39, 16  ;;  %v348_v4 = vshll.u32 %v344_v11, 16  ;;  %v335_v57 = vadd.s32 %v333_v51, %v331_v45 }
  0xe0   :  { %v2836_v20 = vadd.s32 4294967294, %v528_v10  ;;  %vm350_vm4 = vc.u32 %v342_v59, %v346_v24  ;;  %v352_v14 = vadd.s32 %v346_v24, %v342_v59  ;;  %v721_v52 = vadd.s32 3, %v704_v44 }
  0xe1   :  { %v698_v19 = vmul.f32 %v697_v54, %v695_v0  ;;  %v305_v60 = vsel %vm301_vm10, %v3232_v34, %v304_v32  ;;  %v345_v49 = vmul.u32 %v341_v37, %v317_v27  ;;  %v336_v6 = vadd.s32 %v335_v57, %v325_v17 }
  0xe2   :  { %vm2837_vm3 = vcmp.lt.s32.totalorder %v2836_v20, 0  ;;  %v351_v23 = vsel %vm350_vm4, 1, %v4989_v2  ;;  %vm354_vm5 = vc.u32 %v352_v14, %v348_v4  ;;  %vm147_vm6 = vcmp.lt.s32.totalorder %v3079_v48, 4 }
  0xe3   :  { %v699_v50 = vxor.u32 2147483648, %v698_v19  ;;  %v531_v16 = vsel %vm2837_vm3, 0, %v2836_v20  ;;  %v353_v39 = vadd.s32 %v351_v23, %v345_v49  ;;  %v355_v40 = vsel %vm354_vm5, 1, %v4989_v2 }
  0xe4   :  { %v532_v42 = vsub.s32 32, %v531_v16  ;;  %v536_v9 = vsub.s32 4294967266, %v531_v16  ;;  %v546_v46 = vsub.s32 4, %v3304_v38  ;;  %v327_v24 = vshrl.u32 %v3308_v61, 16 }
  0xe5   :  { %v700_v34 = vsel %vm579_vm13, %v699_v50, %v698_v19  ;;  %v533_v27 = vshll.u32 %v524_v29, %v531_v16  ;;  %v347_v37 = vshrl.u32 %v343_v47, 16  ;;  %v357_v58 = vadd.s32 %v355_v40, %v353_v39 }
  0xe6   :  { %v3341_v44 = vsel %vm3295_vm14, %v3068_v43, %v700_v34  ;;  %v534_v56 = vshrl.u32 %v3306_v5, %v532_v42  ;;  %v537_v32 = vadd.s32 127, %v536_v9  ;;  %v3344_v10 = vadd.s32 %v336_v6, %v327_v24 }
  0xe7   :  { %v705_v45 = vmul.f32 %v3341_v44, %v3341_v44  ;;  %vm424_vm9 = vcmp.lt.s32.totalorder %v3051_v28, 0  ;;  %v349_v61 = vshrl.u32 %v344_v11, 16  ;;  %v358_v51 = vadd.s32 %v357_v58, %v347_v37 }
  0xe8   :  { %v535_v29 = vor.u32 %v534_v56, %v533_v27  ;;  %v538_v47 = vshll.u32 %v537_v32, 23  ;;  %v306_v53 = vsel %vm300_vm12, %v3315_v35, %v305_v60  ;;  %v3352_v59 = vadd.s32 %v352_v14, %v348_v4 }
  0xe9   :  { %v706_v0 = vmul.f32 -0.001358992, %v705_v45  ;;  %v713_v5 = vmul.f32 -0.00019511016, %v705_v45  ;;  %v547_v54 = vsel %vm424_vm9, %v546_v46, %v3304_v38  ;;  %v359_v17 = vadd.s32 %v358_v51, %v349_v61 }
  0xea   :  { %v3357_v20 = vand.u32 3, %v721_v52  ;;  %v5016_v11 = vand.u32 2147483647, %v3051_v28  ;;  %v539_v19 = vor.u32 4788187, %v538_v47  ;;  %vm362_vm8 = vc.u32 %v3344_v10, %v3352_v59 }
  0xeb   :  { %v707_v55 = vadd.f32 0.041655596, %v706_v0  ;;  %v714_v35 = vadd.f32 0.008332121, %v713_v5  ;;  %v360_v4 = vmul.u32 %v3271_v8, %v306_v53  ;;  %v363_v14 = vadd.s32 1, %v359_v17 }
  0xec   :  { %vm3361_vm7 = vcmp.le.f32.partialorder %v5016_v11, 0.7853982  ;;  %v540_v60 = vand.u32 2147483647, %v539_v19  ;;  %v542_v38 = vcvt.s32.f32 %v535_v29  ;;  %v112_v49 = vand.u32 2147483647, %v3039_v15 }
  0xed   :  { %v549_v52 = vsel %vm3361_vm7, 0, %v547_v54  ;;  %v153_v6 = vsel %vm147_vm6, %v3281_v7, 920167782  ;;  %v708_v23 = vmul.f32 %v707_v55, %v705_v45  ;;  %v715_v50 = vmul.f32 %v714_v35, %v705_v45 }
  0xee   :  { %v364_v16 = vsel %vm362_vm8, %v363_v14, %v359_v17  ;;  %v157_v8 = vsel %vm147_vm6, %v143_v30, 1326507024  ;;  %v543_v39 = vmul.f32 %v542_v38, %v540_v60  ;;  %v130_v42 = vshrl.u32 %v5007_v36, %v3065_v41 }
  0xef   :  { %v365_v40 = vadd.s32 %v364_v16, %v360_v4  ;;  %v709_v9 = vadd.f32 -0.4999988, %v708_v23  ;;  %v716_v46 = vadd.f32 -0.16666654, %v715_v50  ;;  %v566_v24 = vadd.s32 3, %v549_v52 }
  0xf0   :  { %v133_v34 = vshrl.u32 %v4991_v22, %v3065_v41  ;;  %vm724_vm10 = vcmp.eq.s32.totalorder %v3357_v20, 0  ;;  %vm727_vm11 = vcmp.eq.s32.totalorder %v3357_v20, 2  ;;  %v544_v27 = vxor.u32 2147483648, %v543_v39 }
  0xf1   :  { %v366_v1 = vadd.s32 536870912, %v365_v40  ;;  %v119_v25 = vand.u32 8388607, %v112_v49  ;;  %v129_v30 = vshll.u32 %v4995_v3, %v3055_v33  ;;  %v710_v37 = vmul.f32 %v709_v9, %v705_v45 }
  0xf2   :  { %v717_v58 = vmul.f32 %v716_v46, %v705_v45  ;;  %vm723_vm12 = vcmp.lt.s32.totalorder %v3357_v20, 2  ;;  %v132_v56 = vshll.u32 %v5007_v36, %v3055_v33  ;;  %v136_v32 = vshrl.u32 %v5008_v62, %v3065_v41 }
  0xf3   :  { %vm720_vm13 = vweird.f32 %v3068_v43  ;;  %v545_v61 = vsel %vm424_vm9, %v544_v27, %v543_v39  ;;  %v3397_v51 = vshrl.u32 %v366_v1, 30  ;;  %v3399_v29 = vor.u32 %v130_v42, %v129_v30 }
  0xf4   :  { %v135_v45 = vshll.u32 %v4991_v22, %v3055_v33  ;;  %v711_v47 = vadd.f32 1.0, %v710_v37  ;;  %v718_v53 = vadd.f32 1.0, %v717_v58  ;;  %v548_v0 = vsel %vm3361_vm7, %v3051_v28, %v545_v61 }
  0xf5   :  { %v3406_v5 = vor.u32 %v133_v34, %v132_v56  ;;  %v550_v54 = vmul.f32 %v548_v0, %v548_v0  ;;  %v3408_v17 = vand.u32 3, %v566_v24  ;;  %v368_v11 = vshll.u32 %v3397_v51, 30 }
  0xf6   :  { %v120_v19 = vor.u32 8388608, %v119_v25  ;;  %v719_v55 = vmul.f32 %v718_v53, %v3341_v44  ;;  %v728_v35 = vxor.u32 2147483648, %v711_v47  ;;  %v3412_v4 = vor.u32 %v136_v32, %v135_v45 }
  0xf7   :  { %vm144_vm14 = vcmp.lt.s32.totalorder %v3079_v48, 1  ;;  %v551_v33 = vmul.f32 -0.001358992, %v550_v54  ;;  %v558_v14 = vmul.f32 -0.00019511016, %v550_v54  ;;  %v369_v60 = vsub.s32 %v365_v40, %v368_v11 }
  0xf8   :  { %vm146_vm15 = vcmp.lt.s32.totalorder %v3079_v48, 3  ;;  %v725_v57 = vxor.u32 2147483648, %v719_v55  ;;  %vm145_vm0 = vcmp.lt.s32.totalorder %v3079_v48, 2  ;;  %v152_v38 = vsel %vm144_vm14, %v3399_v29, %v3406_v5 }
  0xf9   :  { %v158_v44 = vsel %vm146_vm15, %v3281_v7, %v157_v8  ;;  %v552_v52 = vadd.f32 0.041655596, %v551_v33  ;;  %v559_v23 = vadd.f32 0.008332121, %v558_v14  ;;  %vm370_vm1 = vcmp.lt.s32.totalorder %v369_v60, 0 }
  0xfa   :  { %v371_v50 = vsub.s32 0, %v369_v60  ;;  %v726_v16 = vsel %vm724_vm10, %v711_v47, %v725_v57  ;;  %v729_v39 = vsel %vm727_vm11, %v728_v35, %v719_v55  ;;  %v154_v40 = vsel %vm146_vm15, %v3412_v4, %v153_v6 }
  0xfb   :  { %v156_v42 = vsel %vm144_vm14, %v3406_v5, %v3412_v4  ;;  %v730_v7 = vsel %vm723_vm12, %v726_v16, %v729_v39  ;;  %v553_v8 = vmul.f32 %v552_v52, %v550_v54  ;;  %v560_v9 = vmul.f32 %v559_v23, %v550_v54 }
  0xfc   :  { %v372_v46 = vsel %vm370_vm1, %v371_v50, %v369_v60  ;;  %v731_v24 = vsel %vm720_vm13, nan, %v730_v7  ;;  %v159_v27 = vsel %vm145_vm0, %v156_v42, %v158_v44  ;;  %v3441_v1 = vshll.u32 %v120_v19, 8 }
  0xfd   :  { %v373_v34 = vclz %v372_v46  ;;  %777 = vmatpush.msra.mxu1 %v731_v24  ;;  %v554_v6 = vadd.f32 -0.4999988, %v553_v8  ;;  %v561_v25 = vadd.f32 -0.16666654, %v560_v9  ;;  %vm569_vm2 = vcmp.eq.s32.totalorder %v3408_v17, 0 }
  0xfe   :  { %v155_v20 = vsel %vm145_vm0, %v152_v38, %v154_v40  ;;  %vm568_vm4 = vcmp.lt.s32.totalorder %v3408_v17, 2  ;;  %v163_v43 = vand.u32 65535, %v159_v27  ;;  %v164_v56 = vshrl.u32 %v159_v27, 16 }
  0xff   :  { %v2833_v30 = vadd.s32 4294967294, %v373_v34  ;;  %v555_v37 = vmul.f32 %v554_v6, %v550_v54  ;;  %v562_v58 = vmul.f32 %v561_v25, %v550_v54  ;;  %vm572_vm3 = vcmp.eq.s32.totalorder %v3408_v17, 2 }
 0x100   :  { %v361_v32 = vadd.s32 %v3352_v59, %v3344_v10  ;;  %v161_v61 = vand.u32 65535, %v3441_v1  ;;  %v162_v11 = vshrl.u32 %v3441_v1, 16  ;;  %v186_v35 = vshrl.u32 %v155_v20, 16 }
 0x101   :  { %vm2834_vm5 = vcmp.lt.s32.totalorder %v2833_v30, 0  ;;  %v556_v45 = vadd.f32 1.0, %v555_v37  ;;  %v563_v47 = vadd.f32 1.0, %v562_v58  ;;  %v185_v39 = vand.u32 65535, %v155_v20 }
 0x102   :  { %v376_v53 = vsel %vm2834_vm5, 0, %v2833_v30  ;;  %v166_v54 = vmul.u32 %v164_v56, %v161_v61  ;;  %v165_v57 = vmul.u32 %v163_v43, %v161_v61  ;;  %v167_v38 = vmul.u32 %v163_v43, %v162_v11 }
 0x103   :  { %v377_v19 = vsub.s32 32, %v376_v53  ;;  %v381_v55 = vsub.s32 4294967266, %v376_v53  ;;  %v564_v33 = vmul.f32 %v563_v47, %v548_v0  ;;  %v573_v14 = vxor.u32 2147483648, %v556_v45 }
 0x104   :  { %v378_v44 = vshll.u32 %v369_v60, %v376_v53  ;;  %v169_v10 = vshll.u32 %v166_v54, 16  ;;  %v168_v16 = vmul.u32 %v164_v56, %v162_v11  ;;  %v171_v8 = vshll.u32 %v167_v38, 16 }
 0x105   :  { %v379_v52 = vshrl.u32 %v361_v32, %v377_v19  ;;  %v382_v23 = vadd.s32 127, %v381_v55  ;;  %v570_v59 = vxor.u32 2147483648, %v564_v33  ;;  %v574_v50 = vsel %vm572_vm3, %v573_v14, %v564_v33 }
 0x106   :  { %vm173_vm9 = vc.u32 %v165_v57, %v169_v10  ;;  %v175_v7 = vadd.s32 %v169_v10, %v165_v57  ;;  %v188_v60 = vmul.u32 %v186_v35, %v161_v61  ;;  %vm565_vm7 = vweird.f32 %v3051_v28 }
 0x107   :  { %v380_v40 = vor.u32 %v379_v52, %v378_v44  ;;  %v383_v42 = vshll.u32 %v382_v23, 23  ;;  %v571_v0 = vsel %vm569_vm2, %v556_v45, %v570_v59  ;;  %v174_v9 = vsel %vm173_vm9, 1, %v4989_v2 }
 0x108   :  { %v575_v46 = vsel %vm568_vm4, %v571_v0, %v574_v50  ;;  %v176_v34 = vadd.s32 %v174_v9, %v168_v16  ;;  %vm177_vm8 = vc.u32 %v175_v7, %v171_v8  ;;  %v187_v6 = vmul.u32 %v185_v39, %v161_v61 }
 0x109   :  { %v384_v24 = vor.u32 4788187, %v383_v42  ;;  %v576_v27 = vsel %vm565_vm7, nan, %v575_v46  ;;  %v189_v25 = vmul.u32 %v185_v39, %v162_v11  ;;  %v387_v20 = vcvt.s32.f32 %v380_v40 }
 0x10a   :  { %778 = vmatpush.msra.mxu1 %v576_v27  ;;  %v178_v37 = vsel %vm177_vm8, 1, %v4989_v2  ;;  %v191_v58 = vshll.u32 %v188_v60, 16  ;;  %v170_v43 = vshrl.u32 %v166_v54, 16  ;;  %v190_v32 = vmul.u32 %v186_v35, %v162_v11 }
 0x10b   :  { %v385_v30 = vand.u32 2147483647, %v384_v24  ;;  %v180_v56 = vadd.s32 %v178_v37, %v176_v34  ;;  %v193_v28 = vshll.u32 %v189_v25, 16  ;;  %v128_v47 = vshrl.u32 %v4995_v3, %v3065_v41 }
 0x10c   :  { %vm195_vm10 = vc.u32 %v187_v6, %v191_v58  ;;  %v197_v17 = vadd.s32 %v191_v58, %v187_v6  ;;  %v149_v55 = vsel %vm147_vm6, %v3412_v4, 2102212464  ;;  %v5019_v54 = vand.u32 2147483647, %v3045_v21 }
 0x10d   :  { %v388_v45 = vmul.f32 %v387_v20, %v385_v30  ;;  %v181_v53 = vadd.s32 %v180_v56, %v170_v43  ;;  %v196_v61 = vsel %vm195_vm10, 1, %v4989_v2  ;;  %vm269_vm13 = vcmp.lt.s32.totalorder %v3045_v21, 0 }
 0x10e   :  { %v198_v33 = vadd.s32 %v196_v61, %v190_v32  ;;  %vm199_vm11 = vc.u32 %v197_v17, %v193_v28  ;;  %vm3469_vm12 = vcmp.le.f32.partialorder %v5019_v54, 0.7853982  ;;  %v172_v35 = vshrl.u32 %v167_v38, 16 }
 0x10f   :  { %v389_v19 = vxor.u32 2147483648, %v388_v45  ;;  %v200_v41 = vsel %vm199_vm11, 1, %v4989_v2  ;;  %v148_v4 = vsel %vm144_vm14, %v128_v47, %v3399_v29  ;;  %v192_v57 = vshrl.u32 %v188_v60, 16 }
 0x110   :  { %v202_v44 = vadd.s32 %v200_v41, %v198_v33  ;;  %v391_v52 = vsub.s32 4, %v3397_v51  ;;  %v150_v38 = vsel %vm146_vm15, %v3406_v5, %v149_v55  ;;  %v182_v10 = vadd.s32 %v181_v53, %v172_v35 }
 0x111   :  { %v390_v14 = vsel %vm269_vm13, %v389_v19, %v388_v45  ;;  %v194_v50 = vshrl.u32 %v189_v25, 16  ;;  %v201_v39 = vadd.s32 %v197_v17, %v193_v28  ;;  %v151_v29 = vsel %vm145_vm0, %v148_v4, %v150_v38 }
 0x112   :  { %v393_v23 = vsel %vm3469_vm12, %v3045_v21, %v390_v14  ;;  %v203_v16 = vadd.s32 %v202_v44, %v192_v57  ;;  %v392_v0 = vsel %vm269_vm13, %v391_v52, %v3397_v51  ;;  %v205_v5 = vmul.u32 %v3441_v1, %v151_v29 }
 0x113   :  { %v395_v59 = vmul.f32 %v393_v23, %v393_v23  ;;  %vm207_vm6 = vc.u32 %v182_v10, %v201_v39  ;;  %v394_v46 = vsel %vm3469_vm12, 0, %v392_v0  ;;  %vm410_vm2 = vweird.f32 %v3045_v21 }
 0x114   :  { %v204_v7 = vadd.s32 %v203_v16, %v194_v50  ;;  %v411_v30 = vadd.s32 3, %v394_v46  ;;  %v206_v14 = vadd.s32 %v201_v39, %v182_v10  ;;  %vm114_vm3 = vcmp.lt.s32.totalorder %v3039_v15, 0 }
 0x115   :  { %v396_v40 = vmul.f32 -0.001358992, %v395_v59  ;;  %v403_v42 = vmul.f32 -0.00019511016, %v395_v59  ;;  %vm3499_vm5 = vcmp.le.f32.partialorder %v112_v49, 0.7853982  ;;  %vm255_vm10 = vweird.f32 %v3039_v15 }
 0x116   :  { %v208_v60 = vadd.s32 1, %v204_v7  ;;  %v412_v32 = vand.u32 3, %v411_v30  ;;  %vm752_vm11 = vcmask 261120  }
 0x117   :  { %v397_v8 = vadd.f32 0.041655596, %v396_v40  ;;  %v404_v9 = vadd.f32 0.008332121, %v403_v42 }
 0x118   :  { %v209_v27 = vsel %vm207_vm6, %v208_v60, %v204_v7  ;;  %vm414_vm14 = vcmp.eq.s32.totalorder %v412_v32, 0  ;;  %vm417_vm15 = vcmp.eq.s32.totalorder %v412_v32, 2  ;;  %vm413_vm1 = vcmp.lt.s32.totalorder %v412_v32, 2  ;;  %v42_v32 = vld [vmem:[%s4972_s4 + $0x10] sm:$0xff] }
 0x119   :  { %v398_v24 = vmul.f32 %v397_v8, %v395_v59  ;;  %v405_v34 = vmul.f32 %v404_v9, %v395_v59  ;;  %v210_v6 = vadd.s32 %v209_v27, %v205_v5  ;;  %v43_v27 = vld [vmem:[%s4972_s4 + $0x18] sm:$0xff]  ;;  %s2813_s4 = sshll.u32 %s2953_s29, 4  ;;  %s2814_s4 = int_to_ptr.vmem [resolvable:$true] %s2813_s4 }
 0x11a   :  { %749 = vperm.xlu2 %2899, %v43_v27  }
 0x11b   :  { %v399_v48 = vadd.f32 -0.4999988, %v398_v24  ;;  %v406_v25 = vadd.f32 -0.16666654, %v405_v34  ;;  %v211_v20 = vadd.s32 536870912, %v210_v6 }
 0x11d   :  { %v400_v37 = vmul.f32 %v399_v48, %v395_v59  ;;  %v407_v58 = vmul.f32 %v406_v25, %v395_v59  ;;  %v212_v51 = vshrl.u32 %v211_v20, 30 }
 0x11f   :  { %v401_v43 = vadd.f32 1.0, %v400_v37  ;;  %v408_v56 = vadd.f32 1.0, %v407_v58  ;;  %v213_v45 = vshll.u32 %v212_v51, 30  ;;  %v236_v39 = vsub.s32 4, %v212_v51 }
 0x121   :  { %v409_v28 = vmul.f32 %v408_v56, %v393_v23  ;;  %v418_v1 = vxor.u32 2147483648, %v401_v43  ;;  %v214_v17 = vsub.s32 %v210_v6, %v213_v45  ;;  %v237_v60 = vsel %vm114_vm3, %v236_v39, %v212_v51 }
 0x122   :  { %v239_v24 = vsel %vm3499_vm5, 0, %v237_v60  ;;  %744 = vperm.xlu2 %2899, %v42_v32   ;;  %v3599_v32 = vld [vmem:[%s4969_s1] sm:$0xff] }
 0x123   :  { %v415_v47 = vxor.u32 2147483648, %v409_v28  ;;  %vm215_vm0 = vcmp.lt.s32.totalorder %v214_v17, 0  ;;  %v216_v53 = vsub.s32 0, %v214_v17  ;;  %v419_v19 = vsel %vm417_vm15, %v418_v1, %v409_v28 }
 0x124   :  { %v256_v25 = vadd.s32 3, %v239_v24 }
 0x125   :  { %v416_v61 = vsel %vm414_vm14, %v401_v43, %v415_v47  ;;  %v217_v33 = vsel %vm215_vm0, %v216_v53, %v214_v17  ;;  %v36_v47 = vld [vmem:[%s4971_s3] sm:$0xff] }
 0x126   :  { %v420_v55 = vsel %vm413_vm1, %v416_v61, %v419_v19  ;;  %v218_v11 = vclz %v217_v33  ;;  %v257_v51 = vand.u32 3, %v256_v25  ;;  %v45_v61 = vld [vmem:[%s4974_s6] sm:$0x3]  ;;  %v37_v19 = vld [vmem:[%s4971_s3 + $0x8] sm:$0xff] }
 0x127   :  { %v421_v54 = vsel %vm410_vm2, nan, %v420_v55  ;;  %v38_v55 = vld [vmem:[%s4971_s3 + $0x10] sm:$0xff]  ;;  %v3539_v33 = vld [vmem:[%s4969_s1 + $0x8] sm:$0xff] }
 0x128   :  { %779 = vmatpush.msra.mxu1 %v421_v54  ;;  %v2830_v35 = vadd.s32 4294967294, %v218_v11  ;;  %vm259_vm9 = vcmp.eq.s32.totalorder %v257_v51, 0  ;;  %vm262_vm7 = vcmp.eq.s32.totalorder %v257_v51, 2  ;;  %vm258_vm8 = vcmp.lt.s32.totalorder %v257_v51, 2  ;;  %v39_v54 = vld [vmem:[%s4971_s3 + $0x18] sm:$0xff] }
 0x12a   :  { %vm2831_vm4 = vcmp.lt.s32.totalorder %v2830_v35, 0  ;;  %1416 = vperm.xlu2 %2899, %v45_v61  }
 0x12b   :  { %v221_v41 = vsel %vm2831_vm4, 0, %v2830_v35  ;;  %v3546_v35 = vpop.permute.xlu1 %734 }
 0x12c   :  { %v222_v4 = vsub.s32 32, %v221_v41  ;;  %v226_v57 = vsub.s32 4294967266, %v221_v41  ;;  %v223_v44 = vshll.u32 %v214_v17, %v221_v41  ;;  %5024 = vst [vmem:[#allocation6_spill] sm:$0xff] %v3546_v35 }
 0x12e   :  { %v224_v52 = vshrl.u32 %v206_v14, %v222_v4  ;;  %v227_v23 = vadd.s32 127, %v226_v57  ;;  %v3554_v57 = vpop.permute.xlu0 %739 }
 0x12f   :  { %5026 = vst [vmem:[#allocation8_spill] sm:$0xff] %v3554_v57 }
 0x130   :  { %v225_v38 = vor.u32 %v224_v52, %v223_v44  ;;  %v228_v59 = vshll.u32 %v227_v23, 23 }
 0x132   :  { %v229_v50 = vor.u32 4788187, %v228_v59  ;;  %v232_v40 = vcvt.s32.f32 %v225_v38 }
 0x134   :  { %v230_v16 = vand.u32 2147483647, %v229_v50 }
 0x136   :  { %v233_v21 = vmul.f32 %v232_v40, %v230_v16  ;;  %v4987_v16 = vmov 1  }
 0x137   :  { %2900 = vset.pattern.permute.xlu1 %v4987_v16  ;;  %2901 = vset.pattern.permute.xlu0 %v4987_v16 }
 0x138   :  { %v234_v42 = vxor.u32 2147483648, %v233_v21 }
 0x13a   :  { %v235_v10 = vsel %vm114_vm3, %v234_v42, %v233_v21  ;;  %v3567_v42 = vld [vmem:[%s4969_s1 + $0x18] sm:$0xff] }
 0x13b   :  { %v238_v7 = vsel %vm3499_vm5, %v3039_v15, %v235_v10  ;;  %v3529_v15 = vld [vmem:[%s4969_s1 + $0x10] sm:$0xff]  ;;  %1476 = vperm.xlu1 %2900, %v3567_v42  }
 0x13c   :  { %v240_v0 = vmul.f32 %v238_v7, %v238_v7  ;;  %1451 = vperm.xlu2 %2899, %v3529_v15   ;;  %1472 = vperm.xlu0 %2901, %v3529_v15  }
 0x13e   :  { %v241_v8 = vmul.f32 -0.001358992, %v240_v0  ;;  %v248_v9 = vmul.f32 -0.00019511016, %v240_v0 }
 0x140   :  { %v242_v5 = vadd.f32 0.041655596, %v241_v8  ;;  %v249_v46 = vadd.f32 0.008332121, %v248_v9 }
 0x142   :  { %v243_v34 = vmul.f32 %v242_v5, %v240_v0  ;;  %v250_v49 = vmul.f32 %v249_v46, %v240_v0 }
 0x144   :  { %v244_v6 = vadd.f32 -0.4999988, %v243_v34  ;;  %v251_v48 = vadd.f32 -0.16666654, %v250_v49  ;;  %1447 = vperm.xlu2 %2899, %v3539_v33   ;;  %2902 = vset.pattern.permute.xlu0 %v4989_v2 }
 0x145   :  { %1455 = vperm.xlu0 %2902, %v3567_v42  }
 0x146   :  { %v245_v30 = vmul.f32 %v244_v6, %v240_v0  ;;  %v252_v20 = vmul.f32 %v251_v48, %v240_v0 }
 0x148   :  { %v246_v37 = vadd.f32 1.0, %v245_v30  ;;  %v253_v58 = vadd.f32 1.0, %v252_v20 }
 0x14a   :  { %v254_v43 = vmul.f32 %v253_v58, %v238_v7  ;;  %v263_v56 = vxor.u32 2147483648, %v246_v37 }
 0x14c   :  { %v260_v45 = vxor.u32 2147483648, %v254_v43  ;;  %v264_v1 = vsel %vm262_vm7, %v263_v56, %v254_v43 }
 0x14d   :  { %1443 = vperm.xlu0 %2902, %v3599_v32  }
 0x14e   :  { %v261_v28 = vsel %vm259_vm9, %v246_v37, %v260_v45 }
 0x14f   :  { %v265_v17 = vsel %vm258_vm8, %v261_v28, %v264_v1 }
 0x150   :  { %v266_v53 = vsel %vm255_vm10, nan, %v265_v17 }
 0x151   :  { %780 = vmatpush.msra.mxu1 %v266_v53 }
 0x152   :  { %2841 = vmatmul.msk.f32.vlgmr.msra.gmra.mxu1 %vm752_vm11, %v36_v47 }
 0x15a   :  { %2842 = vmatmul.msk.f32.gmra.mxu1 %vm752_vm11, %v37_v19 }
 0x162   :  { %2843 = vmatmul.msk.f32.gmra.mxu1 %vm752_vm11, %v38_v55 }
 0x16a   :  { %2844 = vmatmul.msk.f32.gmra.mxu1 %vm752_vm11, %v39_v54 }
 0x174   :  { %v3551_v14 = vpop.permute.xlu2 %749 }
 0x175   :  { %5025 = vst [vmem:[#allocation7_spill] sm:$0xff] %v3551_v14 }
 0x17c   :  { %v3562_v40 = vpop.permute.xlu2 %744 }
 0x17d   :  { %5027 = vst [vmem:[#allocation9_spill] sm:$0xff] %v3562_v40 }
 0x1cf   :  { %v782_v11 = vpop.f32.mrf.mxu1 }
 0x1d0   :  { %v3549_v41 = vadd.f32 %v782_v11, %v3546_v35 }
 0x1d2   :  { %v797_v4 = vand.u32 2139095040, %v3549_v41 }
 0x1d4   :  { %v798_v23 = vshrl.u32 %v797_v4, 23 }
 0x1d6   :  { %v2845_v50 = vadd.s32 4294967169, %v798_v23 }
 0x1d7   :  { %v785_v44 = vpop.f32.mrf.mxu1 }
 0x1d8   :  { %v3557_v52 = vadd.f32 %v785_v44, %v3554_v57  ;;  %v804_v39 = vadd.s32 1, %v2845_v50 }
 0x1da   :  { %v952_v38 = vand.u32 2139095040, %v3557_v52  ;;  %vm805_vm12 = vcmp.gt.s32.totalorder %v804_v39, 0 }
 0x1db   :  { %v806_v24 = vsel %vm805_vm12, %v804_v39, 0 }
 0x1dc   :  { %v953_v59 = vshrl.u32 %v952_v38, 23  ;;  %v3582_v48 = vand.u32 31, %v806_v24  ;;  %v3602_v28 = vshrl.u32 %v806_v24, 5 }
 0x1de   :  { %v2848_v29 = vadd.s32 4294967169, %v953_v59  ;;  %v3594_v56 = vsub.s32 32, %v3582_v48  ;;  %v3606_v1 = vshll.u32 %v5008_v62, %v3582_v48  ;;  %v3619_v19 = vshll.u32 %v5012_v31, %v3582_v48 }
 0x1df   :  { %v788_v21 = vpop.f32.mrf.mxu1 }
 0x1e0   :  { %v3572_v10 = vadd.f32 %v788_v21, %v3562_v40  ;;  %v959_v0 = vadd.s32 1, %v2848_v29  ;;  %v3623_v55 = vshrl.u32 %v5009_v63, %v3594_v56 }
 0x1e2   :  { %v1107_v7 = vand.u32 2139095040, %v3572_v10  ;;  %vm960_vm13 = vcmp.gt.s32.totalorder %v959_v0, 0 }
 0x1e3   :  { %v961_v27 = vsel %vm960_vm13, %v959_v0, 0 }
 0x1e4   :  { %v1108_v8 = vshrl.u32 %v1107_v7, 23  ;;  %v3588_v37 = vand.u32 31, %v961_v27  ;;  %v3625_v54 = vshrl.u32 %v961_v27, 5 }
 0x1e6   :  { %v2851_v9 = vadd.s32 4294967169, %v1108_v8  ;;  %v3609_v17 = vsub.s32 32, %v3588_v37  ;;  %v3633_v59 = vshll.u32 %v5008_v62, %v3588_v37  ;;  %v3641_v21 = vshll.u32 %v5012_v31, %v3588_v37 }
 0x1e7   :  { %v791_v60 = vpop.f32.mrf.mxu1 }
 0x1e8   :  { %v1114_v5 = vadd.s32 1, %v2851_v9  ;;  %v3577_v46 = vadd.f32 %v791_v60, %v3551_v14  ;;  %v3637_v50 = vshrl.u32 %v5012_v31, %v3609_v17 }
 0x1ea   :  { %vm1115_vm6 = vcmp.gt.s32.totalorder %v1114_v5, 0  ;;  %v1262_v34 = vand.u32 2139095040, %v3577_v46  ;;  %v4988_v49 = vand.u32 2147483647, %v3577_v46 }
 0x1eb   :  { %v1116_v6 = vsel %vm1115_vm6, %v1114_v5, 0  ;;  %vm984_vm6 = vcmp.lt.s32.totalorder %v3625_v54, 4 }
 0x1ec   :  { %v3584_v25 = vand.u32 31, %v1116_v6  ;;  %v1263_v30 = vshrl.u32 %v1262_v34, 23  ;;  %v1266_v20 = vand.u32 8388607, %v4988_v49  ;;  %v3643_v29 = vshrl.u32 %v1116_v6, 5 }
 0x1ee   :  { %v3591_v58 = vsub.s32 32, %v3584_v25  ;;  %v2854_v51 = vadd.s32 4294967169, %v1263_v30  ;;  %v1267_v43 = vor.u32 8388608, %v1266_v20  ;;  %v1130_v4 = vshll.u32 %v5008_v62, %v3584_v25 }
 0x1ef   :  { %v1133_v44 = vshll.u32 %v5012_v31, %v3584_v25  ;;  %vm1139_vm4 = vcmp.lt.s32.totalorder %v3643_v29, 4  ;;  %vm1136_vm8 = vcmp.lt.s32.totalorder %v3643_v29, 1  ;;  %vm1138_vm10 = vcmp.lt.s32.totalorder %v3643_v29, 3 }
 0x1f0   :  { %v1269_v45 = vadd.s32 1, %v2854_v51  ;;  %v1131_v47 = vshrl.u32 %v5012_v31, %v3591_v58  ;;  %v1134_v53 = vshrl.u32 %v5009_v63, %v3591_v58  ;;  %v3615_v61 = vshll.u32 %v1267_v43, 8 }
 0x1f1   :  { %vm1137_vm12 = vcmp.lt.s32.totalorder %v3643_v29, 2 }
 0x1f2   :  { %vm1270_vm14 = vcmp.gt.s32.totalorder %v1269_v45, 0  ;;  %v3645_v39 = vor.u32 %v1131_v47, %v1130_v4  ;;  %v1135_v7 = vor.u32 %v1134_v53, %v1133_v44  ;;  %v1308_v8 = vand.u32 65535, %v3615_v61 }
 0x1f3   :  { %v1271_v11 = vsel %vm1270_vm14, %v1269_v45, 0  ;;  %v1309_v5 = vshrl.u32 %v3615_v61, 16 }
 0x1f4   :  { %v1272_v23 = vshrl.u32 %v1271_v11, 5  ;;  %v1273_v38 = vand.u32 31, %v1271_v11  ;;  %v4994_v11 = vand.u32 2147483647, %v3572_v10 }
 0x1f6   :  { %v1274_v0 = vsub.s32 32, %v1273_v38  ;;  %v1285_v9 = vshll.u32 %v5008_v62, %v1273_v38  ;;  %v1288_v60 = vshll.u32 %v5012_v31, %v1273_v38  ;;  %vm1294_vm15 = vcmp.lt.s32.totalorder %v1272_v23, 4 }
 0x1f7   :  { %v1276_v27 = vshll.u32 %v4995_v3, %v1273_v38  ;;  %v1279_v30 = vshll.u32 %v5007_v36, %v1273_v38  ;;  %v1282_v51 = vshll.u32 %v4991_v22, %v1273_v38  ;;  %vm1291_vm0 = vcmp.lt.s32.totalorder %v1272_v23, 1 }
 0x1f8   :  { %v1286_v24 = vshrl.u32 %v5012_v31, %v1274_v0  ;;  %v1289_v34 = vshrl.u32 %v5009_v63, %v1274_v0  ;;  %v1277_v6 = vshrl.u32 %v5007_v36, %v1274_v0  ;;  %v1280_v20 = vshrl.u32 %v4991_v22, %v1274_v0 }
 0x1f9   :  { %v1283_v43 = vshrl.u32 %v5008_v62, %v1274_v0  ;;  %v1275_v4 = vshrl.u32 %v4995_v3, %v1274_v0  ;;  %vm1292_vm1 = vcmp.lt.s32.totalorder %v1272_v23, 2  ;;  %vm1293_vm2 = vcmp.lt.s32.totalorder %v1272_v23, 3 }
 0x1fa   :  { %v1287_v45 = vor.u32 %v1286_v24, %v1285_v9  ;;  %v1290_v47 = vor.u32 %v1289_v34, %v1288_v60  ;;  %v1278_v53 = vor.u32 %v1277_v6, %v1276_v27  ;;  %v1281_v44 = vor.u32 %v1280_v20, %v1279_v30 }
 0x1fb   :  { %v1284_v16 = vor.u32 %v1283_v43, %v1282_v51  ;;  %v1111_v0 = vand.u32 8388607, %v4994_v11  ;;  %v3670_v51 = vshrl.u32 %v5009_v63, %v3609_v17 }
 0x1fc   :  { %v1300_v49 = vsel %vm1294_vm15, %v1287_v45, 920167782  ;;  %v1304_v2 = vsel %vm1294_vm15, %v1290_v47, 1326507024  ;;  %v1299_v22 = vsel %vm1291_vm0, %v1278_v53, %v1281_v44  ;;  %v1295_v60 = vsel %vm1291_vm0, %v1275_v4, %v1278_v53 }
 0x1fd   :  { %v1296_v38 = vsel %vm1294_vm15, %v1284_v16, 2102212464  ;;  %v1301_v14 = vsel %vm1293_vm2, %v1284_v16, %v1300_v49  ;;  %v1303_v9 = vsel %vm1291_vm0, %v1281_v44, %v1284_v16  ;;  %v1305_v34 = vsel %vm1293_vm2, %v1287_v45, %v1304_v2 }
 0x1fe   :  { %v1302_v24 = vsel %vm1292_vm1, %v1299_v22, %v1301_v14  ;;  %v1297_v27 = vsel %vm1293_vm2, %v1281_v44, %v1296_v38  ;;  %v1306_v6 = vsel %vm1292_vm1, %v1303_v9, %v1305_v34  ;;  %v1145_v2 = vsel %vm1139_vm4, %v3645_v39, 920167782 }
 0x1ff   :  { %v1332_v30 = vand.u32 65535, %v1302_v24  ;;  %v1333_v20 = vshrl.u32 %v1302_v24, 16  ;;  %v1310_v49 = vand.u32 65535, %v1306_v6  ;;  %v1311_v16 = vshrl.u32 %v1306_v6, 16 }
 0x200   :  { %v1149_v22 = vsel %vm1139_vm4, %v1135_v7, 1326507024  ;;  %v3679_v45 = vsel %vm1292_vm1, %v1295_v60, %v1297_v27  ;;  %v1112_v4 = vor.u32 8388608, %v1111_v0  ;;  %v5028_v60 = vmov 0  }
 0x201   :  { %v1335_v14 = vmul.u32 %v1333_v20, %v1308_v8  ;;  %v1336_v43 = vmul.u32 %v1332_v30, %v1309_v5  ;;  %v1313_v47 = vmul.u32 %v1311_v16, %v1308_v8  ;;  %v1314_v53 = vmul.u32 %v1310_v49, %v1309_v5 }
 0x202   :  { %v1312_v44 = vmul.u32 %v1310_v49, %v1308_v8  ;;  %v1334_v38 = vmul.u32 %v1332_v30, %v1308_v8  ;;  %v1337_v9 = vmul.u32 %v1333_v20, %v1309_v5  ;;  %v1315_v34 = vmul.u32 %v1311_v16, %v1309_v5 }
 0x203   :  { %v1338_v24 = vshll.u32 %v1335_v14, 16  ;;  %v1316_v6 = vshll.u32 %v1313_v47, 16  ;;  %v1339_v11 = vshrl.u32 %v1335_v14, 16  ;;  %v1340_v3 = vshll.u32 %v1336_v43, 16 }
 0x204   :  { %v1317_v40 = vshrl.u32 %v1313_v47, 16  ;;  %v1341_v57 = vshrl.u32 %v1336_v43, 16  ;;  %v1318_v35 = vshll.u32 %v1314_v53, 16  ;;  %v5029_v8 = vmov 683565275  }
 0x205   :  { %vm1342_vm3 = vc.u32 %v1334_v38, %v1338_v24  ;;  %v1344_v7 = vadd.s32 %v1338_v24, %v1334_v38  ;;  %vm1320_vm5 = vc.u32 %v1312_v44, %v1316_v6  ;;  %v1322_v23 = vadd.s32 %v1316_v6, %v1312_v44 }
 0x206   :  { %v1343_v27 = vsel %vm1342_vm3, 1, %v5028_v60  ;;  %v1321_v26 = vsel %vm1320_vm5, 1, %v5028_v60  ;;  %v1121_v30 = vshll.u32 %v5029_v8, %v3584_v25  ;;  %v1124_v49 = vshll.u32 %v5007_v36, %v3584_v25 }
 0x207   :  { %v1345_v0 = vadd.s32 %v1343_v27, %v1337_v9  ;;  %vm1346_vm9 = vc.u32 %v1344_v7, %v1340_v3  ;;  %v1323_v5 = vadd.s32 %v1321_v26, %v1315_v34  ;;  %vm1324_vm7 = vc.u32 %v1322_v23, %v1318_v35 }
 0x208   :  { %v1347_v20 = vsel %vm1346_vm9, 1, %v5028_v60  ;;  %v1325_v16 = vsel %vm1324_vm7, 1, %v5028_v60  ;;  %v1122_v43 = vshrl.u32 %v5007_v36, %v3591_v58  ;;  %v5030_v47 = vmov 2131351028  }
 0x209   :  { %v1349_v14 = vadd.s32 %v1347_v20, %v1345_v0  ;;  %v1125_v44 = vshrl.u32 %v5030_v47, %v3591_v58  ;;  %v1319_v38 = vshrl.u32 %v1314_v53, 16  ;;  %v1327_v9 = vadd.s32 %v1325_v16, %v1323_v5 }
 0x20a   :  { %v1127_v26 = vshll.u32 %v5030_v47, %v3584_v25  ;;  %v1128_v35 = vshrl.u32 %v5008_v62, %v3591_v58  ;;  %v3697_v34 = vor.u32 %v1122_v43, %v1121_v30  ;;  %v3705_v53 = vshll.u32 %v1112_v4, 8 }
 0x20b   :  { %v1350_v24 = vadd.s32 %v1349_v14, %v1339_v11  ;;  %v3699_v6 = vor.u32 %v1125_v44, %v1124_v49  ;;  %v1328_v23 = vadd.s32 %v1327_v9, %v1317_v40  ;;  %v3707_v0 = vadd.s32 %v1344_v7, %v1340_v3 }
 0x20c   :  { %v3702_v27 = vor.u32 %v1128_v35, %v1127_v26  ;;  %v1150_v30 = vsel %vm1138_vm10, %v3645_v39, %v1149_v22  ;;  %v980_v7 = vor.u32 %v3670_v51, %v3641_v21  ;;  %v1153_v20 = vand.u32 65535, %v3705_v53 }
 0x20d   :  { %v1351_v25 = vadd.s32 %v1350_v24, %v1341_v57  ;;  %v1144_v11 = vsel %vm1136_vm8, %v3697_v34, %v3699_v6  ;;  %v3716_v5 = vadd.s32 %v1328_v23, %v1319_v38  ;;  %v3728_v57 = vor.u32 %v3637_v50, %v3633_v59 }
 0x20e   :  { %v1146_v40 = vsel %vm1138_vm10, %v3702_v27, %v1145_v2  ;;  %v1148_v3 = vsel %vm1136_vm8, %v3699_v6, %v3702_v27  ;;  %v1352_v2 = vmul.u32 %v3615_v61, %v3679_v45  ;;  %v1154_v50 = vshrl.u32 %v3705_v53, 16 }
 0x20f   :  { %v1355_v4 = vadd.s32 1, %v1351_v25  ;;  %v1147_v39 = vsel %vm1137_vm12, %v1144_v11, %v1146_v40  ;;  %v1151_v22 = vsel %vm1137_vm12, %v1148_v3, %v1150_v30  ;;  %vm1354_vm13 = vc.u32 %v3716_v5, %v3707_v0 }
 0x210   :  { %v1155_v49 = vand.u32 65535, %v1151_v22  ;;  %v1156_v16 = vshrl.u32 %v1151_v22, 16  ;;  %v3744_v14 = vshrl.u32 %v5012_v31, %v3594_v56  ;;  %v1177_v44 = vand.u32 65535, %v1147_v39 }
 0x211   :  { %v1356_v59 = vsel %vm1354_vm13, %v1355_v4, %v1351_v25  ;;  %v1178_v21 = vshrl.u32 %v1147_v39, 16  ;;  %v3752_v38 = vsel %vm984_vm6, %v3728_v57, 920167782  ;;  %v3756_v24 = vsel %vm984_vm6, %v980_v7, 1326507024 }
 0x212   :  { %v1357_v43 = vadd.s32 %v1356_v59, %v1352_v2  ;;  %v1158_v51 = vmul.u32 %v1156_v16, %v1153_v20  ;;  %v1159_v45 = vmul.u32 %v1155_v49, %v1154_v50  ;;  %v1181_v35 = vmul.u32 %v1177_v44, %v1154_v50 }
 0x213   :  { %v1180_v26 = vmul.u32 %v1178_v21, %v1153_v20  ;;  %v1157_v23 = vmul.u32 %v1155_v49, %v1153_v20  ;;  %v1160_v40 = vmul.u32 %v1156_v16, %v1154_v50  ;;  %v1179_v3 = vmul.u32 %v1177_v44, %v1153_v20 }
 0x214   :  { %v1358_v9 = vadd.s32 536870912, %v1357_v43  ;;  %v1161_v25 = vshll.u32 %v1158_v51, 16  ;;  %v1163_v39 = vshll.u32 %v1159_v45, 16  ;;  %v1182_v2 = vmul.u32 %v1178_v21, %v1154_v50 }
 0x215   :  { %v1183_v4 = vshll.u32 %v1180_v26, 16  ;;  %v1185_v63 = vshll.u32 %v1181_v35, 16  ;;  %v5031_v44 = vand.u32 2147483647, %v3557_v52  ;;  %v1120_v50 = vshrl.u32 %v5029_v8, %v3591_v58 }
 0x216   :  { %v3759_v30 = vshrl.u32 %v1358_v9, 30  ;;  %vm1165_vm14 = vc.u32 %v1157_v23, %v1161_v25  ;;  %v1167_v22 = vadd.s32 %v1161_v25, %v1157_v23  ;;  %v1162_v21 = vshrl.u32 %v1158_v51, 16 }
 0x217   :  { %v1166_v61 = vsel %vm1165_vm14, 1, %v5028_v60  ;;  %vm1187_vm15 = vc.u32 %v1179_v3, %v1183_v4  ;;  %v1189_v11 = vadd.s32 %v1183_v4, %v1179_v3  ;;  %v956_v31 = vand.u32 8388607, %v5031_v44 }
 0x218   :  { %v1360_v59 = vshll.u32 %v3759_v30, 30  ;;  %v1168_v7 = vadd.s32 %v1166_v61, %v1160_v40  ;;  %vm1169_vm0 = vc.u32 %v1167_v22, %v1163_v39  ;;  %v1188_v49 = vsel %vm1187_vm15, 1, %v5028_v60 }
 0x219   :  { %v1170_v16 = vsel %vm1169_vm0, 1, %v5028_v60  ;;  %v1190_v20 = vadd.s32 %v1188_v49, %v1182_v2  ;;  %vm1191_vm1 = vc.u32 %v1189_v11, %v1185_v63  ;;  %v1141_v61 = vsel %vm1139_vm4, %v3702_v27, 2102212464 }
 0x21a   :  { %v1361_v9 = vsub.s32 %v1357_v43, %v1360_v59  ;;  %v1172_v23 = vadd.s32 %v1170_v16, %v1168_v7  ;;  %v1192_v43 = vsel %vm1191_vm1, 1, %v5028_v60  ;;  %vm1261_vm3 = vcmp.lt.s32.totalorder %v3577_v46, 0 }
 0x21b   :  { %v1164_v40 = vshrl.u32 %v1159_v45, 16  ;;  %v1184_v4 = vshrl.u32 %v1180_v26, 16  ;;  %v1194_v39 = vadd.s32 %v1192_v43, %v1190_v20  ;;  %v1140_v58 = vsel %vm1136_vm8, %v1120_v50, %v3697_v34 }
 0x21c   :  { %vm1362_vm2 = vcmp.lt.s32.totalorder %v1361_v9, 0  ;;  %v1363_v25 = vsub.s32 0, %v1361_v9  ;;  %v1173_v3 = vadd.s32 %v1172_v23, %v1162_v21  ;;  %v1186_v51 = vshrl.u32 %v1181_v35, 16 }
 0x21d   :  { %v970_v2 = vshrl.u32 %v5030_v47, %v3609_v17  ;;  %v1195_v27 = vadd.s32 %v1194_v39, %v1184_v4  ;;  %v969_v49 = vshll.u32 %v5007_v36, %v3588_v37  ;;  %v1142_v45 = vsel %vm1138_vm10, %v3699_v6, %v1141_v61 }
 0x21e   :  { %v1364_v22 = vsel %vm1362_vm2, %v1363_v25, %v1361_v9  ;;  %v3779_v7 = vadd.s32 %v1173_v3, %v1164_v40  ;;  %v967_v26 = vshrl.u32 %v5007_v36, %v3609_v17  ;;  %v972_v34 = vshll.u32 %v5030_v47, %v3588_v37 }
 0x21f   :  { %v1365_v59 = vclz %v1364_v22  ;;  %v973_v35 = vshrl.u32 %v5008_v62, %v3609_v17  ;;  %v3792_v20 = vadd.s32 %v1189_v11, %v1185_v63  ;;  %v1196_v44 = vadd.s32 %v1195_v27, %v1186_v51 }
 0x220   :  { %v3794_v50 = vor.u32 %v970_v2, %v969_v49  ;;  %v1353_v21 = vadd.s32 %v3707_v0, %v3716_v5  ;;  %v1383_v6 = vsub.s32 4, %v3759_v30  ;;  %v966_v23 = vshll.u32 %v5029_v8, %v3588_v37 }
 0x221   :  { %v2855_v16 = vadd.s32 4294967294, %v1365_v59  ;;  %v974_v25 = vor.u32 %v973_v35, %v972_v34  ;;  %v1143_v61 = vsel %vm1137_vm12, %v1140_v58, %v1142_v45  ;;  %vm1199_vm5 = vc.u32 %v3779_v7, %v3792_v20 }
 0x222   :  { %v1200_v63 = vadd.s32 1, %v1196_v44  ;;  %v957_v43 = vor.u32 8388608, %v956_v31  ;;  %v3805_v40 = vor.u32 %v967_v26, %v966_v23  ;;  %vm981_vm9 = vcmp.lt.s32.totalorder %v3625_v54, 1 }
 0x223   :  { %vm2856_vm4 = vcmp.lt.s32.totalorder %v2855_v16, 0  ;;  %vm983_vm7 = vcmp.lt.s32.totalorder %v3625_v54, 3  ;;  %v993_v37 = vsel %vm981_vm9, %v3794_v50, %v974_v25  ;;  %v1384_v29 = vsel %vm1261_vm3, %v1383_v6, %v3759_v30 }
 0x224   :  { %v1368_v11 = vsel %vm2856_vm4, 0, %v2855_v16  ;;  %v1197_v3 = vmul.u32 %v3705_v53, %v1143_v61  ;;  %v1201_v4 = vsel %vm1199_vm5, %v1200_v63, %v1196_v44  ;;  %v995_v31 = vsel %vm983_vm7, %v3728_v57, %v3756_v24 }
 0x225   :  { %v1369_v0 = vsub.s32 32, %v1368_v11  ;;  %v1373_v5 = vsub.s32 4294967266, %v1368_v11  ;;  %v1370_v39 = vshll.u32 %v1361_v9, %v1368_v11  ;;  %vm982_vm8 = vcmp.lt.s32.totalorder %v3625_v54, 2 }
 0x226   :  { %v1202_v51 = vadd.s32 %v1201_v4, %v1197_v3  ;;  %v989_v2 = vsel %vm981_vm9, %v3805_v40, %v3794_v50  ;;  %v991_v53 = vsel %vm983_vm7, %v974_v25, %v3752_v38  ;;  %v996_v30 = vsel %vm982_vm8, %v993_v37, %v995_v31 }
 0x227   :  { %v1371_v22 = vshrl.u32 %v1353_v21, %v1369_v0  ;;  %v1374_v58 = vadd.s32 127, %v1373_v5  ;;  %v3830_v24 = vshll.u32 %v957_v43, 8  ;;  %v1000_v9 = vand.u32 65535, %v996_v30 }
 0x228   :  { %v5032_v27 = vand.u32 2147483647, %v3577_v46  ;;  %v1203_v45 = vadd.s32 536870912, %v1202_v51  ;;  %v1001_v26 = vshrl.u32 %v996_v30, 16  ;;  %v2952_v35 = vmov 2  }
 0x229   :  { %v1372_v59 = vor.u32 %v1371_v22, %v1370_v39  ;;  %v1375_v57 = vshll.u32 %v1374_v58, 23  ;;  %2903 = vset.pattern.permute.xlu1 %v2952_v35  ;;  %v992_v38 = vsel %vm982_vm8, %v989_v2, %v991_v53  ;;  %v998_v16 = vand.u32 65535, %v3830_v24  ;;  %2905 = vset.pattern.permute.xlu2 %v2952_v35 }
 0x22a   :  { %vm3834_vm10 = vcmp.le.f32.partialorder %v5032_v27, 0.7853982  ;;  %v999_v44 = vshrl.u32 %v3830_v24, 16  ;;  %v3846_v21 = vor.u32 %v3744_v14, %v3606_v1  ;;  %vm829_vm12 = vcmp.lt.s32.totalorder %v3602_v28, 4  ;;  %1501 = vperm.xlu1 %2903, %v3567_v42   ;;  %1497 = vperm.xlu2 %2905, %v3529_v15  }
 0x22b   :  { %v1376_v34 = vor.u32 4788187, %v1375_v57  ;;  %v1386_v6 = vsel %vm3834_vm10, 0, %v1384_v29  ;;  %v3852_v23 = vshrl.u32 %v1203_v45, 30  ;;  %v1379_v63 = vcvt.s32.f32 %v1372_v59  ;;  %2907 = vset.pattern.permute.xlu0 %v2952_v35 }
 0x22c   :  { %v1003_v11 = vmul.u32 %v1001_v26, %v998_v16  ;;  %v3855_v43 = vmul.u32 %v1000_v9, %v999_v44  ;;  %v5035_v1 = vor.u32 %v3623_v55, %v3619_v19  ;;  %v965_v0 = vshrl.u32 %v5029_v8, %v3609_v17 }
 0x22d   :  { %v1377_v61 = vand.u32 2147483647, %v1376_v34  ;;  %v1205_v42 = vshll.u32 %v3852_v23, 30  ;;  %v1023_v15 = vshrl.u32 %v992_v38, 16  ;;  %v1403_v37 = vadd.s32 3, %v1386_v6 }
 0x22e   :  { %v3863_v14 = vsel %vm829_vm12, %v5035_v1, 1326507024  ;;  %v1002_v29 = vmul.u32 %v1000_v9, %v998_v16  ;;  %v1006_v3 = vshll.u32 %v1003_v11, 16  ;;  %v986_v31 = vsel %vm984_vm6, %v974_v25, 2102212464 }
 0x22f   :  { %v1380_v5 = vmul.f32 %v1379_v63, %v1377_v61  ;;  %v3868_v4 = vsub.s32 %v1202_v51, %v1205_v42  ;;  %v1005_v19 = vmul.u32 %v1001_v26, %v999_v44  ;;  %v1022_v55 = vand.u32 65535, %v992_v38 }
 0x230   :  { %v1008_v22 = vshll.u32 %v3855_v43, 16  ;;  %vm1010_vm13 = vc.u32 %v1002_v29, %v1006_v3  ;;  %v1012_v58 = vadd.s32 %v1006_v3, %v1002_v29  ;;  %v3876_v53 = vmul.u32 %v1023_v15, %v998_v16 }
 0x231   :  { %v1381_v39 = vxor.u32 2147483648, %v1380_v5  ;;  %vm1207_vm14 = vcmp.lt.s32.totalorder %v3868_v4, 0  ;;  %v1208_v17 = vsub.s32 0, %v3868_v4  ;;  %v1011_v2 = vsel %vm1010_vm13, 1, %v5028_v60 }
 0x232   :  { %v1198_v25 = vadd.s32 %v3792_v20, %v3779_v7  ;;  %v1013_v30 = vadd.s32 %v1011_v2, %v1005_v19  ;;  %vm1014_vm6 = vc.u32 %v1012_v58, %v1008_v22  ;;  %v985_v9 = vsel %vm981_vm9, %v965_v0, %v3805_v40  ;;  %1493 = vperm.xlu2 %2905, %v3539_v33  }
 0x233   :  { %v1382_v51 = vsel %vm1261_vm3, %v1381_v39, %v1380_v5  ;;  %v1209_v57 = vsel %vm1207_vm14, %v1208_v17, %v3868_v4  ;;  %v1015_v27 = vsel %vm1014_vm6, 1, %v5028_v60  ;;  %v5036_v45 = vmov 1  }
 0x234   :  { %v3885_v59 = vsel %vm3834_vm10, %v3577_v46, %v1382_v51  ;;  %2904 = vset.pattern.permute.xlu1 %v5036_v45  ;;  %v1210_v20 = vclz %v1209_v57  ;;  %v987_v49 = vsel %vm983_vm7, %v3794_v50, %v986_v31  ;;  %v1017_v26 = vadd.s32 %v1015_v27, %v1013_v30 }
 0x235   :  { %v1387_v7 = vmul.f32 %v3885_v59, %v3885_v59  ;;  %1468 = vperm.xlu1 %2904, %v3539_v33   ;;  %v3900_v34 = vand.u32 3, %v1403_v37  ;;  %v1024_v40 = vmul.u32 %v1022_v55, %v998_v16  ;;  %v1026_v38 = vmul.u32 %v1022_v55, %v999_v44 }
 0x236   :  { %v1028_v6 = vshll.u32 %v3876_v53, 16  ;;  %v2852_v1 = vadd.s32 4294967294, %v1210_v20  ;;  %v1007_v42 = vshrl.u32 %v1003_v11, 16  ;;  %v1228_v0 = vsub.s32 4, %v3852_v23 }
 0x237   :  { %v1388_v61 = vmul.f32 -0.001358992, %v1387_v7  ;;  %v1395_v63 = vmul.f32 -0.00019511016, %v1387_v7  ;;  %v3906_v5 = vsel %vm982_vm8, %v985_v9, %v987_v49  ;;  %v1027_v50 = vmul.u32 %v1023_v15, %v999_v44 }
 0x238   :  { %vm1032_vm15 = vc.u32 %v1024_v40, %v1028_v6  ;;  %vm1106_vm0 = vcmp.lt.s32.totalorder %v3572_v10, 0  ;;  %vm2853_vm1 = vcmp.lt.s32.totalorder %v2852_v1, 0  ;;  %v1018_v16 = vadd.s32 %v1017_v26, %v1007_v42 }
 0x239   :  { %v1389_v29 = vadd.f32 0.041655596, %v1388_v61  ;;  %v1396_v33 = vadd.f32 0.008332121, %v1395_v63  ;;  %v1213_v37 = vsel %vm2853_vm1, 0, %v2852_v1  ;;  %v1030_v3 = vshll.u32 %v1026_v38, 16 }
 0x23a   :  { %v1033_v31 = vsel %vm1032_vm15, 1, %v5028_v60  ;;  %v1034_v19 = vadd.s32 %v1028_v6, %v1024_v40  ;;  %v1214_v39 = vsub.s32 32, %v1213_v37  ;;  %v1009_v54 = vshrl.u32 %v3855_v43, 16 }
 0x23b   :  { %v1390_v11 = vmul.f32 %v1389_v29, %v1387_v7  ;;  %v1397_v55 = vmul.f32 %v1396_v33, %v1387_v7  ;;  %v1215_v22 = vshll.u32 %v3868_v4, %v1213_v37  ;;  %v1218_v44 = vsub.s32 4294967266, %v1213_v37 }
 0x23c   :  { %v1035_v15 = vadd.s32 %v1033_v31, %v1027_v50  ;;  %vm1036_vm2 = vc.u32 %v1034_v19, %v1030_v3  ;;  %v1216_v2 = vshrl.u32 %v1198_v25, %v1214_v39  ;;  %vm1406_vm3 = vcmp.eq.s32.totalorder %v3900_v34, 0 }
 0x23d   :  { %v1391_v58 = vadd.f32 -0.4999988, %v1390_v11  ;;  %v1398_v17 = vadd.f32 -0.16666654, %v1397_v55  ;;  %v1037_v51 = vsel %vm1036_vm2, 1, %v5028_v60  ;;  %1464 = vperm.xlu1 %2904, %v3599_v32   ;;  %v1219_v30 = vadd.s32 127, %v1218_v44 }
 0x23e   :  { %v3915_v57 = vadd.s32 %v1018_v16, %v1009_v54  ;;  %v1029_v9 = vshrl.u32 %v3876_v53, 16  ;;  %v1039_v43 = vadd.s32 %v1037_v51, %v1035_v15  ;;  %vm1405_vm4 = vcmp.lt.s32.totalorder %v3900_v34, 2 }
 0x23f   :  { %v1392_v27 = vmul.f32 %v1391_v58, %v1387_v7  ;;  %v1399_v4 = vmul.f32 %v1398_v17, %v1387_v7  ;;  %v5037_v45 = vand.u32 2147483647, %v3572_v10  ;;  %v1217_v20 = vor.u32 %v1216_v2, %v1215_v22 }
 0x240   :  { %v794_v49 = vand.u32 2147483647, %v3549_v41  ;;  %vm1402_vm9 = vweird.f32 %v3577_v46  ;;  %v1220_v26 = vshll.u32 %v1219_v30, 23  ;;  %v1031_v40 = vshrl.u32 %v1026_v38, 16 }
 0x241   :  { %vm3921_vm5 = vcmp.le.f32.partialorder %v5037_v45, 0.7853982  ;;  %v3927_v6 = vadd.s32 %v1034_v19, %v1030_v3  ;;  %v1040_v53 = vadd.s32 %v1039_v43, %v1029_v9  ;;  %v1393_v61 = vadd.f32 1.0, %v1392_v27 }
 0x242   :  { %v1400_v7 = vadd.f32 1.0, %v1399_v4  ;;  %vm1409_vm7 = vcmp.eq.s32.totalorder %v3900_v34, 2  ;;  %v1042_v63 = vmul.u32 %v3830_v24, %v3906_v5  ;;  %v1221_v1 = vor.u32 4788187, %v1220_v26 }
 0x243   :  { %v1229_v42 = vsel %vm1106_vm0, %v1228_v0, %v3852_v23  ;;  %v1041_v50 = vadd.s32 %v1040_v53, %v1031_v40  ;;  %vm1044_vm8 = vc.u32 %v3915_v57, %v3927_v6  ;;  %v1410_v29 = vxor.u32 2147483648, %v1393_v61 }
 0x244   :  { %v1401_v38 = vmul.f32 %v1400_v7, %v3885_v59  ;;  %v1224_v33 = vcvt.s32.f32 %v1217_v20  ;;  %v801_v16 = vand.u32 8388607, %v794_v49  ;;  %v1222_v37 = vand.u32 2147483647, %v1221_v1 }
 0x245   :  { %v1045_v3 = vadd.s32 1, %v1041_v50  ;;  %v814_v24 = vshll.u32 %v5007_v36, %v3582_v48  ;;  %v815_v5 = vshrl.u32 %v5030_v47, %v3594_v56  ;;  %v812_v0 = vshrl.u32 %v5007_v36, %v3594_v56  ;;  %2906 = vset.pattern.permute.xlu1 %v2952_v35 }
 0x246   :  { %v1407_v23 = vxor.u32 2147483648, %v1401_v38  ;;  %v817_v59 = vshll.u32 %v5030_v47, %v3582_v48  ;;  %v818_v31 = vshrl.u32 %v5008_v62, %v3594_v56  ;;  %v1225_v19 = vmul.f32 %v1224_v33, %v1222_v37  ;;  %1489 = vperm.xlu1 %2906, %v3599_v32  }
 0x247   :  { %v1046_v11 = vsel %vm1044_vm8, %v1045_v3, %v1041_v50  ;;  %v811_v55 = vshll.u32 %v5029_v8, %v3582_v48  ;;  %v3953_v39 = vor.u32 %v815_v5, %v814_v24  ;;  %v1411_v22 = vsel %vm1409_vm7, %v1410_v29, %v1401_v38 }
 0x248   :  { %v1408_v54 = vsel %vm1406_vm3, %v1393_v61, %v1407_v23  ;;  %v1047_v44 = vadd.s32 %v1046_v11, %v1042_v63  ;;  %v3960_v15 = vor.u32 %v818_v31, %v817_v59  ;;  %v1226_v58 = vxor.u32 2147483648, %v1225_v19 }
 0x249   :  { %v1412_v35 = vsel %vm1405_vm4, %v1408_v54, %v1411_v22  ;;  %v1231_v48 = vsel %vm3921_vm5, 0, %v1229_v42  ;;  %v802_v17 = vor.u32 8388608, %v801_v16  ;;  %v3968_v51 = vor.u32 %v812_v0, %v811_v55 }
 0x24a   :  { %v1413_v32 = vsel %vm1402_vm9, nan, %v1412_v35  ;;  %v1048_v2 = vadd.s32 536870912, %v1047_v44  ;;  %vm826_vm10 = vcmp.lt.s32.totalorder %v3602_v28, 1  ;;  %v835_v30 = vsel %vm829_vm12, %v3846_v21, 920167782 }
 0x24b   :  { %1434 = vmatpush.msra.mxu2 %v1413_v32  ;;  %v1227_v34 = vsel %vm1106_vm0, %v1226_v58, %v1225_v19  ;;  %v838_v9 = vsel %vm826_vm10, %v3953_v39, %v3960_v15  ;;  %v1248_v43 = vadd.s32 3, %v1231_v48  ;;  %vm828_vm13 = vcmp.lt.s32.totalorder %v3602_v28, 3 }
 0x24c   :  { %v1230_v46 = vsel %vm3921_vm5, %v3572_v10, %v1227_v34  ;;  %v3983_v27 = vshrl.u32 %v1048_v2, 30  ;;  %vm827_vm14 = vcmp.lt.s32.totalorder %v3602_v28, 2  ;;  %v840_v45 = vsel %vm828_vm13, %v3846_v21, %v3863_v14 }
 0x24d   :  { %v1232_v4 = vmul.f32 %v1230_v46, %v1230_v46  ;;  %v3991_v20 = vshll.u32 %v802_v17, 8  ;;  %v834_v25 = vsel %vm826_vm10, %v3968_v51, %v3953_v39  ;;  %v836_v40 = vsel %vm828_vm13, %v3960_v15, %v835_v30 }
 0x24e   :  { %v1050_v26 = vshll.u32 %v3983_v27, 30  ;;  %v841_v53 = vsel %vm827_vm14, %v838_v9, %v840_v45  ;;  %v837_v50 = vsel %vm827_vm14, %v834_v25, %v836_v40  ;;  %v1249_v29 = vand.u32 3, %v1248_v43 }
 0x24f   :  { %v1233_v61 = vmul.f32 -0.001358992, %v1232_v4  ;;  %v1240_v7 = vmul.f32 -0.00019511016, %v1232_v4  ;;  %v845_v21 = vand.u32 65535, %v841_v53  ;;  %v846_v14 = vshrl.u32 %v841_v53, 16 }
 0x250   :  { %v1051_v63 = vsub.s32 %v1047_v44, %v1050_v26  ;;  %v843_v38 = vand.u32 65535, %v3991_v20  ;;  %v844_v16 = vshrl.u32 %v3991_v20, 16  ;;  %v868_v0 = vshrl.u32 %v837_v50, 16 }
 0x251   :  { %v1234_v1 = vadd.f32 0.041655596, %v1233_v61  ;;  %v1241_v42 = vadd.f32 0.008332121, %v1240_v7  ;;  %vm1251_vm15 = vcmp.eq.s32.totalorder %v1249_v29, 0  ;;  %vm1254_vm0 = vcmp.eq.s32.totalorder %v1249_v29, 2 }
 0x252   :  { %vm1052_vm6 = vcmp.lt.s32.totalorder %v1051_v63, 0  ;;  %v1053_v33 = vsub.s32 0, %v1051_v63  ;;  %v848_v24 = vmul.u32 %v846_v14, %v843_v38  ;;  %v4007_v23 = vmul.u32 %v845_v21, %v844_v16 }
 0x253   :  { %v1235_v37 = vmul.f32 %v1234_v1, %v1232_v4  ;;  %v1242_v3 = vmul.f32 %v1241_v42, %v1232_v4  ;;  %v1043_v55 = vadd.s32 %v3927_v6, %v3915_v57  ;;  %v847_v54 = vmul.u32 %v845_v21, %v843_v38 }
 0x254   :  { %v1054_v5 = vsel %vm1052_vm6, %v1053_v33, %v1051_v63  ;;  %v851_v11 = vshll.u32 %v848_v24, 16  ;;  %v867_v22 = vand.u32 65535, %v837_v50  ;;  %vm1250_vm1 = vcmp.lt.s32.totalorder %v1249_v29, 2 }
 0x255   :  { %v1236_v59 = vadd.f32 -0.4999988, %v1235_v37  ;;  %v1243_v31 = vadd.f32 -0.16666654, %v1242_v3  ;;  %v1055_v19 = vclz %v1054_v5  ;;  %v850_v48 = vmul.u32 %v846_v14, %v844_v16 }
 0x256   :  { %vm1247_vm2 = vweird.f32 %v3572_v10  ;;  %v853_v17 = vshll.u32 %v4007_v23, 16  ;;  %vm855_vm3 = vc.u32 %v847_v54, %v851_v11  ;;  %v857_v32 = vadd.s32 %v851_v11, %v847_v54 }
 0x257   :  { %v1237_v44 = vmul.f32 %v1236_v59, %v1232_v4  ;;  %v1244_v35 = vmul.f32 %v1243_v31, %v1232_v4  ;;  %v2849_v58 = vadd.s32 4294967294, %v1055_v19  ;;  %v870_v2 = vmul.u32 %v868_v0, %v843_v38 }
 0x258   :  { %v856_v9 = vsel %vm855_vm3, 1, %v5028_v60  ;;  %vm859_vm5 = vc.u32 %v857_v32, %v853_v17  ;;  %v869_v43 = vmul.u32 %v867_v22, %v843_v38  ;;  %v871_v25 = vmul.u32 %v867_v22, %v844_v16 }
 0x259   :  { %v1238_v30 = vadd.f32 1.0, %v1237_v44  ;;  %v1245_v34 = vadd.f32 1.0, %v1244_v35  ;;  %vm2850_vm4 = vcmp.lt.s32.totalorder %v2849_v58, 0  ;;  %v858_v6 = vadd.s32 %v856_v9, %v850_v48 }
 0x25a   :  { %v1058_v57 = vsel %vm2850_vm4, 0, %v2849_v58  ;;  %v852_v53 = vshrl.u32 %v848_v24, 16  ;;  %v860_v61 = vsel %vm859_vm5, 1, %v5028_v60  ;;  %v873_v7 = vshll.u32 %v870_v2, 16 }
 0x25b   :  { %v1246_v4 = vmul.f32 %v1245_v34, %v1230_v46  ;;  %v1255_v45 = vxor.u32 2147483648, %v1238_v30  ;;  %v1059_v26 = vsub.s32 32, %v1058_v57  ;;  %v1063_v40 = vsub.s32 4294967266, %v1058_v57 }
 0x25c   :  { %v1060_v14 = vshll.u32 %v1051_v63, %v1058_v57  ;;  %v862_v42 = vadd.s32 %v860_v61, %v858_v6  ;;  %v872_v37 = vmul.u32 %v868_v0, %v844_v16  ;;  %vm877_vm9 = vc.u32 %v869_v43, %v873_v7 }
 0x25d   :  { %v1252_v21 = vxor.u32 2147483648, %v1246_v4  ;;  %v1061_v1 = vshrl.u32 %v1043_v55, %v1059_v26  ;;  %v1256_v50 = vsel %vm1254_vm0, %v1255_v45, %v1246_v4  ;;  %v1064_v33 = vadd.s32 127, %v1063_v40 }
 0x25e   :  { %v875_v3 = vshll.u32 %v871_v25, 16  ;;  %v878_v5 = vsel %vm877_vm9, 1, %v5028_v60  ;;  %v879_v31 = vadd.s32 %v873_v7, %v869_v43  ;;  %v863_v11 = vadd.s32 %v862_v42, %v852_v53 }
 0x25f   :  { %v1253_v38 = vsel %vm1251_vm15, %v1238_v30, %v1252_v21  ;;  %v1062_v46 = vor.u32 %v1061_v1, %v1060_v14  ;;  %v1065_v59 = vshll.u32 %v1064_v33, 23  ;;  %v880_v19 = vadd.s32 %v878_v5, %v872_v37 }
 0x260   :  { %v1257_v24 = vsel %vm1250_vm1, %v1253_v38, %v1256_v50  ;;  %v831_v16 = vsel %vm829_vm12, %v3960_v15, 2102212464  ;;  %vm881_vm7 = vc.u32 %v879_v31, %v875_v3  ;;  %v810_v0 = vshrl.u32 %v5029_v8, %v3594_v56 }
 0x261   :  { %v1258_v63 = vsel %vm1247_vm2, nan, %v1257_v24  ;;  %v1066_v55 = vor.u32 4788187, %v1065_v59  ;;  %v854_v29 = vshrl.u32 %v4007_v23, 16  ;;  %v882_v54 = vsel %vm881_vm7, 1, %v5028_v60 }
 0x262   :  { %1435 = vmatpush.msra.mxu2 %v1258_v63  ;;  %v1069_v44 = vcvt.s32.f32 %v1062_v46  ;;  %v874_v35 = vshrl.u32 %v870_v2, 16  ;;  %v884_v10 = vadd.s32 %v882_v54, %v880_v19  ;;  %v830_v58 = vsel %vm826_vm10, %v810_v0, %v3968_v51 }
 0x263   :  { %v1067_v22 = vand.u32 2147483647, %v1066_v55  ;;  %v832_v15 = vsel %vm828_vm13, %v3953_v39, %v831_v16  ;;  %v864_v48 = vadd.s32 %v863_v11, %v854_v29  ;;  %v876_v32 = vshrl.u32 %v871_v25, 16 }
 0x264   :  { %v885_v56 = vadd.s32 %v884_v10, %v874_v35  ;;  %v883_v30 = vadd.s32 %v879_v31, %v875_v3  ;;  %v833_v34 = vsel %vm827_vm14, %v830_v58, %v832_v15  ;;  %vm951_vm12 = vcmp.lt.s32.totalorder %v3557_v52, 0 }
 0x265   :  { %v1070_v17 = vmul.f32 %v1069_v44, %v1067_v22  ;;  %v5040_v2 = vand.u32 2147483647, %v3557_v52  ;;  %v1073_v6 = vsub.s32 4, %v3983_v27  ;;  %v887_v28 = vmul.u32 %v3991_v20, %v833_v34 }
 0x266   :  { %v886_v9 = vadd.s32 %v885_v56, %v876_v32  ;;  %vm889_vm8 = vc.u32 %v864_v48, %v883_v30  ;;  %vm1092_vm1 = vweird.f32 %v3557_v52  ;;  %v888_v10 = vadd.s32 %v883_v30, %v864_v48 }
 0x267   :  { %v1071_v23 = vxor.u32 2147483648, %v1070_v17  ;;  %vm4039_vm10 = vcmp.le.f32.partialorder %v5040_v2, 0.7853982  ;;  %v1074_v53 = vsel %vm951_vm12, %v1073_v6, %v3983_v27  ;;  %vm796_vm2 = vcmp.lt.s32.totalorder %v3549_v41, 0 }
 0x268   :  { %v890_v57 = vadd.s32 1, %v886_v9  ;;  %v1076_v1 = vsel %vm4039_vm10, 0, %v1074_v53  ;;  %vm795_vm3 = vcmp.le.f32.partialorder %v794_v49, 0.7853982  ;;  %vm937_vm7 = vweird.f32 %v3549_v41 }
 0x269   :  { %v1072_v39 = vsel %vm951_vm12, %v1071_v23, %v1070_v17  ;;  %v1093_v20 = vadd.s32 3, %v1076_v1 }
 0x26a   :  { %v1075_v43 = vsel %vm4039_vm10, %v3557_v52, %v1072_v39  ;;  %v891_v45 = vsel %vm889_vm8, %v890_v57, %v886_v9 }
 0x26b   :  { %v1077_v4 = vmul.f32 %v1075_v43, %v1075_v43  ;;  %v892_v26 = vadd.s32 %v891_v45, %v887_v28  ;;  %v1094_v31 = vand.u32 3, %v1093_v20 }
 0x26d   :  { %v1078_v25 = vmul.f32 -0.001358992, %v1077_v4  ;;  %v1085_v40 = vmul.f32 -0.00019511016, %v1077_v4  ;;  %v893_v61 = vadd.s32 536870912, %v892_v26  ;;  %vm1096_vm14 = vcmp.eq.s32.totalorder %v1094_v31, 0 }
 0x26e   :  { %vm1099_vm6 = vcmp.eq.s32.totalorder %v1094_v31, 2  ;;  %vm1095_vm15 = vcmp.lt.s32.totalorder %v1094_v31, 2 }
 0x26f   :  { %v1079_v7 = vadd.f32 0.041655596, %v1078_v25  ;;  %v1086_v21 = vadd.f32 0.008332121, %v1085_v40  ;;  %v894_v14 = vshrl.u32 %v893_v61, 30 }
 0x271   :  { %v1080_v42 = vmul.f32 %v1079_v7, %v1077_v4  ;;  %v1087_v50 = vmul.f32 %v1086_v21, %v1077_v4  ;;  %v895_v33 = vshll.u32 %v894_v14, 30  ;;  %v918_v48 = vsub.s32 4, %v894_v14 }
 0x273   :  { %v1081_v37 = vadd.f32 -0.4999988, %v1080_v42  ;;  %v1088_v38 = vadd.f32 -0.16666654, %v1087_v50  ;;  %v896_v46 = vsub.s32 %v892_v26, %v895_v33 }
 0x275   :  { %v1082_v3 = vmul.f32 %v1081_v37, %v1077_v4  ;;  %v1089_v5 = vmul.f32 %v1088_v38, %v1077_v4  ;;  %vm897_vm13 = vcmp.lt.s32.totalorder %v896_v46, 0  ;;  %v898_v24 = vsub.s32 0, %v896_v46 }
 0x276   :  { %v919_v4 = vsel %vm796_vm2, %v918_v48, %v894_v14 }
 0x277   :  { %v1083_v59 = vadd.f32 1.0, %v1082_v3  ;;  %v1090_v27 = vadd.f32 1.0, %v1089_v5  ;;  %v899_v19 = vsel %vm897_vm13, %v898_v24, %v896_v46  ;;  %v921_v25 = vsel %vm795_vm3, 0, %v919_v4  ;;  %v44_v5 = vld [vmem:[%s4973_s5] sm:$0x3] }
 0x278   :  { %v900_v55 = vclz %v899_v19  ;;  %v938_v21 = vadd.s32 3, %v921_v25 }
 0x279   :  { %v1091_v63 = vmul.f32 %v1090_v27, %v1075_v43  ;;  %v1100_v11 = vxor.u32 2147483648, %v1083_v59  ;;  %v4061_v27 = vpop.permute.xlu2 %1416 }
 0x27a   :  { %v2846_v0 = vadd.s32 4294967294, %v900_v55  ;;  %v939_v33 = vand.u32 3, %v938_v21 }
 0x27b   :  { %v1097_v16 = vxor.u32 2147483648, %v1091_v63  ;;  %v1101_v54 = vsel %vm1099_vm6, %v1100_v11, %v1091_v63  ;;  %v1473_v11 = vpop.permute.xlu0 %1472 }
 0x27c   :  { %vm2847_vm0 = vcmp.lt.s32.totalorder %v2846_v0, 0  ;;  %vm941_vm4 = vcmp.eq.s32.totalorder %v939_v33, 0  ;;  %vm944_vm5 = vcmp.eq.s32.totalorder %v939_v33, 2  ;;  %vm940_vm9 = vcmp.lt.s32.totalorder %v939_v33, 2 }
 0x27d   :  { %v1098_v29 = vsel %vm1096_vm14, %v1083_v59, %v1097_v16  ;;  %v903_v44 = vsel %vm2847_vm0, 0, %v2846_v0  ;;  %v1477_v59 = vpop.permute.xlu1 %1476 }
 0x27e   :  { %v1102_v22 = vsel %vm1095_vm15, %v1098_v29, %v1101_v54  ;;  %v904_v58 = vsub.s32 32, %v903_v44  ;;  %v908_v15 = vsub.s32 4294967266, %v903_v44  ;;  %v905_v17 = vshll.u32 %v896_v46, %v903_v44  ;;  %v2912_v44 = vld [vmem:[%s4968_s0] sm:$0xf] }
 0x27f   :  { %v1103_v35 = vsel %vm1092_vm1, nan, %v1102_v22 }
 0x280   :  { %1436 = vmatpush.msra.mxu2 %v1103_v35  ;;  %v906_v32 = vshrl.u32 %v888_v10, %v904_v58  ;;  %v909_v56 = vadd.s32 127, %v908_v15  ;;  %v1504_v35 = vperm.slane %v2912_v44, 3 }
 0x281   :  { %v1452_v19 = vpop.permute.xlu2 %1451 }
 0x282   :  { %v907_v23 = vor.u32 %v906_v32, %v905_v17  ;;  %v910_v34 = vshll.u32 %v909_v56, 23 }
 0x283   :  { %v1456_v0 = vpop.permute.xlu0 %1455 }
 0x284   :  { %v911_v9 = vor.u32 4788187, %v910_v34  ;;  %v914_v51 = vcvt.s32.f32 %v907_v23 }
 0x286   :  { %v912_v2 = vand.u32 2147483647, %v911_v9 }
 0x288   :  { %v915_v39 = vmul.f32 %v914_v51, %v912_v2 }
 0x289   :  { %v1448_v55 = vpop.permute.xlu2 %1447 }
 0x28a   :  { %v916_v57 = vxor.u32 2147483648, %v915_v39 }
 0x28b   :  { %v1444_v56 = vpop.permute.xlu0 %1443 }
 0x28c   :  { %v917_v52 = vsel %vm796_vm2, %v916_v57, %v915_v39 }
 0x28d   :  { %v920_v30 = vsel %vm795_vm3, %v3549_v41, %v917_v52 }
 0x28e   :  { %v922_v6 = vmul.f32 %v920_v30, %v920_v30 }
 0x290   :  { %v923_v43 = vmul.f32 -0.001358992, %v922_v6  ;;  %v930_v28 = vmul.f32 -0.00019511016, %v922_v6 }
 0x291   :  { %v1498_v41 = vpop.permute.xlu2 %1497 }
 0x292   :  { %v924_v45 = vadd.f32 0.041655596, %v923_v43  ;;  %v931_v26 = vadd.f32 0.008332121, %v930_v28  ;;  %v1507_v33 = vmul.f32 %v1504_v35, %v1498_v41  ;;  %v5044_v41 = vmov 1326507024  }
 0x294   :  { %v925_v40 = vmul.f32 %v924_v45, %v922_v6  ;;  %v932_v53 = vmul.f32 %v931_v26, %v922_v6 }
 0x296   :  { %v926_v61 = vadd.f32 -0.4999988, %v925_v40  ;;  %v933_v7 = vadd.f32 -0.16666654, %v932_v53 }
 0x298   :  { %v927_v1 = vmul.f32 %v926_v61, %v922_v6  ;;  %v934_v42 = vmul.f32 %v933_v7, %v922_v6 }
 0x299   :  { %v1494_v32 = vpop.permute.xlu2 %1493 }
 0x29a   :  { %v928_v50 = vadd.f32 1.0, %v927_v1  ;;  %v935_v49 = vadd.f32 1.0, %v934_v42  ;;  %v1506_v48 = vmul.f32 %v1504_v35, %v1494_v32 }
 0x29c   :  { %v936_v37 = vmul.f32 %v935_v49, %v920_v30  ;;  %v945_v38 = vxor.u32 2147483648, %v928_v50  ;;  %v1502_v31 = vpop.permute.xlu1 %1501 }
 0x29d   :  { %v1508_v39 = vmul.f32 %v1504_v35, %v1502_v31 }
 0x29e   :  { %v942_v20 = vxor.u32 2147483648, %v936_v37  ;;  %v946_v46 = vsel %vm944_vm5, %v945_v38, %v936_v37 }
 0x2a0   :  { %v943_v14 = vsel %vm941_vm4, %v928_v50, %v942_v20 }
 0x2a1   :  { %v947_v3 = vsel %vm940_vm9, %v943_v14, %v946_v46 }
 0x2a2   :  { %v948_v24 = vsel %vm937_vm7, nan, %v947_v3 }
 0x2a3   :  { %1437 = vmatpush.msra.mxu2 %v948_v24 }
 0x2a4   :  { %2857 = vmatmul.msk.f32.vlgmr.msra.gmra.mxu2 %vm752_vm11, %v44_v5 }
 0x2a7   :  { %v1469_v63 = vpop.permute.xlu1 %1468 }
 0x2af   :  { %v1465_v16 = vpop.permute.xlu1 %1464 }
 0x2b8   :  { %v1490_v22 = vpop.permute.xlu1 %1489 }
 0x2b9   :  { %v1505_v23 = vmul.f32 %v1504_v35, %v1490_v22 }
 0x327   :  { %v1439_v29 = vpop.f32.mrf.mxu2 }
 0x328   :  { %v1440_v54 = vadd.f32 %v1439_v29, %v4061_v27 }
 0x32a   :  { %v1458_v10 = vperm.slane %v1440_v54, 0  ;;  %v1479_v58 = vperm.slane %v1440_v54, 1  ;;  %2806 = vst [vmem:[#allocation2] sm:$0x3] %v1440_v54 }
 0x32c   :  { %v1462_v15 = vmul.f32 %v1458_v10, %v1456_v0  ;;  %v1483_v17 = vmul.f32 %v1479_v58, %v1477_v59  ;;  %v1460_v34 = vmul.f32 %v1458_v10, %v1448_v55  ;;  %v1481_v9 = vmul.f32 %v1479_v58, %v1469_v63 }
 0x32d   :  { %v1459_v2 = vmul.f32 %v1458_v10, %v1444_v56  ;;  %v1480_v51 = vmul.f32 %v1479_v58, %v1465_v16  ;;  %v1482_v37 = vmul.f32 %v1479_v58, %v1473_v11  ;;  %v5043_v55 = vmov 920167782  }
 0x32e   :  { %v1487_v57 = vadd.f32 %v1483_v17, %v1462_v15  ;;  %v1485_v52 = vadd.f32 %v1481_v9, %v1460_v34 }
 0x32f   :  { %v1484_v30 = vadd.f32 %v1480_v51, %v1459_v2 }
 0x330   :  { %v1512_v6 = vadd.f32 %v1508_v39, %v1487_v57  ;;  %v1510_v43 = vadd.f32 %v1506_v48, %v1485_v52 }
 0x331   :  { %v1509_v28 = vadd.f32 %v1505_v23, %v1484_v30 }
 0x332   :  { %v4068_v4 = vadd.f32 %v1512_v6, %v3042_v18  ;;  %v4071_v45 = vadd.f32 %v1510_v43, %v3034_v12 }
 0x333   :  { %v4075_v25 = vadd.f32 %v1509_v28, %v3036_v13  ;;  %v1461_v13 = vmul.f32 %v1458_v10, %v1452_v19 }
 0x334   :  { %v1985_v26 = vand.u32 2139095040, %v4068_v4  ;;  %v1675_v53 = vand.u32 2139095040, %v4071_v45  ;;  %v1982_v61 = vand.u32 2147483647, %v4068_v4  ;;  %vm1984_vm9 = vcmp.lt.s32.totalorder %v4068_v4, 0 }
 0x335   :  { %v1520_v21 = vand.u32 2139095040, %v4075_v25  ;;  %v1486_v17 = vadd.f32 %v1482_v37, %v1461_v13 }
 0x336   :  { %v1986_v40 = vshrl.u32 %v1985_v26, 23  ;;  %v1676_v42 = vshrl.u32 %v1675_v53, 23  ;;  %v1989_v18 = vand.u32 8388607, %v1982_v61  ;;  %vm4209_vm7 = vcmp.le.f32.partialorder %v1982_v61, 0.7853982 }
 0x337   :  { %v1521_v12 = vshrl.u32 %v1520_v21, 23  ;;  %v1511_v53 = vadd.f32 %v1507_v33, %v1486_v17 }
 0x338   :  { %v2867_v7 = vadd.s32 4294967169, %v1986_v40  ;;  %v2861_v38 = vadd.s32 4294967169, %v1676_v42  ;;  %v1990_v20 = vor.u32 8388608, %v1989_v18 }
 0x339   :  { %v2858_v46 = vadd.s32 4294967169, %v1521_v12 }
 0x33a   :  { %v1992_v1 = vadd.s32 1, %v2867_v7  ;;  %v4105_v35 = vshll.u32 %v1990_v20, 8  ;;  %v1682_v10 = vadd.s32 1, %v2861_v38 }
 0x33b   :  { %v1527_v23 = vadd.s32 1, %v2858_v46 }
 0x33c   :  { %vm1993_vm12 = vcmp.gt.s32.totalorder %v1992_v1, 0  ;;  %v2031_v39 = vand.u32 65535, %v4105_v35  ;;  %vm1683_vm6 = vcmp.gt.s32.totalorder %v1682_v10, 0  ;;  %v2032_v48 = vshrl.u32 %v4105_v35, 16 }
 0x33d   :  { %v1994_v50 = vsel %vm1993_vm12, %v1992_v1, 0  ;;  %vm1528_vm15 = vcmp.gt.s32.totalorder %v1527_v23, 0  ;;  %v1684_v7 = vsel %vm1683_vm6, %v1682_v10, 0 }
 0x33e   :  { %v1996_v49 = vand.u32 31, %v1994_v50  ;;  %v4084_v3 = vshrl.u32 %v1994_v50, 5  ;;  %v1529_v42 = vsel %vm1528_vm15, %v1527_v23, 0 }
 0x340   :  { %v4082_v14 = vsub.s32 32, %v1996_v49  ;;  %v1999_v5 = vshll.u32 %v5029_v8, %v1996_v49  ;;  %v2002_v24 = vshll.u32 %v5007_v36, %v1996_v49  ;;  %v2005_v19 = vshll.u32 %v5030_v47, %v1996_v49 }
 0x341   :  { %v2008_v11 = vshll.u32 %v5008_v62, %v1996_v49  ;;  %v2011_v0 = vshll.u32 %v5043_v55, %v1996_v49  ;;  %vm2014_vm8 = vcmp.lt.s32.totalorder %v4084_v3, 1  ;;  %vm2017_vm10 = vcmp.lt.s32.totalorder %v4084_v3, 4 }
 0x342   :  { %v2000_v59 = vshrl.u32 %v5007_v36, %v4082_v14  ;;  %v2003_v31 = vshrl.u32 %v5030_v47, %v4082_v14  ;;  %v2006_v63 = vshrl.u32 %v5008_v62, %v4082_v14  ;;  %v2009_v16 = vshrl.u32 %v5043_v55, %v4082_v14 }
 0x343   :  { %v2012_v29 = vshrl.u32 %v5044_v41, %v4082_v14  ;;  %vm2016_vm13 = vcmp.lt.s32.totalorder %v4084_v3, 3  ;;  %vm2015_vm14 = vcmp.lt.s32.totalorder %v4084_v3, 2 }
 0x344   :  { %v4101_v54 = vor.u32 %v2000_v59, %v1999_v5  ;;  %v4103_v22 = vor.u32 %v2003_v31, %v2002_v24  ;;  %v2007_v44 = vor.u32 %v2006_v63, %v2005_v19  ;;  %v2010_v58 = vor.u32 %v2009_v16, %v2008_v11  ;;  %v5045_v5 = vld [vmem:[#allocation5_spill] sm:$0xff] }
 0x345   :  { %v2013_v15 = vor.u32 %v2012_v29, %v2011_v0  ;;  %v4135_v24 = vadd.f32 %v1511_v53, %v5045_v5  ;;  %v1672_v29 = vand.u32 2147483647, %v4071_v45  ;;  %v4160_v53 = vand.u32 31, %v1529_v42 }
 0x346   :  { %v2022_v32 = vsel %vm2014_vm8, %v4101_v54, %v4103_v22  ;;  %v2026_v56 = vsel %vm2014_vm8, %v4103_v22, %v2007_v44  ;;  %v2023_v34 = vsel %vm2017_vm10, %v2010_v58, 920167782  ;;  %v2019_v18 = vsel %vm2017_vm10, %v2007_v44, 2102212464 }
 0x347   :  { %v2027_v9 = vsel %vm2017_vm10, %v2013_v15, 1326507024  ;;  %v2024_v2 = vsel %vm2016_vm13, %v2007_v44, %v2023_v34  ;;  %v1827_v11 = vand.u32 2147483647, %v4135_v24  ;;  %v1998_v44 = vshrl.u32 %v5029_v8, %v4082_v14 }
 0x348   :  { %v2028_v51 = vsel %vm2016_vm13, %v2010_v58, %v2027_v9  ;;  %v2025_v57 = vsel %vm2015_vm14, %v2022_v32, %v2024_v2  ;;  %v2020_v9 = vsel %vm2016_vm13, %v4103_v22, %v2019_v18 }
 0x349   :  { %v2029_v52 = vsel %vm2015_vm14, %v2026_v56, %v2028_v51  ;;  %v2055_v43 = vand.u32 65535, %v2025_v57  ;;  %v2056_v28 = vshrl.u32 %v2025_v57, 16  ;;  %v1830_v56 = vand.u32 2139095040, %v4135_v24 }
 0x34a   :  { %v2033_v30 = vand.u32 65535, %v2029_v52  ;;  %v2034_v6 = vshrl.u32 %v2029_v52, 16  ;;  %v1834_v23 = vand.u32 8388607, %v1827_v11  ;;  %v2018_v34 = vsel %vm2014_vm8, %v1998_v44, %v4101_v54 }
 0x34b   :  { %v2058_v21 = vmul.u32 %v2056_v28, %v2031_v39  ;;  %v2059_v1 = vmul.u32 %v2055_v43, %v2032_v48  ;;  %v2057_v13 = vmul.u32 %v2055_v43, %v2031_v39  ;;  %v2060_v37 = vmul.u32 %v2056_v28, %v2032_v48 }
 0x34c   :  { %v2036_v26 = vmul.u32 %v2034_v6, %v2031_v39  ;;  %v2037_v40 = vmul.u32 %v2033_v30, %v2032_v48  ;;  %v2035_v12 = vmul.u32 %v2033_v30, %v2031_v39  ;;  %v2038_v49 = vmul.u32 %v2034_v6, %v2032_v48 }
 0x34d   :  { %v2061_v38 = vshll.u32 %v2058_v21, 16  ;;  %v2063_v59 = vshll.u32 %v2059_v1, 16  ;;  %v2062_v17 = vshrl.u32 %v2058_v21, 16  ;;  %v2064_v51 = vshrl.u32 %v2059_v1, 16 }
 0x34e   :  { %v2039_v50 = vshll.u32 %v2036_v26, 16  ;;  %v2041_v20 = vshll.u32 %v2037_v40, 16  ;;  %v2040_v10 = vshrl.u32 %v2036_v26, 16  ;;  %v2042_v14 = vshrl.u32 %v2037_v40, 16 }
 0x34f   :  { %vm2065_vm1 = vc.u32 %v2057_v13, %v2061_v38  ;;  %v2067_v31 = vadd.s32 %v2061_v38, %v2057_v13  ;;  %v1831_v57 = vshrl.u32 %v1830_v56, 23  ;;  %v1679_v52 = vand.u32 8388607, %v1672_v29 }
 0x350   :  { %vm2043_vm0 = vc.u32 %v2035_v12, %v2039_v50  ;;  %v2045_v46 = vadd.s32 %v2039_v50, %v2035_v12  ;;  %v2066_v63 = vsel %vm2065_vm1, 1, %v5028_v60  ;;  %v1835_v6 = vor.u32 8388608, %v1834_v23 }
 0x351   :  { %v2044_v33 = vsel %vm2043_vm0, 1, %v5028_v60  ;;  %v2068_v0 = vadd.s32 %v2066_v63, %v2060_v37  ;;  %vm2069_vm3 = vc.u32 %v2067_v31, %v2063_v59  ;;  %v2071_v30 = vadd.s32 %v2067_v31, %v2063_v59 }
 0x352   :  { %v2046_v19 = vadd.s32 %v2044_v33, %v2038_v49  ;;  %vm2047_vm2 = vc.u32 %v2045_v46, %v2041_v20  ;;  %v2070_v15 = vsel %vm2069_vm3, 1, %v5028_v60  ;;  %v2021_v43 = vsel %vm2015_vm14, %v2018_v34, %v2020_v9 }
 0x353   :  { %v2048_v16 = vsel %vm2047_vm2, 1, %v5028_v60  ;;  %v2072_v32 = vadd.s32 %v2070_v15, %v2068_v0  ;;  %v2864_v54 = vadd.s32 4294967169, %v1831_v57  ;;  %v4158_v26 = vand.u32 31, %v1684_v7 }
 0x354   :  { %v2050_v58 = vadd.s32 %v2048_v16, %v2046_v19  ;;  %v1680_v21 = vor.u32 8388608, %v1679_v52  ;;  %v2075_v1 = vmul.u32 %v4105_v35, %v2021_v43  ;;  %v4163_v18 = vshll.u32 %v1835_v6, 8 }
 0x355   :  { %v2073_v39 = vadd.s32 %v2072_v32, %v2062_v17  ;;  %v1837_v40 = vadd.s32 1, %v2864_v54  ;;  %v4165_v12 = vshrl.u32 %v1684_v7, 5  ;;  %v4167_v50 = vshrl.u32 %v1529_v42, 5 }
 0x356   :  { %v2051_v2 = vadd.s32 %v2050_v58, %v2040_v10  ;;  %v4170_v49 = vsub.s32 32, %v4158_v26  ;;  %v4173_v13 = vsub.s32 32, %v4160_v53  ;;  %v4177_v35 = vshll.u32 %v1680_v21, 8 }
 0x357   :  { %v2074_v28 = vadd.s32 %v2073_v39, %v2064_v51  ;;  %vm1838_vm5 = vcmp.gt.s32.totalorder %v1837_v40, 0  ;;  %v1517_v7 = vand.u32 2147483647, %v4075_v25  ;;  %v4181_v42 = vand.u32 65535, %v4163_v18 }
 0x358   :  { %v2052_v48 = vadd.s32 %v2051_v2, %v2042_v14  ;;  %v1839_v38 = vsel %vm1838_vm5, %v1837_v40, 0  ;;  %v4184_v33 = vshrl.u32 %v4163_v18, 16  ;;  %v1689_v59 = vshll.u32 %v5029_v8, %v4158_v26 }
 0x359   :  { %v2078_v22 = vadd.s32 1, %v2074_v28  ;;  %v1841_v46 = vand.u32 31, %v1839_v38  ;;  %v4188_v31 = vshrl.u32 %v1839_v38, 5  ;;  %v1692_v63 = vshll.u32 %v5007_v36, %v4158_v26 }
 0x35a   :  { %vm2077_vm4 = vc.u32 %v2052_v48, %v2071_v30  ;;  %v4175_v20 = vadd.s32 %v2071_v30, %v2052_v48  ;;  %v1695_v16 = vshll.u32 %v5030_v47, %v4158_v26  ;;  %v1698_v57 = vshll.u32 %v5008_v62, %v4158_v26 }
 0x35b   :  { %v2079_v3 = vsel %vm2077_vm4, %v2078_v22, %v2074_v28  ;;  %v1842_v19 = vsub.s32 32, %v1841_v46  ;;  %v1844_v44 = vshll.u32 %v5029_v8, %v1841_v46  ;;  %v1847_v10 = vshll.u32 %v5007_v36, %v1841_v46 }
 0x35c   :  { %v2080_v37 = vadd.s32 %v2079_v3, %v2075_v1  ;;  %v1850_v58 = vshll.u32 %v5030_v47, %v1841_v46  ;;  %v1853_v56 = vshll.u32 %v5008_v62, %v1841_v46  ;;  %v1856_v9 = vshll.u32 %v5043_v55, %v1841_v46 }
 0x35d   :  { %v1845_v15 = vshrl.u32 %v5007_v36, %v1842_v19  ;;  %v1848_v17 = vshrl.u32 %v5030_v47, %v1842_v19  ;;  %v1851_v32 = vshrl.u32 %v5008_v62, %v1842_v19  ;;  %v1854_v34 = vshrl.u32 %v5043_v55, %v1842_v19 }
 0x35e   :  { %v2081_v5 = vadd.s32 536870912, %v2080_v37  ;;  %v1857_v14 = vshrl.u32 %v5044_v41, %v1842_v19  ;;  %v1690_v43 = vshrl.u32 %v5007_v36, %v4170_v49  ;;  %vm1859_vm12 = vcmp.lt.s32.totalorder %v4188_v31, 1 }
 0x35f   :  { %v1846_v2 = vor.u32 %v1845_v15, %v1844_v44  ;;  %v1849_v51 = vor.u32 %v1848_v17, %v1847_v10  ;;  %v1852_v39 = vor.u32 %v1851_v32, %v1850_v58  ;;  %v1855_v30 = vor.u32 %v1854_v34, %v1853_v56 }
 0x360   :  { %v2082_v0 = vshrl.u32 %v2081_v5, 30  ;;  %v1858_v6 = vor.u32 %v1857_v14, %v1856_v9  ;;  %v1693_v54 = vshrl.u32 %v5030_v47, %v4170_v49  ;;  %v1696_v22 = vshrl.u32 %v5008_v62, %v4170_v49 }
 0x361   :  { %vm1862_vm10 = vcmp.lt.s32.totalorder %v4188_v31, 4  ;;  %v1867_v40 = vsel %vm1859_vm12, %v1846_v2, %v1849_v51  ;;  %vm1861_vm13 = vcmp.lt.s32.totalorder %v4188_v31, 3  ;;  %v1871_v1 = vsel %vm1859_vm12, %v1849_v51, %v1852_v39 }
 0x362   :  { %v2083_v23 = vshll.u32 %v2082_v0, 30  ;;  %v2106_v28 = vsub.s32 4, %v2082_v0  ;;  %v1868_v21 = vsel %vm1862_vm10, %v1855_v30, 920167782  ;;  %v1872_v3 = vsel %vm1862_vm10, %v1858_v6, 1326507024 }
 0x363   :  { %vm1860_vm14 = vcmp.lt.s32.totalorder %v4188_v31, 2  ;;  %v1869_v38 = vsel %vm1861_vm13, %v1852_v39, %v1868_v21  ;;  %v1873_v46 = vsel %vm1861_vm13, %v1855_v30, %v1872_v3  ;;  %v4241_v58 = vshrl.u32 %v5029_v8, %v4170_v49 }
 0x364   :  { %v2084_v48 = vsub.s32 %v2080_v37, %v2083_v23  ;;  %v1870_v44 = vsel %vm1860_vm14, %v1867_v40, %v1869_v38  ;;  %v1874_v10 = vsel %vm1860_vm14, %v1871_v1, %v1873_v46  ;;  %v4245_v15 = vsel %vm1984_vm9, %v2106_v28, %v2082_v0 }
 0x365   :  { %v1878_v17 = vand.u32 65535, %v1874_v10  ;;  %v1879_v32 = vshrl.u32 %v1874_v10, 16  ;;  %v4247_v56 = vor.u32 %v1690_v43, %v1689_v59  ;;  %v4249_v34 = vor.u32 %v1693_v54, %v1692_v63 }
 0x366   :  { %vm2085_vm8 = vcmp.lt.s32.totalorder %v2084_v48, 0  ;;  %v2086_v61 = vsub.s32 0, %v2084_v48  ;;  %v4251_v9 = vor.u32 %v1696_v22, %v1695_v16  ;;  %v1699_v14 = vshrl.u32 %v5043_v55, %v4170_v49 }
 0x367   :  { %v1864_v30 = vsel %vm1862_vm10, %v1852_v39, 2102212464  ;;  %v1881_v6 = vmul.u32 %v1879_v32, %v4181_v42  ;;  %v1882_v0 = vmul.u32 %v1878_v17, %v4184_v33  ;;  %v1901_v28 = vshrl.u32 %v1870_v44, 16 }
 0x368   :  { %v2087_v37 = vsel %vm2085_vm8, %v2086_v61, %v2084_v48  ;;  %v2109_v59 = vsel %vm4209_vm7, 0, %v4245_v15  ;;  %v1843_v63 = vshrl.u32 %v5029_v8, %v1842_v19  ;;  %v1701_v16 = vshll.u32 %v5043_v55, %v4158_v26 }
 0x369   :  { %v2088_v5 = vclz %v2087_v37  ;;  %v1880_v54 = vmul.u32 %v1878_v17, %v4181_v42  ;;  %v1884_v22 = vshll.u32 %v1881_v6, 16  ;;  %v1900_v39 = vand.u32 65535, %v1870_v44 }
 0x36a   :  { %v1863_v21 = vsel %vm1859_vm12, %v1843_v63, %v1846_v2  ;;  %v1865_v1 = vsel %vm1861_vm13, %v1849_v51, %v1864_v30  ;;  %v1886_v3 = vshll.u32 %v1882_v0, 16  ;;  %v1903_v19 = vmul.u32 %v1901_v28, %v4181_v42 }
 0x36b   :  { %v2868_v23 = vadd.s32 4294967294, %v2088_v5  ;;  %vm1888_vm15 = vc.u32 %v1880_v54, %v1884_v22  ;;  %v1890_v37 = vadd.s32 %v1884_v22, %v1880_v54  ;;  %v1883_v5 = vmul.u32 %v1879_v32, %v4184_v33 }
 0x36c   :  { %v1889_v44 = vsel %vm1888_vm15, 1, %v5028_v60  ;;  %v1904_v10 = vmul.u32 %v1900_v39, %v4184_v33  ;;  %v1700_v2 = vor.u32 %v1699_v14, %v1698_v57  ;;  %v1902_v63 = vmul.u32 %v1900_v39, %v4181_v42 }
 0x36d   :  { %vm2869_vm6 = vcmp.lt.s32.totalorder %v2868_v23, 0  ;;  %vm1892_vm0 = vc.u32 %v1890_v37, %v1886_v3  ;;  %v1891_v51 = vadd.s32 %v1889_v44, %v1883_v5  ;;  %v1906_v54 = vshll.u32 %v1903_v19, 16 }
 0x36e   :  { %v2091_v43 = vsel %vm2869_vm6, 0, %v2868_v23  ;;  %v1893_v30 = vsel %vm1892_vm0, 1, %v5028_v60  ;;  %vm1704_vm1 = vcmp.lt.s32.totalorder %v4165_v12, 1  ;;  %v1885_v32 = vshrl.u32 %v1881_v6, 16 }
 0x36f   :  { %v2092_v61 = vsub.s32 32, %v2091_v43  ;;  %v2096_v40 = vsub.s32 4294967266, %v2091_v43  ;;  %v2093_v38 = vshll.u32 %v2084_v48, %v2091_v43  ;;  %v1887_v43 = vshrl.u32 %v1882_v0, 16 }
 0x370   :  { %v1895_v22 = vadd.s32 %v1893_v30, %v1891_v51  ;;  %v1908_v57 = vshll.u32 %v1904_v10, 16  ;;  %vm1910_vm2 = vc.u32 %v1902_v63, %v1906_v54  ;;  %v1912_v14 = vadd.s32 %v1906_v54, %v1902_v63 }
 0x371   :  { %v2094_v26 = vshrl.u32 %v4175_v20, %v2092_v61  ;;  %v2097_v46 = vadd.s32 127, %v2096_v40  ;;  %v1702_v20 = vshrl.u32 %v5044_v41, %v4170_v49  ;;  %v1905_v61 = vmul.u32 %v1901_v28, %v4184_v33 }
 0x372   :  { %v1896_v37 = vadd.s32 %v1895_v22, %v1885_v32  ;;  %v1911_v42 = vsel %vm1910_vm2, 1, %v5028_v60  ;;  %v1907_v39 = vshrl.u32 %v1903_v19, 16  ;;  %vm1914_vm3 = vc.u32 %v1912_v14, %v1908_v57 }
 0x373   :  { %v2095_v17 = vor.u32 %v2094_v26, %v2093_v38  ;;  %v2098_v23 = vshll.u32 %v2097_v46, 23  ;;  %v1913_v38 = vadd.s32 %v1911_v42, %v1905_v61  ;;  %v1703_v49 = vor.u32 %v1702_v20, %v1701_v16 }
 0x374   :  { %v1909_v46 = vshrl.u32 %v1904_v10, 16  ;;  %v1915_v6 = vsel %vm1914_vm3, 1, %v5028_v60  ;;  %vm1707_vm4 = vcmp.lt.s32.totalorder %v4165_v12, 4  ;;  %v4284_v0 = vadd.s32 %v1896_v37, %v1887_v43 }
 0x375   :  { %v2099_v48 = vor.u32 4788187, %v2098_v23  ;;  %v2102_v3 = vcvt.s32.f32 %v2095_v17  ;;  %v1917_v33 = vadd.s32 %v1915_v6, %v1913_v38  ;;  %v1712_v28 = vsel %vm1704_vm1, %v4247_v56, %v4249_v34 }
 0x376   :  { %v1713_v19 = vsel %vm1707_vm4, %v1700_v2, 920167782  ;;  %v4292_v44 = vadd.s32 %v1912_v14, %v1908_v57  ;;  %vm1705_vm5 = vcmp.lt.s32.totalorder %v4165_v12, 2  ;;  %vm1706_vm12 = vcmp.lt.s32.totalorder %v4165_v12, 3 }
 0x377   :  { %v2100_v40 = vand.u32 2147483647, %v2099_v48  ;;  %v1918_v16 = vadd.s32 %v1917_v33, %v1907_v39  ;;  %v1714_v10 = vsel %vm1706_vm12, %v4251_v9, %v1713_v19  ;;  %v1716_v17 = vsel %vm1704_vm1, %v4249_v34, %v4251_v9 }
 0x378   :  { %v1717_v23 = vsel %vm1707_vm4, %v1703_v49, 1326507024  ;;  %v1866_v30 = vsel %vm1860_vm14, %v1863_v21, %v1865_v1  ;;  %v1715_v63 = vsel %vm1705_vm5, %v1712_v28, %v1714_v10  ;;  %vm1922_vm8 = vc.u32 %v4284_v0, %v4292_v44 }
 0x379   :  { %v2103_v26 = vmul.f32 %v2102_v3, %v2100_v40  ;;  %v1718_v54 = vsel %vm1706_vm12, %v1700_v2, %v1717_v23  ;;  %v1919_v48 = vadd.s32 %v1918_v16, %v1909_v46  ;;  %v1721_v31 = vand.u32 65535, %v4177_v35 }
 0x37a   :  { %v1719_v32 = vsel %vm1705_vm5, %v1716_v17, %v1718_v54  ;;  %v2126_v2 = vadd.s32 3, %v2109_v59  ;;  %v1722_v61 = vshrl.u32 %v4177_v35, 16  ;;  %v1746_v57 = vshrl.u32 %v1715_v63, 16 }
 0x37b   :  { %v2104_v5 = vxor.u32 2147483648, %v2103_v26  ;;  %v1723_v21 = vand.u32 65535, %v1719_v32  ;;  %v1724_v1 = vshrl.u32 %v1719_v32, 16  ;;  %v1923_v22 = vadd.s32 1, %v1919_v48 }
 0x37c   :  { %v1920_v3 = vmul.u32 %v4163_v18, %v1866_v30  ;;  %v1745_v49 = vand.u32 65535, %v1715_v63  ;;  %v2127_v33 = vand.u32 3, %v2126_v2  ;;  %v1709_v15 = vsel %vm1707_vm4, %v4251_v9, 2102212464 }
 0x37d   :  { %v2105_v51 = vsel %vm1984_vm9, %v2104_v5, %v2103_v26  ;;  %v1726_v37 = vmul.u32 %v1724_v1, %v1721_v31  ;;  %v1924_v42 = vsel %vm1922_vm8, %v1923_v22, %v1919_v48  ;;  %v1725_v39 = vmul.u32 %v1723_v21, %v1721_v31 }
 0x37e   :  { %v2108_v20 = vsel %vm4209_vm7, %v4068_v4, %v2105_v51  ;;  %v1727_v38 = vmul.u32 %v1723_v21, %v1722_v61  ;;  %v1925_v6 = vadd.s32 %v1924_v42, %v1920_v3  ;;  %v1728_v59 = vmul.u32 %v1724_v1, %v1722_v61 }
 0x37f   :  { %v2110_v43 = vmul.f32 %v2108_v20, %v2108_v20  ;;  %v1729_v52 = vshll.u32 %v1726_v37, 16  ;;  %v1748_v28 = vmul.u32 %v1746_v57, %v1721_v31  ;;  %v1749_v23 = vmul.u32 %v1745_v49, %v1722_v61 }
 0x380   :  { %v1926_v16 = vadd.s32 536870912, %v1925_v6  ;;  %v1731_v18 = vshll.u32 %v1727_v38, 16  ;;  %v1708_v9 = vsel %vm1704_vm1, %v4241_v58, %v4247_v56  ;;  %v1747_v48 = vmul.u32 %v1745_v49, %v1721_v31 }
 0x381   :  { %v2111_v14 = vmul.f32 -0.001358992, %v2110_v43  ;;  %v2118_v40 = vmul.f32 -0.00019511016, %v2110_v43  ;;  %vm1733_vm9 = vc.u32 %v1725_v39, %v1729_v52  ;;  %v1735_v17 = vadd.s32 %v1729_v52, %v1725_v39 }
 0x382   :  { %v1734_v10 = vsel %vm1733_vm9, 1, %v5028_v60  ;;  %v4331_v63 = vshrl.u32 %v1926_v16, 30  ;;  %v1751_v32 = vshll.u32 %v1748_v28, 16  ;;  %v1710_v22 = vsel %vm1706_vm12, %v4249_v34, %v1709_v15 }
 0x383   :  { %v2112_v26 = vadd.f32 0.041655596, %v2111_v14  ;;  %v2119_v46 = vadd.f32 0.008332121, %v2118_v40  ;;  %v1736_v54 = vadd.s32 %v1734_v10, %v1728_v59  ;;  %vm1737_vm7 = vc.u32 %v1735_v17, %v1731_v18 }
 0x384   :  { %v1928_v2 = vshll.u32 %v4331_v63, 30  ;;  %vm2125_vm10 = vweird.f32 %v4068_v4  ;;  %v1738_v14 = vsel %vm1737_vm7, 1, %v5028_v60  ;;  %v1753_v40 = vshll.u32 %v1749_v23, 16 }
 0x385   :  { %v2113_v19 = vmul.f32 %v2112_v26, %v2110_v43  ;;  %v2120_v5 = vmul.f32 %v2119_v46, %v2110_v43  ;;  %vm1755_vm13 = vc.u32 %v1747_v48, %v1751_v32  ;;  %v1757_v3 = vadd.s32 %v1751_v32, %v1747_v48 }
 0x386   :  { %v1929_v42 = vsub.s32 %v1925_v6, %v1928_v2  ;;  %v1730_v31 = vshrl.u32 %v1726_v37, 16  ;;  %v1740_v39 = vadd.s32 %v1738_v14, %v1736_v54  ;;  %v1750_v49 = vmul.u32 %v1746_v57, %v1722_v61 }
 0x387   :  { %v2114_v51 = vadd.f32 -0.4999988, %v2113_v19  ;;  %v2121_v30 = vadd.f32 -0.16666654, %v2120_v5  ;;  %vm1759_vm14 = vc.u32 %v1757_v3, %v1753_v40  ;;  %v1732_v52 = vshrl.u32 %v1727_v38, 16 }
 0x388   :  { %vm1930_vm6 = vcmp.lt.s32.totalorder %v1929_v42, 0  ;;  %v1931_v34 = vsub.s32 0, %v1929_v42  ;;  %v1741_v15 = vadd.s32 %v1740_v39, %v1730_v31  ;;  %v1760_v19 = vsel %vm1759_vm14, 1, %v5028_v60 }
 0x389   :  { %v2115_v21 = vmul.f32 %v2114_v51, %v2110_v43  ;;  %v2122_v1 = vmul.f32 %v2121_v30, %v2110_v43  ;;  %v1756_v43 = vsel %vm1755_vm13, 1, %v5028_v60  ;;  %vm2129_vm15 = vcmp.eq.s32.totalorder %v2127_v33, 0 }
 0x38a   :  { %v1758_v59 = vadd.s32 %v1756_v43, %v1750_v49  ;;  %vm2132_vm0 = vcmp.eq.s32.totalorder %v2127_v33, 2  ;;  %v1932_v16 = vsel %vm1930_vm6, %v1931_v34, %v1929_v42  ;;  %v1711_v61 = vsel %vm1705_vm5, %v1708_v9, %v1710_v22 }
 0x38b   :  { %v2116_v58 = vadd.f32 1.0, %v2115_v21  ;;  %v2123_v56 = vadd.f32 1.0, %v2122_v1  ;;  %v1933_v6 = vclz %v1932_v16  ;;  %v4347_v57 = vadd.s32 %v1741_v15, %v1732_v52 }
 0x38c   :  { %v1762_v37 = vadd.s32 %v1760_v19, %v1758_v59  ;;  %vm2128_vm1 = vcmp.lt.s32.totalorder %v2127_v33, 2  ;;  %v1752_v10 = vshrl.u32 %v1748_v28, 16  ;;  %v1921_v17 = vadd.s32 %v4292_v44, %v4284_v0 }
 0x38d   :  { %v2124_v26 = vmul.f32 %v2123_v56, %v2108_v20  ;;  %v2133_v46 = vxor.u32 2147483648, %v2116_v58  ;;  %v2865_v51 = vadd.s32 4294967294, %v1933_v6  ;;  %v4351_v30 = vadd.s32 %v1757_v3, %v1753_v40 }
 0x38e   :  { %v1754_v48 = vshrl.u32 %v1749_v23, 16  ;;  %v1763_v12 = vadd.s32 %v1762_v37, %v1752_v10  ;;  %v1765_v9 = vmul.u32 %v4177_v35, %v1711_v61  ;;  %v1951_v33 = vsub.s32 4, %v4331_v63 }
 0x38f   :  { %v2130_v5 = vxor.u32 2147483648, %v2124_v26  ;;  %v2134_v18 = vsel %vm2132_vm0, %v2133_v46, %v2124_v26  ;;  %vm2866_vm2 = vcmp.lt.s32.totalorder %v2865_v51, 0  ;;  %vm1767_vm3 = vc.u32 %v4347_v57, %v4351_v30 }
 0x390   :  { %v1524_v0 = vand.u32 8388607, %v1517_v7  ;;  %v1936_v44 = vsel %vm2866_vm2, 0, %v2865_v51  ;;  %v1764_v28 = vadd.s32 %v1763_v12, %v1754_v48  ;;  %v1537_v4 = vshll.u32 %v5007_v36, %v4160_v53 }
 0x391   :  { %v2131_v20 = vsel %vm2129_vm15, %v2116_v58, %v2130_v5  ;;  %v1538_v23 = vshrl.u32 %v5030_v47, %v4173_v13  ;;  %v1937_v32 = vsub.s32 32, %v1936_v44  ;;  %v1941_v35 = vsub.s32 4294967266, %v1936_v44 }
 0x392   :  { %v2135_v38 = vsel %vm2128_vm1, %v2131_v20, %v2134_v18  ;;  %v1535_v21 = vshrl.u32 %v5007_v36, %v4173_v13  ;;  %v1540_v1 = vshll.u32 %v5030_v47, %v4160_v53  ;;  %v1938_v2 = vshll.u32 %v1929_v42, %v1936_v44 }
 0x393   :  { %v2136_v54 = vsel %vm2125_vm10, nan, %v2135_v38  ;;  %v1768_v22 = vadd.s32 1, %v1764_v28  ;;  %v4369_v14 = vor.u32 %v1538_v23, %v1537_v4  ;;  %v1541_v40 = vshrl.u32 %v5008_v62, %v4173_v13 }
 0x394   :  { %2149 = vmatpush.msra.mxu3 %v2136_v54  ;;  %v1939_v3 = vshrl.u32 %v1921_v17, %v1937_v32  ;;  %v1942_v58 = vadd.s32 127, %v1941_v35  ;;  %v1543_v56 = vshll.u32 %v5008_v62, %v4160_v53  ;;  %v1544_v31 = vshrl.u32 %v5043_v55, %v4173_v13 }
 0x395   :  { %v1769_v39 = vsel %vm1767_vm3, %v1768_v22, %v1764_v28  ;;  %v4380_v49 = vor.u32 %v1541_v40, %v1540_v1  ;;  %v1546_v42 = vshll.u32 %v5043_v55, %v4160_v53  ;;  %v1547_v43 = vshrl.u32 %v5044_v41, %v4173_v13 }
 0x396   :  { %v1940_v26 = vor.u32 %v1939_v3, %v1938_v2  ;;  %v1943_v46 = vshll.u32 %v1942_v58, 23  ;;  %v1770_v34 = vadd.s32 %v1769_v39, %v1765_v9  ;;  %v1545_v52 = vor.u32 %v1544_v31, %v1543_v56 }
 0x397   :  { %vm1829_vm4 = vcmp.lt.s32.totalorder %v4135_v24, 0  ;;  %v1525_v15 = vor.u32 8388608, %v1524_v0  ;;  %v1534_v59 = vshll.u32 %v5029_v8, %v4160_v53  ;;  %v1548_v19 = vor.u32 %v1547_v43, %v1546_v42 }
 0x398   :  { %vm4391_vm5 = vcmp.le.f32.partialorder %v1827_v11, 0.7853982  ;;  %v1944_v16 = vor.u32 4788187, %v1943_v46  ;;  %v1952_v6 = vsel %vm1829_vm4, %v1951_v33, %v4331_v63  ;;  %v1771_v61 = vadd.s32 536870912, %v1770_v34 }
 0x399   :  { %v1947_v37 = vcvt.s32.f32 %v1940_v26  ;;  %v4398_v20 = vor.u32 %v1535_v21, %v1534_v59  ;;  %vm1549_vm12 = vcmp.lt.s32.totalorder %v4167_v50, 1  ;;  %vm1552_vm8 = vcmp.lt.s32.totalorder %v4167_v50, 4 }
 0x39a   :  { %v1945_v53 = vand.u32 2147483647, %v1944_v16  ;;  %v4402_v18 = vshrl.u32 %v1771_v61, 30  ;;  %v1558_v11 = vsel %vm1552_vm8, %v1545_v52, 920167782  ;;  %v1561_v10 = vsel %vm1549_vm12, %v4369_v14, %v4380_v49 }
 0x39b   :  { %v1954_v63 = vsel %vm4391_vm5, 0, %v1952_v6  ;;  %vm1551_vm9 = vcmp.lt.s32.totalorder %v4167_v50, 3  ;;  %v1562_v38 = vsel %vm1552_vm8, %v1548_v19, 1326507024  ;;  %v4415_v17 = vshll.u32 %v1525_v15, 8 }
 0x39c   :  { %v1948_v51 = vmul.f32 %v1947_v37, %v1945_v53  ;;  %v1773_v54 = vshll.u32 %v4402_v18, 30  ;;  %vm1550_vm7 = vcmp.lt.s32.totalorder %v4167_v50, 2  ;;  %v1563_v48 = vsel %vm1551_vm9, %v1545_v52, %v1562_v38 }
 0x39d   :  { %v1557_v12 = vsel %vm1549_vm12, %v4398_v20, %v4369_v14  ;;  %v1559_v9 = vsel %vm1551_vm9, %v4380_v49, %v1558_v11  ;;  %v1564_v33 = vsel %vm1550_vm7, %v1561_v10, %v1563_v48  ;;  %v1971_v4 = vadd.s32 3, %v1954_v63 }
 0x39e   :  { %v1949_v0 = vxor.u32 2147483648, %v1948_v51  ;;  %v1774_v44 = vsub.s32 %v1770_v34, %v1773_v54  ;;  %v1568_v28 = vand.u32 65535, %v1564_v33  ;;  %v1566_v23 = vand.u32 65535, %v4415_v17 }
 0x39f   :  { %v1567_v32 = vshrl.u32 %v4415_v17, 16  ;;  %v1569_v35 = vshrl.u32 %v1564_v33, 16  ;;  %v1560_v2 = vsel %vm1550_vm7, %v1557_v12, %v1559_v9  ;;  %v4441_v34 = vand.u32 3, %v1971_v4 }
 0x3a0   :  { %v1950_v21 = vsel %vm1829_vm4, %v1949_v0, %v1948_v51  ;;  %vm1775_vm10 = vcmp.lt.s32.totalorder %v1774_v44, 0  ;;  %v1776_v1 = vsub.s32 0, %v1774_v44  ;;  %v1570_v39 = vmul.u32 %v1568_v28, %v1566_v23 }
 0x3a1   :  { %v1953_v22 = vsel %vm4391_vm5, %v4135_v24, %v1950_v21  ;;  %v1571_v40 = vmul.u32 %v1569_v35, %v1566_v23  ;;  %v4439_v3 = vmul.u32 %v1568_v28, %v1567_v32  ;;  %v1591_v43 = vshrl.u32 %v1560_v2, 16 }
 0x3a2   :  { %v1955_v58 = vmul.f32 %v1953_v22, %v1953_v22  ;;  %v1777_v56 = vsel %vm1775_vm10, %v1776_v1, %v1774_v44  ;;  %v1590_v52 = vand.u32 65535, %v1560_v2  ;;  %v1573_v59 = vmul.u32 %v1569_v35, %v1567_v32 }
 0x3a3   :  { %v1778_v31 = vclz %v1777_v56  ;;  %v1574_v42 = vshll.u32 %v1571_v40, 16  ;;  %v1576_v19 = vshll.u32 %v4439_v3, 16  ;;  %v1533_v37 = vshrl.u32 %v5029_v8, %v4173_v13 }
 0x3a4   :  { %v1956_v26 = vmul.f32 -0.001358992, %v1955_v58  ;;  %v1963_v46 = vmul.f32 -0.00019511016, %v1955_v58  ;;  %v1593_v11 = vmul.u32 %v1591_v43, %v1566_v23  ;;  %v1766_v51 = vadd.s32 %v4351_v30, %v4347_v57 }
 0x3a5   :  { %v2862_v15 = vadd.s32 4294967294, %v1778_v31  ;;  %vm1578_vm13 = vc.u32 %v1570_v39, %v1574_v42  ;;  %v1580_v61 = vadd.s32 %v1574_v42, %v1570_v39  ;;  %v1592_v0 = vmul.u32 %v1590_v52, %v1566_v23 }
 0x3a6   :  { %v1957_v5 = vadd.f32 0.041655596, %v1956_v26  ;;  %v1964_v16 = vadd.f32 0.008332121, %v1963_v46  ;;  %v1579_v6 = vsel %vm1578_vm13, 1, %v5028_v60  ;;  %v1594_v28 = vmul.u32 %v1590_v52, %v1567_v32 }
 0x3a7   :  { %vm2863_vm14 = vcmp.lt.s32.totalorder %v2862_v15, 0  ;;  %v1581_v53 = vadd.s32 %v1579_v6, %v1573_v59  ;;  %vm1582_vm6 = vc.u32 %v1580_v61, %v1576_v19  ;;  %v1596_v21 = vshll.u32 %v1593_v11, 16 }
 0x3a8   :  { %v1958_v10 = vmul.f32 %v1957_v5, %v1955_v58  ;;  %v1965_v63 = vmul.f32 %v1964_v16, %v1955_v58  ;;  %v1781_v38 = vsel %vm2863_vm14, 0, %v2862_v15  ;;  %v1583_v12 = vsel %vm1582_vm6, 1, %v5028_v60 }
 0x3a9   :  { %v1782_v54 = vsub.s32 32, %v1781_v38  ;;  %v1786_v48 = vsub.s32 4294967266, %v1781_v38  ;;  %v1783_v4 = vshll.u32 %v1774_v44, %v1781_v38  ;;  %vm1973_vm15 = vcmp.lt.s32.totalorder %v4441_v34, 2 }
 0x3aa   :  { %v1959_v9 = vadd.f32 -0.4999988, %v1958_v10  ;;  %v1966_v33 = vadd.f32 -0.16666654, %v1965_v63  ;;  %v1585_v56 = vadd.s32 %v1583_v12, %v1581_v53  ;;  %vm1970_vm0 = vweird.f32 %v4135_v24 }
 0x3ab   :  { %v1784_v35 = vshrl.u32 %v1766_v51, %v1782_v54  ;;  %v1787_v13 = vadd.s32 127, %v1786_v48  ;;  %v1595_v31 = vmul.u32 %v1591_v43, %v1567_v32  ;;  %vm1600_vm1 = vc.u32 %v1592_v0, %v1596_v21 }
 0x3ac   :  { %v1960_v1 = vmul.f32 %v1959_v9, %v1955_v58  ;;  %v1967_v2 = vmul.f32 %v1966_v33, %v1955_v58  ;;  %v1575_v26 = vshrl.u32 %v1571_v40, 16  ;;  %v1601_v23 = vsel %vm1600_vm1, 1, %v5028_v60 }
 0x3ad   :  { %v1785_v57 = vor.u32 %v1784_v35, %v1783_v4  ;;  %v1788_v30 = vshll.u32 %v1787_v13, 23  ;;  %v1598_v46 = vshll.u32 %v1594_v28, 16  ;;  %v1602_v52 = vadd.s32 %v1596_v21, %v1592_v0 }
 0x3ae   :  { %v1961_v39 = vadd.f32 1.0, %v1960_v1  ;;  %v1968_v42 = vadd.f32 1.0, %v1967_v2  ;;  %v1603_v15 = vadd.s32 %v1601_v23, %v1595_v31  ;;  %vm1974_vm2 = vcmp.eq.s32.totalorder %v4441_v34, 0 }
 0x3af   :  { %v1789_v44 = vor.u32 4788187, %v1788_v30  ;;  %v1586_v19 = vadd.s32 %v1585_v56, %v1575_v26  ;;  %v1792_v16 = vcvt.s32.f32 %v1785_v57  ;;  %v1554_v32 = vsel %vm1552_vm8, %v4380_v49, 2102212464 }
 0x3b0   :  { %v1969_v59 = vmul.f32 %v1968_v42, %v1953_v22  ;;  %v1978_v58 = vxor.u32 2147483648, %v1961_v39  ;;  %vm1604_vm3 = vc.u32 %v1602_v52, %v1598_v46  ;;  %vm1977_vm4 = vcmp.eq.s32.totalorder %v4441_v34, 2 }
 0x3b1   :  { %v1790_v5 = vand.u32 2147483647, %v1789_v44  ;;  %v1577_v40 = vshrl.u32 %v4439_v3, 16  ;;  %v1605_v6 = vsel %vm1604_vm3, 1, %v5028_v60  ;;  %v1553_v22 = vsel %vm1549_vm12, %v1533_v37, %v4398_v20 }
 0x3b2   :  { %v1975_v43 = vxor.u32 2147483648, %v1969_v59  ;;  %v1597_v53 = vshrl.u32 %v1593_v11, 16  ;;  %v1607_v10 = vadd.s32 %v1605_v6, %v1603_v15  ;;  %v1979_v38 = vsel %vm1977_vm4, %v1978_v58, %v1969_v59 }
 0x3b3   :  { %v1793_v61 = vmul.f32 %v1792_v16, %v1790_v5  ;;  %v1555_v49 = vsel %vm1551_vm9, %v4369_v14, %v1554_v32  ;;  %v1587_v51 = vadd.s32 %v1586_v19, %v1577_v40  ;;  %v1599_v48 = vshrl.u32 %v1594_v28, 16 }
 0x3b4   :  { %v1976_v63 = vsel %vm1974_vm2, %v1961_v39, %v1975_v43  ;;  %v1608_v12 = vadd.s32 %v1607_v10, %v1597_v53  ;;  %vm1674_vm5 = vcmp.lt.s32.totalorder %v4071_v45, 0  ;;  %v1606_v20 = vadd.s32 %v1602_v52, %v1598_v46 }
 0x3b5   :  { %v1980_v54 = vsel %vm1973_vm15, %v1976_v63, %v1979_v38  ;;  %v1794_v3 = vxor.u32 2147483648, %v1793_v61  ;;  %vm4473_vm12 = vcmp.le.f32.partialorder %v1672_v29, 0.7853982  ;;  %v1556_v34 = vsel %vm1550_vm7, %v1553_v22, %v1555_v49 }
 0x3b6   :  { %v1981_v9 = vsel %vm1970_vm0, nan, %v1980_v54  ;;  %v1609_v11 = vadd.s32 %v1608_v12, %v1599_v48  ;;  %v1796_v24 = vsub.s32 4, %v4402_v18  ;;  %vm1612_vm8 = vc.u32 %v1587_v51, %v1606_v20 }
 0x3b7   :  { %2150 = vmatpush.msra.mxu3 %v1981_v9  ;;  %v1795_v14 = vsel %vm1674_vm5, %v1794_v3, %v1793_v61  ;;  %v1610_v29 = vmul.u32 %v4415_v17, %v1556_v34  ;;  %vm1815_vm14 = vweird.f32 %v4071_v45  ;;  %v1611_v63 = vadd.s32 %v1606_v20, %v1587_v51 }
 0x3b8   :  { %v1798_v33 = vsel %vm4473_vm12, %v4071_v45, %v1795_v14  ;;  %v1613_v28 = vadd.s32 1, %v1609_v11  ;;  %v1797_v50 = vsel %vm1674_vm5, %v1796_v24, %v4402_v18  ;;  %vm1519_vm15 = vcmp.lt.s32.totalorder %v4075_v25, 0 }
 0x3b9   :  { %v1800_v0 = vmul.f32 %v1798_v33, %v1798_v33  ;;  %v1799_v57 = vsel %vm4473_vm12, 0, %v1797_v50  ;;  %vm1518_vm0 = vcmp.le.f32.partialorder %v1517_v7, 0.7853982  ;;  %vm1660_vm4 = vweird.f32 %v4075_v25 }
 0x3ba   :  { %v1614_v13 = vsel %vm1612_vm8, %v1613_v28, %v1609_v11  ;;  %v1816_v17 = vadd.s32 3, %v1799_v57 }
 0x3bb   :  { %v1801_v4 = vmul.f32 -0.001358992, %v1800_v0  ;;  %v1808_v35 = vmul.f32 -0.00019511016, %v1800_v0  ;;  %v1615_v21 = vadd.s32 %v1614_v13, %v1610_v29 }
 0x3bc   :  { %v1817_v18 = vand.u32 3, %v1816_v17 }
 0x3bd   :  { %v1802_v1 = vadd.f32 0.041655596, %v1801_v4  ;;  %v1809_v2 = vadd.f32 0.008332121, %v1808_v35  ;;  %v1616_v56 = vadd.s32 536870912, %v1615_v21 }
 0x3be   :  { %vm1819_vm7 = vcmp.eq.s32.totalorder %v1817_v18, 0  ;;  %vm1822_vm10 = vcmp.eq.s32.totalorder %v1817_v18, 2  ;;  %vm1818_vm13 = vcmp.lt.s32.totalorder %v1817_v18, 2  ;;  %v2915_v18 = vld [vmem:[%s4971_s3 + $0x10] sm:$0xff] }
 0x3bf   :  { %v1803_v30 = vmul.f32 %v1802_v1, %v1800_v0  ;;  %v1810_v31 = vmul.f32 %v1809_v2, %v1800_v0  ;;  %v1617_v39 = vshrl.u32 %v1616_v56, 30 }
 0x3c1   :  { %v1804_v42 = vadd.f32 -0.4999988, %v1803_v30  ;;  %v1811_v26 = vadd.f32 -0.16666654, %v1810_v31  ;;  %v1618_v23 = vshll.u32 %v1617_v39, 30 }
 0x3c3   :  { %v1805_v44 = vmul.f32 %v1804_v42, %v1800_v0  ;;  %v1812_v46 = vmul.f32 %v1811_v26, %v1800_v0  ;;  %v1619_v52 = vsub.s32 %v1615_v21, %v1618_v23 }
 0x3c5   :  { %v1806_v15 = vadd.f32 1.0, %v1805_v44  ;;  %v1813_v59 = vadd.f32 1.0, %v1812_v46  ;;  %vm1620_vm9 = vcmp.lt.s32.totalorder %v1619_v52, 0  ;;  %v1621_v58 = vsub.s32 0, %v1619_v52 }
 0x3c7   :  { %v1814_v19 = vmul.f32 %v1813_v59, %v1798_v33  ;;  %v1823_v5 = vxor.u32 2147483648, %v1806_v15  ;;  %v1622_v16 = vsel %vm1620_vm9, %v1621_v58, %v1619_v52  ;;  %v1641_v33 = vsub.s32 4, %v1617_v39  ;;  %v2914_v59 = vld [vmem:[%s4971_s3 + $0x8] sm:$0xff] }
 0x3c8   :  { %v1623_v43 = vclz %v1622_v16 }
 0x3c9   :  { %v1820_v32 = vxor.u32 2147483648, %v1814_v19  ;;  %v1824_v6 = vsel %vm1822_vm10, %v1823_v5, %v1814_v19  ;;  %v1642_v29 = vsel %vm1519_vm15, %v1641_v33, %v1617_v39  ;;  %v5052_v19 = vld [vmem:[#allocation6_spill] sm:$0xff] }
 0x3ca   :  { %v2859_v61 = vadd.s32 4294967294, %v1623_v43  ;;  %v1644_v13 = vsel %vm1518_vm0, 0, %v1642_v29 }
 0x3cb   :  { %v1821_v40 = vsel %vm1819_vm7, %v1806_v15, %v1820_v32  ;;  %v1661_v56 = vadd.s32 3, %v1644_v13  ;;  %v2913_v15 = vld [vmem:[%s4971_s3] sm:$0xff] }
 0x3cc   :  { %v1825_v22 = vsel %vm1818_vm13, %v1821_v40, %v1824_v6  ;;  %vm2860_vm6 = vcmp.lt.s32.totalorder %v2859_v61, 0 }
 0x3cd   :  { %v1826_v53 = vsel %vm1815_vm14, nan, %v1825_v22  ;;  %v1626_v10 = vsel %vm2860_vm6, 0, %v2859_v61  ;;  %v1662_v42 = vand.u32 3, %v1661_v56  ;;  %v5053_v61 = vld [vmem:[#allocation8_spill] sm:$0xff] }
 0x3ce   :  { %2151 = vmatpush.msra.mxu3 %v1826_v53  ;;  %v1627_v38 = vsub.s32 32, %v1626_v10  ;;  %v1631_v49 = vsub.s32 4294967266, %v1626_v10  ;;  %v1628_v54 = vshll.u32 %v1619_v52, %v1626_v10 }
 0x3cf   :  { %vm1664_vm1 = vcmp.eq.s32.totalorder %v1662_v42, 0  ;;  %vm1667_vm2 = vcmp.eq.s32.totalorder %v1662_v42, 2  ;;  %vm1663_vm3 = vcmp.lt.s32.totalorder %v1662_v42, 2 }
 0x3d0   :  { %v1629_v3 = vshrl.u32 %v1611_v63, %v1627_v38  ;;  %v1632_v48 = vadd.s32 127, %v1631_v49 }
 0x3d2   :  { %v1630_v12 = vor.u32 %v1629_v3, %v1628_v54  ;;  %v1633_v9 = vshll.u32 %v1632_v48, 23  ;;  %v5054_v54 = vld [vmem:[#allocation9_spill] sm:$0xff] }
 0x3d4   :  { %v1634_v37 = vor.u32 4788187, %v1633_v9  ;;  %v1637_v34 = vcvt.s32.f32 %v1630_v12 }
 0x3d6   :  { %v1635_v14 = vand.u32 2147483647, %v1634_v37 }
 0x3d8   :  { %v1638_v11 = vmul.f32 %v1637_v34, %v1635_v14 }
 0x3da   :  { %v1639_v24 = vxor.u32 2147483648, %v1638_v11 }
 0x3dc   :  { %v1640_v45 = vsel %vm1519_vm15, %v1639_v24, %v1638_v11 }
 0x3dd   :  { %v1643_v51 = vsel %vm1518_vm0, %v4075_v25, %v1640_v45  ;;  %v2916_v25 = vld [vmem:[%s4971_s3 + $0x18] sm:$0xff] }
 0x3de   :  { %v1645_v20 = vmul.f32 %v1643_v51, %v1643_v51 }
 0x3e0   :  { %v1646_v0 = vmul.f32 -0.001358992, %v1645_v20  ;;  %v1653_v28 = vmul.f32 -0.00019511016, %v1645_v20 }
 0x3e2   :  { %v1647_v4 = vadd.f32 0.041655596, %v1646_v0  ;;  %v1654_v35 = vadd.f32 0.008332121, %v1653_v28  ;;  %v5055_v0 = vld [vmem:[#allocation7_spill] sm:$0xff] }
 0x3e4   :  { %v1648_v50 = vmul.f32 %v1647_v4, %v1645_v20  ;;  %v1655_v21 = vmul.f32 %v1654_v35, %v1645_v20 }
 0x3e6   :  { %v1649_v1 = vadd.f32 -0.4999988, %v1648_v50  ;;  %v1656_v2 = vadd.f32 -0.16666654, %v1655_v21 }
 0x3e8   :  { %v1650_v57 = vmul.f32 %v1649_v1, %v1645_v20  ;;  %v1657_v30 = vmul.f32 %v1656_v2, %v1645_v20 }
 0x3ea   :  { %v1651_v31 = vadd.f32 1.0, %v1650_v57  ;;  %v1658_v7 = vadd.f32 1.0, %v1657_v30 }
 0x3ec   :  { %v1659_v26 = vmul.f32 %v1658_v7, %v1643_v51  ;;  %v1668_v17 = vxor.u32 2147483648, %v1651_v31 }
 0x3ee   :  { %v1665_v23 = vxor.u32 2147483648, %v1659_v26  ;;  %v1669_v44 = vsel %vm1667_vm2, %v1668_v17, %v1659_v26 }
 0x3f0   :  { %v1666_v39 = vsel %vm1664_vm1, %v1651_v31, %v1665_v23 }
 0x3f1   :  { %v1670_v46 = vsel %vm1663_vm3, %v1666_v39, %v1669_v44 }
 0x3f2   :  { %v1671_v52 = vsel %vm1660_vm4, nan, %v1670_v46 }
 0x3f3   :  { %2152 = vmatpush.msra.mxu3 %v1671_v52 }
 0x3f4   :  { %2870 = vmatmul.msk.f32.vlgmr.msra.gmra.mxu3 %vm752_vm11, %v2913_v15 }
 0x3fc   :  { %2871 = vmatmul.msk.f32.gmra.mxu3 %vm752_vm11, %v2914_v59 }
 0x404   :  { %2872 = vmatmul.msk.f32.gmra.mxu3 %vm752_vm11, %v2915_v18 }
 0x40c   :  { %2873 = vmatmul.msk.f32.gmra.mxu3 %vm752_vm11, %v2916_v25 }
 0x477   :  { %v2154_v58 = vpop.f32.mrf.mxu3 }
 0x478   :  { %v4514_v5 = vadd.f32 %v2154_v58, %v5052_v19 }
 0x47a   :  { %v2169_v16 = vand.u32 2139095040, %v4514_v5 }
 0x47c   :  { %v2170_v32 = vshrl.u32 %v2169_v16, 23 }
 0x47e   :  { %v2874_v43 = vadd.s32 4294967169, %v2170_v32 }
 0x47f   :  { %v2157_v40 = vpop.f32.mrf.mxu3 }
 0x480   :  { %v2176_v6 = vadd.s32 1, %v2874_v43  ;;  %v4518_v22 = vadd.f32 %v2157_v40, %v5053_v61 }
 0x482   :  { %v2324_v53 = vand.u32 2139095040, %v4518_v22  ;;  %vm2177_vm5 = vcmp.gt.s32.totalorder %v2176_v6, 0  ;;  %v5003_v11 = vand.u32 2147483647, %v4518_v22 }
 0x483   :  { %v2178_v63 = vsel %vm2177_vm5, %v2176_v6, 0 }
 0x484   :  { %v2325_v10 = vshrl.u32 %v2324_v53, 23  ;;  %v4524_v48 = vand.u32 31, %v2178_v63  ;;  %v4541_v4 = vand.u32 8388607, %v5003_v11  ;;  %v4560_v7 = vshrl.u32 %v2178_v63, 5 }
 0x486   :  { %v2877_v38 = vadd.s32 4294967169, %v2325_v10  ;;  %v4528_v34 = vsub.s32 32, %v4524_v48  ;;  %v2192_v56 = vshll.u32 %v5008_v62, %v4524_v48  ;;  %v4558_v57 = vshll.u32 %v5043_v55, %v4524_v48 }
 0x487   :  { %v2160_v49 = vpop.f32.mrf.mxu3  ;;  %v2329_v39 = vor.u32 8388608, %v4541_v4 }
 0x488   :  { %v4522_v3 = vadd.f32 %v2160_v49, %v5054_v54  ;;  %v2331_v12 = vadd.s32 1, %v2877_v38  ;;  %v2193_v29 = vshrl.u32 %v5043_v55, %v4528_v34  ;;  %v4545_v35 = vshrl.u32 %v5044_v41, %v4528_v34 }
 0x48a   :  { %v2479_v9 = vand.u32 2139095040, %v4522_v3  ;;  %vm2332_vm12 = vcmp.gt.s32.totalorder %v2331_v12, 0  ;;  %v5004_v51 = vand.u32 2147483647, %v4522_v3  ;;  %v4564_v26 = vor.u32 %v2193_v29, %v2192_v56 }
 0x48b   :  { %v2333_v37 = vsel %vm2332_vm12, %v2331_v12, 0  ;;  %v2197_v17 = vor.u32 %v4545_v35, %v4558_v57 }
 0x48c   :  { %v2480_v14 = vshrl.u32 %v2479_v9, 23  ;;  %v4531_v45 = vand.u32 31, %v2333_v37  ;;  %v2483_v2 = vand.u32 8388607, %v5004_v51  ;;  %v4576_v19 = vshrl.u32 %v2333_v37, 5 }
 0x48e   :  { %v2880_v24 = vadd.s32 4294967169, %v2480_v14  ;;  %v4550_v21 = vsub.s32 32, %v4531_v45  ;;  %v2484_v15 = vor.u32 8388608, %v2483_v2  ;;  %v2347_v16 = vshll.u32 %v5008_v62, %v4531_v45 }
 0x48f   :  { %v2163_v33 = vpop.f32.mrf.mxu3  ;;  %v4583_v40 = vshll.u32 %v5043_v55, %v4531_v45 }
 0x490   :  { %v2486_v20 = vadd.s32 1, %v2880_v24  ;;  %v4535_v28 = vadd.f32 %v2163_v33, %v5055_v0  ;;  %v2348_v44 = vshrl.u32 %v5043_v55, %v4550_v21  ;;  %v4587_v6 = vshrl.u32 %v5044_v41, %v4550_v21 }
 0x491   :  { %v4598_v12 = vshll.u32 %v2484_v15, 8  ;;  %v2337_v35 = vshrl.u32 %v5029_v8, %v4550_v21 }
 0x492   :  { %vm2487_vm8 = vcmp.gt.s32.totalorder %v2486_v20, 0  ;;  %v2634_v13 = vand.u32 2139095040, %v4535_v28  ;;  %v5005_v50 = vand.u32 2147483647, %v4535_v28  ;;  %v4593_v10 = vor.u32 %v2348_v44, %v2347_v16 }
 0x493   :  { %v2488_v1 = vsel %vm2487_vm8, %v2486_v20, 0 }
 0x494   :  { %v2490_v30 = vand.u32 31, %v2488_v1  ;;  %v2635_v31 = vshrl.u32 %v2634_v13, 23  ;;  %v2638_v42 = vand.u32 8388607, %v5005_v50  ;;  %v4571_v59 = vshrl.u32 %v2488_v1, 5 }
 0x496   :  { %v2491_v23 = vsub.s32 32, %v2490_v30  ;;  %v2883_v46 = vadd.s32 4294967169, %v2635_v31  ;;  %v2639_v52 = vor.u32 8388608, %v2638_v42  ;;  %v2502_v18 = vshll.u32 %v5008_v62, %v2490_v30 }
 0x497   :  { %v2505_v32 = vshll.u32 %v5043_v55, %v2490_v30  ;;  %vm2511_vm7 = vcmp.lt.s32.totalorder %v4571_v59, 4  ;;  %v2493_v37 = vshll.u32 %v5029_v8, %v2490_v30  ;;  %v2496_v14 = vshll.u32 %v5007_v36, %v2490_v30 }
 0x498   :  { %v2503_v25 = vshrl.u32 %v5043_v55, %v2491_v23  ;;  %v2506_v58 = vshrl.u32 %v5044_v41, %v2491_v23  ;;  %v2641_v43 = vadd.s32 1, %v2883_v46  ;;  %v4591_v53 = vshll.u32 %v2639_v52, 8 }
 0x499   :  { %v2494_v38 = vshrl.u32 %v5007_v36, %v2491_v23  ;;  %v2497_v54 = vshrl.u32 %v5030_v47, %v2491_v23  ;;  %v2499_v24 = vshll.u32 %v5030_v47, %v2490_v30  ;;  %v2492_v29 = vshrl.u32 %v5029_v8, %v2491_v23 }
 0x49a   :  { %v4589_v61 = vor.u32 %v2503_v25, %v2502_v18  ;;  %v2507_v63 = vor.u32 %v2506_v58, %v2505_v32  ;;  %vm2642_vm9 = vcmp.gt.s32.totalorder %v2641_v43, 0  ;;  %v2680_v20 = vand.u32 65535, %v4591_v53 }
 0x49b   :  { %v2643_v49 = vsel %vm2642_vm9, %v2641_v43, 0  ;;  %v2681_v0 = vshrl.u32 %v4591_v53, 16  ;;  %v2495_v56 = vor.u32 %v2494_v38, %v2493_v37  ;;  %v4615_v42 = vor.u32 %v2497_v54, %v2496_v14 }
 0x49c   :  { %v2645_v9 = vand.u32 31, %v2643_v49  ;;  %v4606_v33 = vsel %vm2511_vm7, %v4589_v61, 920167782  ;;  %v2521_v13 = vsel %vm2511_vm7, %v2507_v63, 1326507024  ;;  %v2644_v1 = vshrl.u32 %v2643_v49, 5 }
 0x49d   :  { %v2500_v44 = vshrl.u32 %v5008_v62, %v2491_v23  ;;  %vm2508_vm10 = vcmp.lt.s32.totalorder %v4571_v59, 1  ;;  %vm2509_vm0 = vcmp.lt.s32.totalorder %v4571_v59, 2  ;;  %vm2510_vm1 = vcmp.lt.s32.totalorder %v4571_v59, 3 }
 0x49e   :  { %v2646_v2 = vsub.s32 32, %v2645_v9  ;;  %v2657_v31 = vshll.u32 %v5008_v62, %v2645_v9  ;;  %v2660_v30 = vshll.u32 %v5043_v55, %v2645_v9  ;;  %v2648_v15 = vshll.u32 %v5029_v8, %v2645_v9 }
 0x49f   :  { %v2651_v25 = vshll.u32 %v5007_v36, %v2645_v9  ;;  %v2654_v16 = vshll.u32 %v5030_v47, %v2645_v9  ;;  %vm2666_vm13 = vcmp.lt.s32.totalorder %v2644_v1, 4  ;;  %vm2663_vm14 = vcmp.lt.s32.totalorder %v2644_v1, 1 }
 0x4a0   :  { %v2658_v46 = vshrl.u32 %v5043_v55, %v2646_v2  ;;  %v2661_v52 = vshrl.u32 %v5044_v41, %v2646_v2  ;;  %v2649_v18 = vshrl.u32 %v5007_v36, %v2646_v2  ;;  %v2652_v58 = vshrl.u32 %v5030_v47, %v2646_v2 }
 0x4a1   :  { %v2655_v32 = vshrl.u32 %v5008_v62, %v2646_v2  ;;  %v2647_v55 = vshrl.u32 %v5029_v8, %v2646_v2  ;;  %vm2664_vm6 = vcmp.lt.s32.totalorder %v2644_v1, 2  ;;  %vm2665_vm15 = vcmp.lt.s32.totalorder %v2644_v1, 3 }
 0x4a2   :  { %v2659_v43 = vor.u32 %v2658_v46, %v2657_v31  ;;  %v2662_v23 = vor.u32 %v2661_v52, %v2660_v30  ;;  %v2650_v63 = vor.u32 %v2649_v18, %v2648_v15  ;;  %v2653_v38 = vor.u32 %v2652_v58, %v2651_v25 }
 0x4a3   :  { %v2656_v41 = vor.u32 %v2655_v32, %v2654_v16  ;;  %v4634_v25 = vsel %vm2508_vm10, %v2492_v29, %v2495_v56  ;;  %v2525_v58 = vand.u32 65535, %v4598_v12  ;;  %v2501_v32 = vor.u32 %v2500_v44, %v2499_v24 }
 0x4a4   :  { %v2672_v49 = vsel %vm2666_vm13, %v2659_v43, 920167782  ;;  %v2676_v54 = vsel %vm2666_vm13, %v2662_v23, 1326507024  ;;  %v2671_v14 = vsel %vm2663_vm14, %v2650_v63, %v2653_v38  ;;  %v2667_v9 = vsel %vm2663_vm14, %v2647_v55, %v2650_v63 }
 0x4a5   :  { %v2668_v37 = vsel %vm2666_vm13, %v2656_v41, 2102212464  ;;  %v2673_v11 = vsel %vm2665_vm15, %v2656_v41, %v2672_v49  ;;  %v2675_v51 = vsel %vm2663_vm14, %v2653_v38, %v2656_v41  ;;  %v2677_v31 = vsel %vm2665_vm15, %v2659_v43, %v2676_v54 }
 0x4a6   :  { %v2674_v50 = vsel %vm2664_vm6, %v2671_v14, %v2673_v11  ;;  %v2669_v2 = vsel %vm2665_vm15, %v2653_v38, %v2668_v37  ;;  %v2678_v30 = vsel %vm2664_vm6, %v2675_v51, %v2677_v31  ;;  %v2516_v43 = vsel %vm2508_vm10, %v2495_v56, %v4615_v42 }
 0x4a7   :  { %v2704_v46 = vand.u32 65535, %v2674_v50  ;;  %v2705_v52 = vshrl.u32 %v2674_v50, 16  ;;  %v2682_v15 = vand.u32 65535, %v2678_v30  ;;  %v2683_v18 = vshrl.u32 %v2678_v30, 16 }
 0x4a8   :  { %v4641_v23 = vsel %vm2664_vm6, %v2667_v9, %v2669_v2  ;;  %v2522_v63 = vsel %vm2510_vm1, %v4589_v61, %v2521_v13  ;;  %v2518_v1 = vsel %vm2510_vm1, %v2501_v32, %v4606_v33  ;;  %v2520_v56 = vsel %vm2508_vm10, %v4615_v42, %v2501_v32 }
 0x4a9   :  { %v2707_v16 = vmul.u32 %v2705_v52, %v2680_v20  ;;  %v2708_v11 = vmul.u32 %v2704_v46, %v2681_v0  ;;  %v2685_v51 = vmul.u32 %v2683_v18, %v2680_v20  ;;  %v2686_v50 = vmul.u32 %v2682_v15, %v2681_v0 }
 0x4aa   :  { %v2684_v29 = vmul.u32 %v2682_v15, %v2680_v20  ;;  %v2706_v55 = vmul.u32 %v2704_v46, %v2680_v20  ;;  %v2709_v38 = vmul.u32 %v2705_v52, %v2681_v0  ;;  %v2687_v49 = vmul.u32 %v2683_v18, %v2681_v0 }
 0x4ab   :  { %v2710_v41 = vshll.u32 %v2707_v16, 16  ;;  %v2688_v54 = vshll.u32 %v2685_v51, 16  ;;  %v2711_v24 = vshrl.u32 %v2707_v16, 16  ;;  %v2712_v44 = vshll.u32 %v2708_v11, 16 }
 0x4ac   :  { %v2690_v14 = vshll.u32 %v2686_v50, 16  ;;  %v2519_v9 = vsel %vm2509_vm0, %v2516_v43, %v2518_v1  ;;  %v2523_v2 = vsel %vm2509_vm0, %v2520_v56, %v2522_v63  ;;  %v2689_v30 = vshrl.u32 %v2685_v51, 16 }
 0x4ad   :  { %vm2714_vm2 = vc.u32 %v2706_v55, %v2710_v41  ;;  %v2716_v37 = vadd.s32 %v2710_v41, %v2706_v55  ;;  %vm2692_vm3 = vc.u32 %v2684_v29, %v2688_v54  ;;  %v2694_v61 = vadd.s32 %v2688_v54, %v2684_v29 }
 0x4ae   :  { %v2715_v20 = vsel %vm2714_vm2, 1, %v5028_v60  ;;  %v2693_v0 = vsel %vm2692_vm3, 1, %v5028_v60  ;;  %v2527_v15 = vand.u32 65535, %v2523_v2  ;;  %v2526_v16 = vshrl.u32 %v4598_v12, 16 }
 0x4af   :  { %v2717_v13 = vadd.s32 %v2715_v20, %v2709_v38  ;;  %vm2718_vm4 = vc.u32 %v2716_v37, %v2712_v44  ;;  %v2695_v31 = vadd.s32 %v2693_v0, %v2687_v49  ;;  %vm2696_vm5 = vc.u32 %v2694_v61, %v2690_v14 }
 0x4b0   :  { %v2719_v33 = vsel %vm2718_vm4, 1, %v5028_v60  ;;  %v2697_v46 = vsel %vm2696_vm5, 1, %v5028_v60  ;;  %v2528_v29 = vshrl.u32 %v2523_v2, 16  ;;  %v2550_v55 = vshrl.u32 %v2519_v9, 16 }
 0x4b1   :  { %v2721_v52 = vadd.s32 %v2719_v33, %v2717_v13  ;;  %v2699_v18 = vadd.s32 %v2697_v46, %v2695_v31  ;;  %v2713_v38 = vshrl.u32 %v2708_v11, 16  ;;  %v2513_v43 = vsel %vm2511_vm7, %v2501_v32, 2102212464 }
 0x4b2   :  { %v2549_v49 = vand.u32 65535, %v2519_v9  ;;  %v2691_v54 = vshrl.u32 %v2686_v50, 16  ;;  %v2530_v14 = vmul.u32 %v2528_v29, %v2525_v58  ;;  %v2531_v63 = vmul.u32 %v2527_v15, %v2526_v16 }
 0x4b3   :  { %v2722_v41 = vadd.s32 %v2721_v52, %v2711_v24  ;;  %v2700_v1 = vadd.s32 %v2699_v18, %v2689_v30  ;;  %v4663_v51 = vadd.s32 %v2716_v37, %v2712_v44  ;;  %v2724_v61 = vmul.u32 %v4591_v53, %v4641_v23 }
 0x4b4   :  { %v2552_v20 = vmul.u32 %v2550_v55, %v2525_v58  ;;  %v2529_v13 = vmul.u32 %v2527_v15, %v2525_v58  ;;  %v2532_v11 = vmul.u32 %v2528_v29, %v2526_v16  ;;  %v2533_v24 = vshll.u32 %v2530_v14, 16 }
 0x4b5   :  { %v2723_v56 = vadd.s32 %v2722_v41, %v2713_v38  ;;  %v4667_v0 = vadd.s32 %v2700_v1, %v2691_v54  ;;  %v2551_v33 = vmul.u32 %v2549_v49, %v2525_v58  ;;  %v2553_v32 = vmul.u32 %v2549_v49, %v2526_v16 }
 0x4b6   :  { %v2555_v9 = vshll.u32 %v2552_v20, 16  ;;  %v2535_v50 = vshll.u32 %v2531_v63, 16  ;;  %vm2537_vm8 = vc.u32 %v2529_v13, %v2533_v24  ;;  %v2539_v44 = vadd.s32 %v2533_v24, %v2529_v13 }
 0x4b7   :  { %v2727_v31 = vadd.s32 1, %v2723_v56  ;;  %vm2726_vm12 = vc.u32 %v4667_v0, %v4663_v51  ;;  %v2514_v53 = vsel %vm2510_vm1, %v4615_v42, %v2513_v43  ;;  %v2538_v23 = vsel %vm2537_vm8, 1, %v5028_v60 }
 0x4b8   :  { %v2554_v2 = vmul.u32 %v2550_v55, %v2526_v16  ;;  %v2540_v46 = vadd.s32 %v2538_v23, %v2532_v11  ;;  %vm2541_vm9 = vc.u32 %v2539_v44, %v2535_v50  ;;  %vm2559_vm7 = vc.u32 %v2551_v33, %v2555_v9 }
 0x4b9   :  { %v2728_v37 = vsel %vm2726_vm12, %v2727_v31, %v2723_v56  ;;  %v2542_v58 = vsel %vm2541_vm9, 1, %v5028_v60  ;;  %v2557_v52 = vshll.u32 %v2553_v32, 16  ;;  %v2560_v15 = vsel %vm2559_vm7, 1, %v5028_v60 }
 0x4ba   :  { %v2729_v30 = vadd.s32 %v2728_v37, %v2724_v61  ;;  %v2561_v18 = vadd.s32 %v2555_v9, %v2551_v33  ;;  %v2534_v38 = vshrl.u32 %v2530_v14, 16  ;;  %v2544_v41 = vadd.s32 %v2542_v58, %v2540_v46 }
 0x4bb   :  { %v2562_v49 = vadd.s32 %v2560_v15, %v2554_v2  ;;  %v2352_v42 = vor.u32 %v4587_v6, %v4583_v40  ;;  %v2515_v16 = vsel %vm2509_vm0, %v4634_v25, %v2514_v53  ;;  %v2536_v55 = vshrl.u32 %v2531_v63, 16 }
 0x4bc   :  { %v2730_v29 = vadd.s32 536870912, %v2729_v30  ;;  %vm2563_vm10 = vc.u32 %v2561_v18, %v2557_v52  ;;  %v2545_v54 = vadd.s32 %v2544_v41, %v2534_v38  ;;  %v2342_v56 = vshrl.u32 %v5030_v47, %v4550_v21 }
 0x4bd   :  { %v2564_v1 = vsel %vm2563_vm10, 1, %v5028_v60  ;;  %v2556_v14 = vshrl.u32 %v2552_v20, 16  ;;  %v2339_v13 = vshrl.u32 %v5007_v36, %v4550_v21  ;;  %v2345_v40 = vshrl.u32 %v5008_v62, %v4550_v21 }
 0x4be   :  { %v4682_v43 = vshrl.u32 %v2730_v29, 30  ;;  %v2566_v61 = vadd.s32 %v2564_v1, %v2562_v49  ;;  %v4692_v6 = vadd.s32 %v2545_v54, %v2536_v55  ;;  %v2341_v25 = vshll.u32 %v5007_v36, %v4531_v45 }
 0x4bf   :  { %v2344_v63 = vshll.u32 %v5030_v47, %v4531_v45  ;;  %vm2356_vm13 = vcmp.lt.s32.totalorder %v4576_v19, 4  ;;  %v2558_v20 = vshrl.u32 %v2553_v32, 16  ;;  %v2338_v24 = vshll.u32 %v5029_v8, %v4531_v45 }
 0x4c0   :  { %v2732_v59 = vshll.u32 %v4682_v43, 30  ;;  %v2567_v11 = vadd.s32 %v2566_v61, %v2556_v14  ;;  %v4701_v33 = vadd.s32 %v2561_v18, %v2557_v52  ;;  %v4703_v9 = vor.u32 %v2342_v56, %v2341_v25 }
 0x4c1   :  { %v4705_v50 = vor.u32 %v2345_v40, %v2344_v63  ;;  %v2362_v44 = vsel %vm2356_vm13, %v4593_v10, 920167782  ;;  %v2366_v37 = vsel %vm2356_vm13, %v2352_v42, 1326507024  ;;  %v2569_v32 = vmul.u32 %v4598_v12, %v2515_v16 }
 0x4c2   :  { %v2733_v31 = vsub.s32 %v2729_v30, %v2732_v59  ;;  %v2568_v53 = vadd.s32 %v2567_v11, %v2558_v20  ;;  %vm2571_vm6 = vc.u32 %v4692_v6, %v4701_v33  ;;  %v2340_v45 = vor.u32 %v2339_v13, %v2338_v24 }
 0x4c3   :  { %vm2353_vm15 = vcmp.lt.s32.totalorder %v4576_v19, 1  ;;  %vm2354_vm0 = vcmp.lt.s32.totalorder %v4576_v19, 2  ;;  %vm2355_vm1 = vcmp.lt.s32.totalorder %v4576_v19, 3  ;;  %v4727_v58 = vshll.u32 %v2329_v39, 8 }
 0x4c4   :  { %vm2734_vm14 = vcmp.lt.s32.totalorder %v2733_v31, 0  ;;  %v2735_v23 = vsub.s32 0, %v2733_v31  ;;  %v2572_v2 = vadd.s32 1, %v2568_v53  ;;  %v2365_v46 = vsel %vm2353_vm15, %v4703_v9, %v4705_v50 }
 0x4c5   :  { %v2367_v12 = vsel %vm2355_vm1, %v4593_v10, %v2366_v37  ;;  %vm2201_vm2 = vcmp.lt.s32.totalorder %v4560_v7, 4  ;;  %v2361_v10 = vsel %vm2353_vm15, %v2340_v45, %v4703_v9  ;;  %v2363_v4 = vsel %vm2355_vm1, %v4705_v50, %v2362_v44 }
 0x4c6   :  { %v2736_v30 = vsel %vm2734_vm14, %v2735_v23, %v2733_v31  ;;  %v2573_v15 = vsel %vm2571_vm6, %v2572_v2, %v2568_v53  ;;  %v2368_v18 = vsel %vm2354_vm0, %v2365_v46, %v2367_v12  ;;  %v4735_v29 = vsel %vm2201_vm2, %v4564_v26, 920167782 }
 0x4c7   :  { %v2737_v52 = vclz %v2736_v30  ;;  %v2574_v38 = vadd.s32 %v2573_v15, %v2569_v32  ;;  %v4748_v39 = vsel %vm2201_vm2, %v2197_v17, 1326507024  ;;  %v2755_v49 = vsub.s32 4, %v4682_v43 }
 0x4c8   :  { %v2372_v42 = vand.u32 65535, %v2368_v18  ;;  %vm2633_vm3 = vcmp.lt.s32.totalorder %v4535_v28, 0  ;;  %v2370_v55 = vand.u32 65535, %v4727_v58  ;;  %v2373_v54 = vshrl.u32 %v2368_v18, 16 }
 0x4c9   :  { %v2884_v41 = vadd.s32 4294967294, %v2737_v52  ;;  %v2575_v16 = vadd.s32 536870912, %v2574_v38  ;;  %v5056_v1 = vand.u32 2147483647, %v4535_v28  ;;  %v2364_v57 = vsel %vm2354_vm0, %v2361_v10, %v2363_v4 }
 0x4ca   :  { %v2371_v17 = vshrl.u32 %v4727_v58, 16  ;;  %v2725_v14 = vadd.s32 %v4663_v51, %v4667_v0  ;;  %v2375_v40 = vmul.u32 %v2373_v54, %v2370_v55  ;;  %v2756_v63 = vsel %vm2633_vm3, %v2755_v49, %v4682_v43 }
 0x4cb   :  { %vm4755_vm4 = vcmp.le.f32.partialorder %v5056_v1, 0.7853982  ;;  %vm2885_vm5 = vcmp.lt.s32.totalorder %v2884_v41, 0  ;;  %v4766_v13 = vshrl.u32 %v2575_v16, 30  ;;  %v2374_v11 = vmul.u32 %v2372_v42, %v2370_v55 }
 0x4cc   :  { %v2740_v61 = vsel %vm2885_vm5, 0, %v2884_v41  ;;  %v4771_v20 = vmul.u32 %v2372_v42, %v2371_v17  ;;  %v2378_v24 = vshll.u32 %v2375_v40, 16  ;;  %v2394_v44 = vand.u32 65535, %v2364_v57 }
 0x4cd   :  { %v2741_v59 = vsub.s32 32, %v2740_v61  ;;  %v2745_v25 = vsub.s32 4294967266, %v2740_v61  ;;  %v2577_v21 = vshll.u32 %v4766_v13, 30  ;;  %v2742_v37 = vshll.u32 %v2733_v31, %v2740_v61 }
 0x4ce   :  { %v2395_v0 = vshrl.u32 %v2364_v57, 16  ;;  %v2377_v23 = vmul.u32 %v2373_v54, %v2371_v17  ;;  %vm2382_vm12 = vc.u32 %v2374_v11, %v2378_v24  ;;  %v2384_v2 = vadd.s32 %v2378_v24, %v2374_v11 }
 0x4cf   :  { %v2743_v53 = vshrl.u32 %v2725_v14, %v2741_v59  ;;  %v2746_v51 = vadd.s32 127, %v2745_v25  ;;  %v4774_v32 = vsub.s32 %v2574_v38, %v2577_v21  ;;  %v2380_v43 = vshll.u32 %v4771_v20, 16 }
 0x4d0   :  { %v2383_v12 = vsel %vm2382_vm12, 1, %v5028_v60  ;;  %v2357_v31 = vsel %vm2353_vm15, %v2337_v35, %v2340_v45  ;;  %v2358_v38 = vsel %vm2356_vm13, %v4705_v50, 2102212464  ;;  %v2397_v10 = vmul.u32 %v2395_v0, %v2370_v55 }
 0x4d1   :  { %v2744_v30 = vor.u32 %v2743_v53, %v2742_v37  ;;  %v2747_v46 = vshll.u32 %v2746_v51, 23  ;;  %vm2579_vm8 = vcmp.lt.s32.totalorder %v4774_v32, 0  ;;  %v2580_v52 = vsub.s32 0, %v4774_v32 }
 0x4d2   :  { %v2385_v15 = vadd.s32 %v2383_v12, %v2377_v23  ;;  %vm2386_vm9 = vc.u32 %v2384_v2, %v2380_v43  ;;  %v2758_v4 = vsel %vm4755_vm4, 0, %v2756_v63  ;;  %v2398_v42 = vmul.u32 %v2394_v44, %v2371_v17 }
 0x4d3   :  { %v2748_v18 = vor.u32 4788187, %v2747_v46  ;;  %v2581_v41 = vsel %vm2579_vm8, %v2580_v52, %v4774_v32  ;;  %v2387_v49 = vsel %vm2386_vm9, 1, %v5028_v60  ;;  %v2751_v54 = vcvt.s32.f32 %v2744_v30 }
 0x4d4   :  { %v2570_v45 = vadd.s32 %v4701_v33, %v4692_v6  ;;  %v2582_v1 = vclz %v2581_v41  ;;  %v2359_v50 = vsel %vm2355_vm1, %v4703_v9, %v2358_v38  ;;  %v2389_v35 = vadd.s32 %v2387_v49, %v2385_v15 }
 0x4d5   :  { %v2749_v16 = vand.u32 2147483647, %v2748_v18  ;;  %v2396_v57 = vmul.u32 %v2394_v44, %v2370_v55  ;;  %v2400_v14 = vshll.u32 %v2397_v10, 16  ;;  %v2775_v59 = vadd.s32 3, %v2758_v4 }
 0x4d6   :  { %v2881_v25 = vadd.s32 4294967294, %v2582_v1  ;;  %v2379_v63 = vshrl.u32 %v2375_v40, 16  ;;  %vm2478_vm7 = vcmp.lt.s32.totalorder %v4522_v3, 0  ;;  %v2399_v21 = vmul.u32 %v2395_v0, %v2371_v17 }
 0x4d7   :  { %v2752_v61 = vmul.f32 %v2751_v54, %v2749_v16  ;;  %v2402_v11 = vshll.u32 %v2398_v42, 16  ;;  %vm2404_vm10 = vc.u32 %v2396_v57, %v2400_v14  ;;  %v2406_v24 = vadd.s32 %v2400_v14, %v2396_v57 }
 0x4d8   :  { %vm2882_vm13 = vcmp.lt.s32.totalorder %v2881_v25, 0  ;;  %v2360_v6 = vsel %vm2354_vm0, %v2357_v31, %v2359_v50  ;;  %v2405_v33 = vsel %vm2404_vm10, 1, %v5028_v60  ;;  %v2390_v55 = vadd.s32 %v2389_v35, %v2379_v63 }
 0x4d9   :  { %v2753_v37 = vxor.u32 2147483648, %v2752_v61  ;;  %v2585_v9 = vsel %vm2882_vm13, 0, %v2881_v25  ;;  %v2407_v44 = vadd.s32 %v2405_v33, %v2399_v21  ;;  %vm2408_vm14 = vc.u32 %v2406_v24, %v2402_v11 }
 0x4da   :  { %v2586_v53 = vsub.s32 32, %v2585_v9  ;;  %v2590_v51 = vsub.s32 4294967266, %v2585_v9  ;;  %v2600_v17 = vsub.s32 4, %v4766_v13  ;;  %v5059_v19 = vand.u32 2147483647, %v4522_v3 }
 0x4db   :  { %v2754_v40 = vsel %vm2633_vm3, %v2753_v37, %v2752_v61  ;;  %v2587_v2 = vshll.u32 %v4774_v32, %v2585_v9  ;;  %v2381_v30 = vshrl.u32 %v4771_v20, 16  ;;  %v2409_v46 = vsel %vm2408_vm14, 1, %v5028_v60 }
 0x4dc   :  { %v4804_v0 = vsel %vm4755_vm4, %v4535_v28, %v2754_v40  ;;  %vm4808_vm6 = vcmp.le.f32.partialorder %v5059_v19, 0.7853982  ;;  %v2588_v12 = vshrl.u32 %v2570_v45, %v2586_v53  ;;  %v2591_v52 = vadd.s32 127, %v2590_v51 }
 0x4dd   :  { %v2759_v43 = vmul.f32 %v4804_v0, %v4804_v0  ;;  %v2411_v56 = vadd.s32 %v2409_v46, %v2407_v44  ;;  %v4817_v31 = vand.u32 3, %v2775_v59  ;;  %v4819_v15 = vadd.s32 %v2390_v55, %v2381_v30 }
 0x4de   :  { %v2401_v18 = vshrl.u32 %v2397_v10, 16  ;;  %v2166_v38 = vand.u32 2147483647, %v4514_v5  ;;  %v2589_v32 = vor.u32 %v2588_v12, %v2587_v2  ;;  %v2592_v49 = vshll.u32 %v2591_v52, 23 }
 0x4df   :  { %v2760_v4 = vmul.f32 -0.001358992, %v2759_v43  ;;  %v2767_v41 = vmul.f32 -0.00019511016, %v2759_v43  ;;  %v2403_v20 = vshrl.u32 %v2398_v42, 16  ;;  %v4822_v16 = vadd.s32 %v2406_v24, %v2402_v11 }
 0x4e0   :  { %v2412_v54 = vadd.s32 %v2411_v56, %v2401_v18  ;;  %v2414_v1 = vmul.u32 %v4727_v58, %v2360_v6  ;;  %v2593_v35 = vor.u32 4788187, %v2592_v49  ;;  %v2601_v57 = vsel %vm2478_vm7, %v2600_v17, %v4766_v13 }
 0x4e1   :  { %v2761_v45 = vadd.f32 0.041655596, %v2760_v4  ;;  %v2768_v50 = vadd.f32 0.008332121, %v2767_v41  ;;  %v2596_v10 = vcvt.s32.f32 %v2589_v32  ;;  %vm2416_vm15 = vc.u32 %v4819_v15, %v4822_v16 }
 0x4e2   :  { %v2413_v14 = vadd.s32 %v2412_v54, %v2403_v20  ;;  %v2173_v42 = vand.u32 8388607, %v2166_v38  ;;  %v2594_v25 = vand.u32 2147483647, %v2593_v35  ;;  %v2187_v58 = vshrl.u32 %v5030_v47, %v4528_v34 }
 0x4e3   :  { %v2762_v61 = vmul.f32 %v2761_v45, %v2759_v43  ;;  %v2769_v59 = vmul.f32 %v2768_v50, %v2759_v43  ;;  %v2186_v21 = vshll.u32 %v5007_v36, %v4524_v48  ;;  %v2189_v13 = vshll.u32 %v5030_v47, %v4524_v48 }
 0x4e4   :  { %v2417_v63 = vadd.s32 1, %v2413_v14  ;;  %v2190_v11 = vshrl.u32 %v5008_v62, %v4528_v34  ;;  %v2597_v6 = vmul.f32 %v2596_v10, %v2594_v25  ;;  %v2603_v33 = vsel %vm4808_vm6, 0, %v2601_v57 }
 0x4e5   :  { %v2763_v24 = vadd.f32 -0.4999988, %v2762_v61  ;;  %v2770_v37 = vadd.f32 -0.16666654, %v2769_v59  ;;  %v2184_v55 = vshrl.u32 %v5007_v36, %v4528_v34  ;;  %v4844_v44 = vor.u32 %v2187_v58, %v2186_v21 }
 0x4e6   :  { %v2418_v9 = vsel %vm2416_vm15, %v2417_v63, %v2413_v14  ;;  %v4846_v40 = vor.u32 %v2190_v11, %v2189_v13  ;;  %vm2777_vm0 = vcmp.lt.s32.totalorder %v4817_v31, 2  ;;  %v2598_v47 = vxor.u32 2147483648, %v2597_v6 }
 0x4e7   :  { %v2764_v53 = vmul.f32 %v2763_v24, %v2759_v43  ;;  %v2771_v51 = vmul.f32 %v2770_v37, %v2759_v43  ;;  %v2419_v62 = vadd.s32 %v2418_v9, %v2414_v1  ;;  %vm2774_vm1 = vweird.f32 %v4535_v28 }
 0x4e8   :  { %v2620_v17 = vadd.s32 3, %v2603_v33  ;;  %v2174_v19 = vor.u32 8388608, %v2173_v42  ;;  %v2183_v2 = vshll.u32 %v5029_v8, %v4524_v48  ;;  %vm2198_vm3 = vcmp.lt.s32.totalorder %v4560_v7, 1 }
 0x4e9   :  { %v2765_v36 = vadd.f32 1.0, %v2764_v53  ;;  %v2772_v30 = vadd.f32 1.0, %v2771_v51  ;;  %v2599_v46 = vsel %vm2478_vm7, %v2598_v47, %v2597_v6  ;;  %v2420_v12 = vadd.s32 536870912, %v2419_v62 }
 0x4ea   :  { %v2602_v43 = vsel %vm4808_vm6, %v4522_v3, %v2599_v46  ;;  %v4858_v52 = vor.u32 %v2184_v55, %v2183_v2  ;;  %vm2200_vm4 = vcmp.lt.s32.totalorder %v4560_v7, 3  ;;  %v2210_v48 = vsel %vm2198_vm3, %v4844_v44, %v4846_v40 }
 0x4eb   :  { %v2773_v56 = vmul.f32 %v2772_v30, %v4804_v0  ;;  %v2782_v18 = vxor.u32 2147483648, %v2765_v36  ;;  %v2604_v4 = vmul.f32 %v2602_v43, %v2602_v43  ;;  %v4866_v41 = vshrl.u32 %v2420_v12, 30 }
 0x4ec   :  { %vm2778_vm5 = vcmp.eq.s32.totalorder %v4817_v31, 0  ;;  %vm2781_vm12 = vcmp.eq.s32.totalorder %v4817_v31, 2  ;;  %vm2199_vm8 = vcmp.lt.s32.totalorder %v4560_v7, 2  ;;  %v2212_v23 = vsel %vm2200_vm4, %v4564_v26, %v4748_v39 }
 0x4ed   :  { %v2779_v32 = vxor.u32 2147483648, %v2773_v56  ;;  %v2605_v49 = vmul.f32 -0.001358992, %v2604_v4  ;;  %v2612_v20 = vmul.f32 -0.00019511016, %v2604_v4  ;;  %v4875_v54 = vshll.u32 %v2174_v19, 8 }
 0x4ee   :  { %v4877_v0 = vand.u32 3, %v2620_v17  ;;  %v2422_v1 = vshll.u32 %v4866_v41, 30  ;;  %v2206_v45 = vsel %vm2198_vm3, %v4858_v52, %v4844_v44  ;;  %v2213_v50 = vsel %vm2199_vm8, %v2210_v48, %v2212_v23 }
 0x4ef   :  { %v2780_v35 = vsel %vm2778_vm5, %v2765_v36, %v2779_v32  ;;  %v2783_v57 = vsel %vm2781_vm12, %v2782_v18, %v2773_v56  ;;  %v2606_v26 = vadd.f32 0.041655596, %v2605_v49  ;;  %v2613_v39 = vadd.f32 0.008332121, %v2612_v20 }
 0x4f0   :  { %v2784_v10 = vsel %vm2777_vm0, %v2780_v35, %v2783_v57  ;;  %v4888_v14 = vsub.s32 %v2419_v62, %v2422_v1  ;;  %v2208_v42 = vsel %vm2200_vm4, %v4846_v40, %v4735_v29  ;;  %v2217_v61 = vand.u32 65535, %v2213_v50 }
 0x4f1   :  { %v2785_v59 = vsel %vm2774_vm1, nan, %v2784_v10  ;;  %v2607_v25 = vmul.f32 %v2606_v26, %v2604_v4  ;;  %v2614_v58 = vmul.f32 %v2613_v39, %v2604_v4  ;;  %v2215_v63 = vand.u32 65535, %v4875_v54 }
 0x4f2   :  { %2798 = vmatpush.msrb.mxu2 %v2785_v59  ;;  %vm2424_vm9 = vcmp.lt.s32.totalorder %v4888_v14, 0  ;;  %v2425_v31 = vsub.s32 0, %v4888_v14  ;;  %v2216_v21 = vshrl.u32 %v4875_v54, 16  ;;  %v2218_v13 = vshrl.u32 %v2213_v50, 16 }
 0x4f3   :  { %v2608_v11 = vadd.f32 -0.4999988, %v2607_v25  ;;  %v2615_v24 = vadd.f32 -0.16666654, %v2614_v58  ;;  %vm2622_vm7 = vcmp.lt.s32.totalorder %v4877_v0, 2  ;;  %v2209_v55 = vsel %vm2199_vm8, %v2206_v45, %v2208_v42 }
 0x4f4   :  { %v2426_v29 = vsel %vm2424_vm9, %v2425_v31, %v4888_v14  ;;  %v2220_v37 = vmul.u32 %v2218_v13, %v2215_v63  ;;  %v4901_v6 = vmul.u32 %v2217_v61, %v2216_v21  ;;  %vm2619_vm10 = vweird.f32 %v4522_v3 }
 0x4f5   :  { %v2609_v28 = vmul.f32 %v2608_v11, %v2604_v4  ;;  %v2616_v33 = vmul.f32 %v2615_v24, %v2604_v4  ;;  %v2427_v9 = vclz %v2426_v29  ;;  %vm2623_vm13 = vcmp.eq.s32.totalorder %v4877_v0, 0 }
 0x4f6   :  { %vm2626_vm14 = vcmp.eq.s32.totalorder %v4877_v0, 2  ;;  %v2219_v53 = vmul.u32 %v2217_v61, %v2215_v63  ;;  %v2223_v51 = vshll.u32 %v2220_v37, 16  ;;  %v2222_v19 = vmul.u32 %v2218_v13, %v2216_v21 }
 0x4f7   :  { %v2610_v47 = vadd.f32 1.0, %v2609_v28  ;;  %v2617_v62 = vadd.f32 1.0, %v2616_v33  ;;  %v2878_v17 = vadd.s32 4294967294, %v2427_v9  ;;  %v2225_v2 = vshll.u32 %v4901_v6, 16 }
 0x4f8   :  { %vm2227_vm6 = vc.u32 %v2219_v53, %v2223_v51  ;;  %v2229_v36 = vadd.s32 %v2223_v51, %v2219_v53  ;;  %v2239_v30 = vand.u32 65535, %v2209_v55  ;;  %v2240_v4 = vshrl.u32 %v2209_v55, 16 }
 0x4f9   :  { %v2618_v46 = vmul.f32 %v2617_v62, %v2602_v43  ;;  %v2627_v12 = vxor.u32 2147483648, %v2610_v47  ;;  %vm2879_vm15 = vcmp.lt.s32.totalorder %v2878_v17, 0  ;;  %v2228_v48 = vsel %vm2227_vm6, 1, %v5028_v60 }
 0x4fa   :  { %v2430_v56 = vsel %vm2879_vm15, 0, %v2878_v17  ;;  %v2230_v18 = vadd.s32 %v2228_v48, %v2222_v19  ;;  %vm2231_vm0 = vc.u32 %v2229_v36, %v2225_v2  ;;  %v2415_v49 = vadd.s32 %v4822_v16, %v4819_v15 }
 0x4fb   :  { %v2624_v23 = vxor.u32 2147483648, %v2618_v46  ;;  %v2628_v32 = vsel %vm2626_vm14, %v2627_v12, %v2618_v46  ;;  %v2431_v20 = vsub.s32 32, %v2430_v56  ;;  %v2432_v1 = vshll.u32 %v4888_v14, %v2430_v56 }
 0x4fc   :  { %v2435_v45 = vsub.s32 4294967266, %v2430_v56  ;;  %v2232_v43 = vsel %vm2231_vm0, 1, %v5028_v60  ;;  %v2242_v50 = vmul.u32 %v2240_v4, %v2215_v63  ;;  %v2241_v26 = vmul.u32 %v2239_v30, %v2215_v63 }
 0x4fd   :  { %v2625_v35 = vsel %vm2623_vm13, %v2610_v47, %v2624_v23  ;;  %v2433_v57 = vshrl.u32 %v2415_v49, %v2431_v20  ;;  %v2243_v39 = vmul.u32 %v2239_v30, %v2216_v21  ;;  %v2234_v61 = vadd.s32 %v2232_v43, %v2230_v18 }
 0x4fe   :  { %v2629_v10 = vsel %vm2622_vm7, %v2625_v35, %v2628_v32  ;;  %v2436_v42 = vadd.s32 127, %v2435_v45  ;;  %v2245_v59 = vshll.u32 %v2242_v50, 16  ;;  %v2224_v16 = vshrl.u32 %v2220_v37, 16 }
 0x4ff   :  { %v2630_v15 = vsel %vm2619_vm10, nan, %v2629_v10  ;;  %v2434_v14 = vor.u32 %v2433_v57, %v2432_v1  ;;  %v2244_v58 = vmul.u32 %v2240_v4, %v2216_v21  ;;  %v2247_v31 = vshll.u32 %v2243_v39, 16 }
 0x500   :  { %2799 = vmatpush.msrb.mxu2 %v2630_v15  ;;  %v2437_v25 = vshll.u32 %v2436_v42, 23  ;;  %vm2249_vm1 = vc.u32 %v2241_v26, %v2245_v59  ;;  %v2251_v63 = vadd.s32 %v2245_v59, %v2241_v26  ;;  %v2235_v24 = vadd.s32 %v2234_v61, %v2224_v16 }
 0x501   :  { %v2250_v13 = vsel %vm2249_vm1, 1, %v5028_v60  ;;  %v2182_v29 = vshrl.u32 %v5029_v8, %v4528_v34  ;;  %v2203_v3 = vsel %vm2201_vm2, %v4846_v40, 2102212464  ;;  %v2441_v28 = vcvt.s32.f32 %v2434_v14 }
 0x502   :  { %v2438_v11 = vor.u32 4788187, %v2437_v25  ;;  %v2252_v0 = vadd.s32 %v2250_v13, %v2244_v58  ;;  %vm2253_vm5 = vc.u32 %v2251_v63, %v2247_v31  ;;  %v2226_v21 = vshrl.u32 %v4901_v6, 16 }
 0x503   :  { %v2254_v33 = vsel %vm2253_vm5, 1, %v5028_v60  ;;  %v2246_v9 = vshrl.u32 %v2242_v50, 16  ;;  %v2202_v51 = vsel %vm2198_vm3, %v2182_v29, %v4858_v52  ;;  %v2204_v8 = vsel %vm2200_vm4, %v4844_v44, %v2203_v3 }
 0x504   :  { %v2439_v37 = vand.u32 2147483647, %v2438_v11  ;;  %v2256_v55 = vadd.s32 %v2254_v33, %v2252_v0  ;;  %v2236_v34 = vadd.s32 %v2235_v24, %v2226_v21  ;;  %v2248_v40 = vshrl.u32 %v2243_v39, 16 }
 0x505   :  { %v2255_v17 = vadd.s32 %v2251_v63, %v2247_v31  ;;  %vm2323_vm2 = vcmp.lt.s32.totalorder %v4518_v22, 0  ;;  %v2205_v60 = vsel %vm2199_vm8, %v2202_v51, %v2204_v8  ;;  %v5062_v19 = vand.u32 2147483647, %v4518_v22 }
 0x506   :  { %v2442_v53 = vmul.f32 %v2441_v28, %v2439_v37  ;;  %v2257_v47 = vadd.s32 %v2256_v55, %v2246_v9  ;;  %v2445_v44 = vsub.s32 4, %v4866_v41  ;;  %v2259_v7 = vmul.u32 %v4875_v54, %v2205_v60 }
 0x507   :  { %vm4942_vm12 = vcmp.le.f32.partialorder %v5062_v19, 0.7853982  ;;  %vm2261_vm3 = vc.u32 %v2236_v34, %v2255_v17  ;;  %vm2464_vm10 = vweird.f32 %v4518_v22  ;;  %v2260_v29 = vadd.s32 %v2255_v17, %v2236_v34 }
 0x508   :  { %v2443_v62 = vxor.u32 2147483648, %v2442_v53  ;;  %v2258_v6 = vadd.s32 %v2257_v47, %v2248_v40  ;;  %v2446_v4 = vsel %vm2323_vm2, %v2445_v44, %v4866_v41  ;;  %vm2168_vm14 = vcmp.lt.s32.totalorder %v4514_v5, 0 }
 0x509   :  { %v2448_v20 = vsel %vm4942_vm12, 0, %v2446_v4  ;;  %vm2167_vm6 = vcmp.le.f32.partialorder %v2166_v38, 0.7853982  ;;  %vm2309_vm5 = vweird.f32 %v4514_v5 }
 0x50a   :  { %v2444_v52 = vsel %vm2323_vm2, %v2443_v62, %v2442_v53  ;;  %v2262_v30 = vadd.s32 1, %v2258_v6  ;;  %v2465_v26 = vadd.s32 3, %v2448_v20 }
 0x50b   :  { %v2447_v36 = vsel %vm4942_vm12, %v4518_v22, %v2444_v52 }
 0x50c   :  { %v2449_v46 = vmul.f32 %v2447_v36, %v2447_v36  ;;  %v2263_v12 = vsel %vm2261_vm3, %v2262_v30, %v2258_v6  ;;  %v2466_v59 = vand.u32 3, %v2465_v26 }
 0x50d   :  { %v2264_v18 = vadd.s32 %v2263_v12, %v2259_v7 }
 0x50e   :  { %v2450_v48 = vmul.f32 -0.001358992, %v2449_v46  ;;  %v2457_v56 = vmul.f32 -0.00019511016, %v2449_v46  ;;  %vm2468_vm8 = vcmp.eq.s32.totalorder %v2466_v59, 0  ;;  %vm2471_vm9 = vcmp.eq.s32.totalorder %v2466_v59, 2 }
 0x50f   :  { %v2265_v49 = vadd.s32 536870912, %v2264_v18  ;;  %vm2467_vm7 = vcmp.lt.s32.totalorder %v2466_v59, 2 }
 0x510   :  { %v2451_v23 = vadd.f32 0.041655596, %v2450_v48  ;;  %v2458_v32 = vadd.f32 0.008332121, %v2457_v56 }
 0x511   :  { %v2266_v43 = vshrl.u32 %v2265_v49, 30 }
 0x512   :  { %v2452_v1 = vmul.f32 %v2451_v23, %v2449_v46  ;;  %v2459_v45 = vmul.f32 %v2458_v32, %v2449_v46 }
 0x513   :  { %v2267_v57 = vshll.u32 %v2266_v43, 30  ;;  %v2290_v62 = vsub.s32 4, %v2266_v43 }
 0x514   :  { %v2453_v50 = vadd.f32 -0.4999988, %v2452_v1  ;;  %v2460_v35 = vadd.f32 -0.16666654, %v2459_v45 }
 0x515   :  { %v2268_v10 = vsub.s32 %v2264_v18, %v2267_v57  ;;  %v2291_v19 = vsel %vm2168_vm14, %v2290_v62, %v2266_v43 }
 0x516   :  { %v2454_v54 = vmul.f32 %v2453_v50, %v2449_v46  ;;  %v2461_v39 = vmul.f32 %v2460_v35, %v2449_v46  ;;  %v2293_v44 = vsel %vm2167_vm6, 0, %v2291_v19  ;;  %v2917_v50 = vld [vmem:[%s4973_s5] sm:$0x3] }
 0x517   :  { %vm2269_vm4 = vcmp.lt.s32.totalorder %v2268_v10, 0  ;;  %v2270_v41 = vsub.s32 0, %v2268_v10  ;;  %v2310_v12 = vadd.s32 3, %v2293_v44 }
 0x518   :  { %v2455_v42 = vadd.f32 1.0, %v2454_v54  ;;  %v2462_v61 = vadd.f32 1.0, %v2461_v39 }
 0x519   :  { %v2271_v14 = vsel %vm2269_vm4, %v2270_v41, %v2268_v10  ;;  %v2311_v4 = vand.u32 3, %v2310_v12 }
 0x51a   :  { %v2463_v15 = vmul.f32 %v2462_v61, %v2447_v36  ;;  %v2472_v16 = vxor.u32 2147483648, %v2455_v42  ;;  %v2272_v25 = vclz %v2271_v14 }
 0x51b   :  { %vm2313_vm15 = vcmp.eq.s32.totalorder %v2311_v4, 0  ;;  %vm2316_vm0 = vcmp.eq.s32.totalorder %v2311_v4, 2  ;;  %vm2312_vm1 = vcmp.lt.s32.totalorder %v2311_v4, 2 }
 0x51c   :  { %v2469_v58 = vxor.u32 2147483648, %v2463_v15  ;;  %v2875_v31 = vadd.s32 4294967294, %v2272_v25  ;;  %v2473_v63 = vsel %vm2471_vm9, %v2472_v16, %v2463_v15 }
 0x51e   :  { %v2470_v13 = vsel %vm2468_vm8, %v2455_v42, %v2469_v58  ;;  %vm2876_vm13 = vcmp.lt.s32.totalorder %v2875_v31, 0 }
 0x51f   :  { %v2474_v11 = vsel %vm2467_vm7, %v2470_v13, %v2473_v63  ;;  %v2275_v0 = vsel %vm2876_vm13, 0, %v2875_v31 }
 0x520   :  { %v2475_v24 = vsel %vm2464_vm10, nan, %v2474_v11  ;;  %v2276_v3 = vsub.s32 32, %v2275_v0  ;;  %v2280_v37 = vsub.s32 4294967266, %v2275_v0  ;;  %v2277_v28 = vshll.u32 %v2268_v10, %v2275_v0 }
 0x521   :  { %2800 = vmatpush.msrb.mxu2 %v2475_v24 }
 0x522   :  { %v2278_v21 = vshrl.u32 %v2260_v29, %v2276_v3  ;;  %v2281_v33 = vadd.s32 127, %v2280_v37 }
 0x524   :  { %v2279_v9 = vor.u32 %v2278_v21, %v2277_v28  ;;  %v2282_v55 = vshll.u32 %v2281_v33, 23 }
 0x526   :  { %v2283_v53 = vor.u32 4788187, %v2282_v55  ;;  %v2286_v8 = vcvt.s32.f32 %v2279_v9 }
 0x528   :  { %v2284_v51 = vand.u32 2147483647, %v2283_v53 }
 0x52a   :  { %v2287_v40 = vmul.f32 %v2286_v8, %v2284_v51 }
 0x52c   :  { %v2288_v47 = vxor.u32 2147483648, %v2287_v40 }
 0x52e   :  { %v2289_v22 = vsel %vm2168_vm14, %v2288_v47, %v2287_v40 }
 0x52f   :  { %v2292_v34 = vsel %vm2167_vm6, %v4514_v5, %v2289_v22 }
 0x530   :  { %v2294_v17 = vmul.f32 %v2292_v34, %v2292_v34 }
 0x532   :  { %v2295_v60 = vmul.f32 -0.001358992, %v2294_v17  ;;  %v2302_v6 = vmul.f32 -0.00019511016, %v2294_v17 }
 0x534   :  { %v2296_v2 = vadd.f32 0.041655596, %v2295_v60  ;;  %v2303_v52 = vadd.f32 0.008332121, %v2302_v6 }
 0x536   :  { %v2297_v36 = vmul.f32 %v2296_v2, %v2294_v17  ;;  %v2304_v30 = vmul.f32 %v2303_v52, %v2294_v17 }
 0x538   :  { %v2298_v46 = vadd.f32 -0.4999988, %v2297_v36  ;;  %v2305_v7 = vadd.f32 -0.16666654, %v2304_v30 }
 0x53a   :  { %v2299_v48 = vmul.f32 %v2298_v46, %v2294_v17  ;;  %v2306_v56 = vmul.f32 %v2305_v7, %v2294_v17 }
 0x53c   :  { %v2300_v18 = vadd.f32 1.0, %v2299_v48  ;;  %v2307_v38 = vadd.f32 1.0, %v2306_v56 }
 0x53e   :  { %v2308_v23 = vmul.f32 %v2307_v38, %v2292_v34  ;;  %v2317_v32 = vxor.u32 2147483648, %v2300_v18 }
 0x540   :  { %v2314_v49 = vxor.u32 2147483648, %v2308_v23  ;;  %v2318_v1 = vsel %vm2316_vm0, %v2317_v32, %v2308_v23 }
 0x542   :  { %v2315_v20 = vsel %vm2313_vm15, %v2300_v18, %v2314_v49 }
 0x543   :  { %v2319_v45 = vsel %vm2312_vm1, %v2315_v20, %v2318_v1 }
 0x544   :  { %v2320_v43 = vsel %vm2309_vm5, nan, %v2319_v45 }
 0x545   :  { %2801 = vmatpush.msrb.mxu2 %v2320_v43 }
 0x546   :  { %2886 = vmatmul.msk.f32.vlgmr.msrb.gmra.mxu2 %vm752_vm11, %v2917_v50 }
 0x5c9   :  { %v2803_v35 = vpop.f32.mrf.mxu2 }
 0x5ca   :  { %v2804_v57 = vadd.f32 %v2803_v35, %v4061_v27 }
 0x5cc   :  { %2807 = vst [vmem:[#allocation2 + $0x2] sm:$0x3] %v2804_v57 }
 0x5cd   :  { %2818 = dma.vmem_to_hbm [thread:$0]  %s2814_s4, 64, %s2816_s9, [#allocation3]  }
 0x5ce   :  { %2942 = dma.done.wait [#allocation3], 64  }
 0x5cf   :  { %2943 = vsyncadd [#allocation3], 4294967232 }
 0x5d0   :  { %2823 = vsyncpa [#allocation3], 1 }

</bundles_post_ra>
